<compile_context>
chip_gen: v6e
topology: v6e:2x2x1
jax: 0.10.0
libtpu: 0.0.40
codegen_flags: <defaults>
</compile_context>

<pallas_src>
import functools

import jax
import jax.numpy as jnp
from jax import lax
from jax.experimental import pallas as pl
from jax.experimental.pallas import tpu as pltpu

LANE = 128  # TPU lane width; channel dims are padded to a multiple of this.


def _round_up(x, m):
    return (x + m - 1) // m * m


# ----------------------------- Pallas kernel -------------------------------


def _res_block_kernel(x_ref, w1_ref, b1_ref, w2_ref, b2_ref, o_ref, p_ref,
                      *, use_residual: bool):
    """One residual-unit repeat for one batch element (grid step = (n, r)).

    x_ref  : (H, W, C)           input image (bf16), resident across repeats
    w1_ref : (C, Cmid)           folded 1x1 conv weight for repeat r (bf16)
    b1_ref : (1, Cmid)           folded 1x1 conv bias (f32)
    w2_ref : (3, 3*Cmid, C)      folded 3x3 conv weight, per-dy fat-K (bf16)
    b2_ref : (1, C)              folded 3x3 conv bias (f32)
    o_ref  : (H, W, C)           running activation / output (bf16); same block
                                 across the repeat axis -> one HBM writeback
    p_ref  : (H+2, W, 3*Cmid)    bf16 scratch: dx-shifted padded patch tensor
    """
    H, W, C = x_ref.shape
    Cmid = w1_ref.shape[1]
    r = pl.program_id(1)

    # Seed the VMEM-resident running activation at the first repeat.
    @pl.when(r == 0)
    def _():
        o_ref[...] = x_ref[...]

    # Zero-fill the permanently-zero padding positions of the patch buffer
    # (rows 0 and H+1; the left column of the dx=0 slab; the right column of
    # the dx=2 slab). They are never overwritten, so once per image suffices.
    @pl.when(r == 0)
    def _():
        p_ref[0:1, :, :] = jnp.zeros((1, W, 3 * Cmid), p_ref.dtype)
        p_ref[H + 1:H + 2, :, :] = jnp.zeros((1, W, 3 * Cmid), p_ref.dtype)
        p_ref[1:H + 1, 0:1, 0:Cmid] = jnp.zeros((H, 1, Cmid), p_ref.dtype)
        p_ref[1:H + 1, W - 1:W, 2 * Cmid:3 * Cmid] = jnp.zeros(
            (H, 1, Cmid), p_ref.dtype)

    act = o_ref[...]                                      # (H, W, C) bf16

    # ---- conv1 (1x1) + folded BN + LeakyReLU(0.1) --------------------------
    z1 = jnp.dot(act.reshape(H * W, C), w1_ref[...],
                 preferred_element_type=jnp.float32) + b1_ref[...]
    z1 = jnp.maximum(z1, 0.1 * z1)
    mid = z1.reshape(H, W, Cmid).astype(p_ref.dtype)      # (H, W, Cmid) bf16

    # ---- scatter mid into the three dx-shifted lane slabs of P (built once) --
    p_ref[1:H + 1, 1:W, 0:Cmid] = mid[:, 0:W - 1, :]              # dx = 0
    p_ref[1:H + 1, :, Cmid:2 * Cmid] = mid                        # dx = 1
    p_ref[1:H + 1, 0:W - 1, 2 * Cmid:3 * Cmid] = mid[:, 1:W, :]   # dx = 2

    # ---- conv2 (3x3) as 3 fat-K matmuls, local f32 accumulator ------------
    acc = jnp.dot(p_ref[0:H, :, :].reshape(H * W, 3 * Cmid), w2_ref[0],
                  preferred_element_type=jnp.float32)
    acc = acc + jnp.dot(p_ref[1:H + 1, :, :].reshape(H * W, 3 * Cmid),
                        w2_ref[1], preferred_element_type=jnp.float32)
    acc = acc + jnp.dot(p_ref[2:H + 2, :, :].reshape(H * W, 3 * Cmid),
                        w2_ref[2], preferred_element_type=jnp.float32)

    z2 = acc + b2_ref[...]
    y = jnp.maximum(z2, 0.1 * z2)                         # LeakyReLU(0.1)
    if use_residual:
        y = y + act.reshape(H * W, C).astype(jnp.float32)
    o_ref[...] = y.reshape(H, W, C).astype(o_ref.dtype)


def _vmem_limit_bytes(H, W, Cp, Cmidp):
    """Rough VMEM budget: double-buffered blocks + scratch + transients."""
    bf16, f32 = 2, 4
    x_blk = H * W * Cp * bf16
    w1 = Cp * Cmidp * bf16
    b1 = Cmidp * f32
    w2 = 9 * Cmidp * Cp * bf16
    b2 = Cp * f32
    p_scr = (H + 2) * W * 3 * Cmidp * bf16
    pipelined = 2 * (2 * x_blk + w1 + b1 + w2 + b2)       # in + out blocks, 2x buffered
    transients = H * W * (Cmidp * (bf16 + f32) + 3 * Cp * f32)
    need = pipelined + p_scr + transients
    # 2x headroom, floor at the 32 MiB scoped default, cap below physical VMEM.
    return int(min(max(2 * need, 32 << 20), 96 << 20))


def residual_block_pallas(x_nhwc, w1_all, b1_all, w2_all, b2_all,
                          *, use_residual=True):
    """All repeats fused in one pallas_call. x_nhwc: (N, H, W, Cp) bf16."""
    N, H, W, Cp = x_nhwc.shape
    R = w1_all.shape[0]
    Cmidp = w1_all.shape[2]

    kernel = functools.partial(_res_block_kernel, use_residual=use_residual)

    return pl.pallas_call(
        kernel,
        out_shape=jax.ShapeDtypeStruct((N, H, W, Cp), x_nhwc.dtype),
        grid=(N, R),
        in_specs=[
            # Full image per batch element; block index only depends on n, so
            # it is DMA'd once per image and stays VMEM-resident across repeats.
            pl.BlockSpec((None, H, W, Cp), lambda n, r: (n, 0, 0, 0)),
            # Per-repeat folded weights/biases (pipelined along the r axis).
            pl.BlockSpec((None, Cp, Cmidp), lambda n, r: (r, 0, 0)),
            pl.BlockSpec((None, 1, Cmidp), lambda n, r: (r, 0, 0)),
            pl.BlockSpec((None, 3, 3 * Cmidp, Cp), lambda n, r: (r, 0, 0, 0)),
            pl.BlockSpec((None, 1, Cp), lambda n, r: (r, 0, 0)),
        ],
        # Output block ignores r -> acts as the running activation across
        # repeats; HBM writeback happens once per image.
        out_specs=pl.BlockSpec((None, H, W, Cp), lambda n, r: (n, 0, 0, 0)),
        scratch_shapes=[
            pltpu.VMEM((H + 2, W, 3 * Cmidp), jnp.bfloat16),  # patch tensor P
        ],
        compiler_params=pltpu.CompilerParams(
            dimension_semantics=("parallel", "arbitrary"),
            vmem_limit_bytes=_vmem_limit_bytes(H, W, Cp, Cmidp)),
    )(x_nhwc, w1_all, b1_all, w2_all, b2_all)


# --------------------------- parameter handling -----------------------------


def fold_bn_into_conv(w, b, gamma, beta, mean, var, eps=1e-5):
    """Fold inference-mode BatchNorm into a conv. w: (Cout, Cin, kh, kw)."""
    scale = gamma / jnp.sqrt(var + eps)
    w_f = w * scale[:, None, None, None]
    b_f = (b - mean) * scale + beta
    return w_f, b_f


def init_params(key, channels, num_repeats):
    """Deterministic synthetic parameters, mirroring the PyTorch module shapes.

    Returns (packed, raw): packed = kernel-layout stacks over repeats,
    raw = folded f32 conv params for the lax reference.
    """
    cmid = channels // 2
    c_p = _round_up(channels, LANE)
    cmid_p = _round_up(cmid, LANE)
    w1s, b1s, w2s, b2s, raw = [], [], [], [], []
    for _ in range(num_repeats):
        keys = jax.random.split(key, 13)
        key = keys[0]
        # Conv1: (cmid, channels, 1, 1) + bias (cmid) + BN stats
        w1 = jax.random.normal(keys[1], (cmid, channels, 1, 1), jnp.float32) * 0.1
        b1 = jax.random.normal(keys[2], (cmid,), jnp.float32) * 0.1
        g1 = 1.0 + 0.1 * jax.random.normal(keys[3], (cmid,), jnp.float32)
        be1 = 0.1 * jax.random.normal(keys[4], (cmid,), jnp.float32)
        m1 = 0.1 * jax.random.normal(keys[5], (cmid,), jnp.float32)
        v1 = jnp.abs(jax.random.normal(keys[6], (cmid,), jnp.float32)) * 0.5 + 0.5
        # Conv2: (channels, cmid, 3, 3) + bias (channels) + BN stats
        w2 = jax.random.normal(keys[7], (channels, cmid, 3, 3), jnp.float32) * 0.1
        b2 = jax.random.normal(keys[8], (channels,), jnp.float32) * 0.1
        g2 = 1.0 + 0.1 * jax.random.normal(keys[9], (channels,), jnp.float32)
        be2 = 0.1 * jax.random.normal(keys[10], (channels,), jnp.float32)
        m2 = 0.1 * jax.random.normal(keys[11], (channels,), jnp.float32)
        v2 = jnp.abs(jax.random.normal(keys[12], (channels,), jnp.float32)) * 0.5 + 0.5

        # Fold BN (inference mode) into conv weights/bias.
        w1f, b1f = fold_bn_into_conv(w1, b1, g1, be1, m1, v1)
        w2f, b2f = fold_bn_into_conv(w2, b2, g2, be2, m2, v2)
        raw.append(dict(w1=w1f, b1=b1f, w2=w2f, b2=b2f))

        # Kernel layout. Invariant: padded channels carry zero weights AND zero
        # bias, so padded lanes stay exactly zero through LeakyReLU + residual.
        # 1x1: (Cout, Cin, 1, 1) -> (Cin_p, Cout_p)
        w1t = jnp.transpose(w1f[:, :, 0, 0], (1, 0))                # (C, Cmid)
        w1s.append(jnp.zeros((c_p, cmid_p), jnp.float32)
                   .at[:channels, :cmid].set(w1t).astype(jnp.bfloat16))
        b1s.append(jnp.zeros((1, cmid_p), jnp.float32).at[0, :cmid].set(b1f))
        # 3x3: (Cout, Cin, 3, 3) -> (dy, dx, Cin, Cout) -> (3, 3*Cin_p, Cout_p)
        w2t = jnp.transpose(w2f, (2, 3, 1, 0))                      # (3,3,Cmid,C)
        w2p = (jnp.zeros((3, 3, cmid_p, c_p), jnp.float32)
               .at[:, :, :cmid, :channels].set(w2t))
        w2s.append(w2p.reshape(3, 3 * cmid_p, c_p).astype(jnp.bfloat16))
        b2s.append(jnp.zeros((1, c_p), jnp.float32).at[0, :channels].set(b2f))

    packed = dict(w1=jnp.stack(w1s), b1=jnp.stack(b1s),
                  w2=jnp.stack(w2s), b2=jnp.stack(b2s))
    return packed, raw


# ------------------------------- forward pass -------------------------------


def residual_block_forward(x_nchw, packed, use_residual=True):
    """Full ResidualBlock forward. Input/output are NCHW f32 (PyTorch layout)."""
    N, C, H, W = x_nchw.shape
    c_p = _round_up(C, LANE)
    x = jnp.transpose(x_nchw, (0, 2, 3, 1))                  # NCHW -> NHWC
    x = jnp.pad(x, ((0, 0), (0, 0), (0, 0), (0, c_p - C)))   # lane-dense channels
    x = x.astype(jnp.bfloat16)
    y = residual_block_pallas(x, packed["w1"], packed["b1"],
                              packed["w2"], packed["b2"],
                              use_residual=use_residual)
    y = y[..., :C].astype(jnp.float32)
    return jnp.transpose(y, (0, 3, 1, 2))                    # back to NCHW


def residual_block_reference(x_nchw, raw_params, use_residual=True):
    """Pure-JAX f32 reference (lax convs, BN already folded)."""
    dn = ("NCHW", "OIHW", "NCHW")
    x = x_nchw
    for p in raw_params:
        z1 = lax.conv_general_dilated(x, p["w1"], (1, 1), "VALID",
                                      dimension_numbers=dn)
        z1 = z1 + p["b1"][None, :, None, None]
        h = jnp.where(z1 >= 0, z1, 0.1 * z1)
        z2 = lax.conv_general_dilated(h, p["w2"], (1, 1), ((1, 1), (1, 1)),
                                      dimension_numbers=dn)
        z2 = z2 + p["b2"][None, :, None, None]
        y = jnp.where(z2 >= 0, z2, 0.1 * z2)
        x = y + x if use_residual else y
    return x


# ---------------------------------- main ------------------------------------

if __name__ == "__main__":
    N, C, H, W = 2, 4, 16, 16
    num_repeats = 2

    key = jax.random.PRNGKey(0)
    kx, kp = jax.random.split(key)
    x = jax.random.normal(kx, (N, C, H, W), jnp.float32)
    packed, raw = init_params(kp, C, num_repeats)

    out = residual_block_forward(x, packed, use_residual=True)
    out = jax.block_until_ready(out)

    ref = residual_block_reference(x, raw, use_residual=True)
    assert out.shape == (N, C, H, W)
    max_err = float(jnp.max(jnp.abs(out - ref)))
    # bf16 activations / weights with f32 accumulation -> loosened tolerance.
    assert jnp.allclose(out, ref, rtol=5e-2, atol=5e-2), \
        f"mismatch vs reference (max abs err {max_err})"

    print("KERNEL_OK")
</pallas_src>

<mosaic_0001>
module attributes {stable_mosaic.version = 11 : i64} {
  func.func @_res_block_kernel(%arg0: i32, %arg1: i32, %arg2: memref<1x16x16x128xbf16, #tpu.memory_space<vmem>>, %arg3: memref<1x128x128xbf16, #tpu.memory_space<vmem>>, %arg4: memref<1x1x128xf32, #tpu.memory_space<vmem>>, %arg5: memref<1x3x384x128xbf16, #tpu.memory_space<vmem>>, %arg6: memref<1x1x128xf32, #tpu.memory_space<vmem>>, %arg7: memref<1x16x16x128xbf16, #tpu.memory_space<vmem>>, %arg8: memref<18x16x384xbf16, #tpu.memory_space<vmem>>) attributes {dimension_semantics = [#tpu.dimension_semantics<parallel>, #tpu.dimension_semantics<arbitrary>], iteration_bounds = array<i64: 2, 2>, scalar_prefetch = 0 : i64, scratch_operands = 1 : i64, tpu.core_type = #tpu.core_type<tc>, window_params = [{transform_indices = @transform_0, window_bounds = array<i64: 1, 16, 16, 128>}, {transform_indices = @transform_1, window_bounds = array<i64: 1, 128, 128>}, {transform_indices = @transform_2, window_bounds = array<i64: 1, 1, 128>}, {transform_indices = @transform_3, window_bounds = array<i64: 1, 3, 384, 128>}, {transform_indices = @transform_4, window_bounds = array<i64: 1, 1, 128>}, {transform_indices = @transform_5, window_bounds = array<i64: 1, 16, 16, 128>}]} {
    %c0_i32 = arith.constant 0 : i32
    %0 = arith.cmpi eq, %arg1, %c0_i32 : i32
    %1 = arith.extui %0 : i1 to i32
    %c0_i32_0 = arith.constant 0 : i32
    %2 = arith.cmpi ne, %1, %c0_i32_0 : i32
    scf.if %2 {
      %c0_50 = arith.constant 0 : index
      %c0_51 = arith.constant 0 : index
      %c0_52 = arith.constant 0 : index
      %c0_53 = arith.constant 0 : index
      %58 = vector.load %arg2[%c0_50, %c0_51, %c0_52, %c0_53] : memref<1x16x16x128xbf16, #tpu.memory_space<vmem>>, vector<1x16x16x128xbf16>
      %59 = vector.shape_cast %58 : vector<1x16x16x128xbf16> to vector<16x16x128xbf16>
      %c0_54 = arith.constant 0 : index
      %c0_55 = arith.constant 0 : index
      %c0_56 = arith.constant 0 : index
      %c0_57 = arith.constant 0 : index
      %60 = vector.load %arg7[%c0_54, %c0_55, %c0_56, %c0_57] : memref<1x16x16x128xbf16, #tpu.memory_space<vmem>>, vector<1x16x16x128xbf16>
      %61 = vector.shape_cast %60 : vector<1x16x16x128xbf16> to vector<16x16x128xbf16>
      %62 = vector.shape_cast %59 : vector<16x16x128xbf16> to vector<1x16x16x128xbf16>
      tpu.vector_store %arg7[%c0_54, %c0_55, %c0_56, %c0_57], %62 {strides = array<i32>} : memref<1x16x16x128xbf16, #tpu.memory_space<vmem>>, vector<1x16x16x128xbf16>,
    } else {
    }
    %c0_i32_1 = arith.constant 0 : i32
    %3 = arith.cmpi eq, %arg1, %c0_i32_1 : i32
    %4 = arith.extui %3 : i1 to i32
    %c0_i32_2 = arith.constant 0 : i32
    %5 = arith.cmpi ne, %4, %c0_i32_2 : i32
    scf.if %5 {
      %cst_50 = arith.constant 0.000000e+00 : bf16
      %58 = vector.broadcast %cst_50 : bf16 to vector<1x16x384xbf16>
      %c0_51 = arith.constant 0 : index
      %c0_52 = arith.constant 0 : index
      %c0_53 = arith.constant 0 : index
      %59 = vector.load %arg8[%c0_51, %c0_52, %c0_53] : memref<18x16x384xbf16, #tpu.memory_space<vmem>>, vector<1x16x384xbf16>
      tpu.vector_store %arg8[%c0_51, %c0_52, %c0_53], %58 {strides = array<i32>} : memref<18x16x384xbf16, #tpu.memory_space<vmem>>, vector<1x16x384xbf16>,
      %cst_54 = arith.constant 0.000000e+00 : bf16
      %60 = vector.broadcast %cst_54 : bf16 to vector<1x16x384xbf16>
      %c17 = arith.constant 17 : index
      %c0_55 = arith.constant 0 : index
      %c0_56 = arith.constant 0 : index
      %61 = vector.load %arg8[%c17, %c0_55, %c0_56] : memref<18x16x384xbf16, #tpu.memory_space<vmem>>, vector<1x16x384xbf16>
      tpu.vector_store %arg8[%c17, %c0_55, %c0_56], %60 {strides = array<i32>} : memref<18x16x384xbf16, #tpu.memory_space<vmem>>, vector<1x16x384xbf16>,
      %cst_57 = arith.constant 0.000000e+00 : bf16
      %62 = vector.broadcast %cst_57 : bf16 to vector<16x1x128xbf16>
      %c1_58 = arith.constant 1 : index
      %c0_59 = arith.constant 0 : index
      %c0_60 = arith.constant 0 : index
      %63 = vector.load %arg8[%c1_58, %c0_59, %c0_60] : memref<18x16x384xbf16, #tpu.memory_space<vmem>>, vector<16x1x128xbf16>
      tpu.vector_store %arg8[%c1_58, %c0_59, %c0_60], %62 {strides = array<i32>} : memref<18x16x384xbf16, #tpu.memory_space<vmem>>, vector<16x1x128xbf16>,
      %cst_61 = arith.constant 0.000000e+00 : bf16
      %64 = vector.broadcast %cst_61 : bf16 to vector<16x1x128xbf16>
      %c1_62 = arith.constant 1 : index
      %c15 = arith.constant 15 : index
      %c256_63 = arith.constant 256 : index
      %65 = vector.load %arg8[%c1_62, %c15, %c256_63] : memref<18x16x384xbf16, #tpu.memory_space<vmem>>, vector<16x1x128xbf16>
      tpu.vector_store %arg8[%c1_62, %c15, %c256_63], %64 {strides = array<i32>} : memref<18x16x384xbf16, #tpu.memory_space<vmem>>, vector<16x1x128xbf16>,
    } else {
    }
    %c0 = arith.constant 0 : index
    %c0_3 = arith.constant 0 : index
    %c0_4 = arith.constant 0 : index
    %c0_5 = arith.constant 0 : index
    %6 = vector.load %arg7[%c0, %c0_3, %c0_4, %c0_5] : memref<1x16x16x128xbf16, #tpu.memory_space<vmem>>, vector<1x16x16x128xbf16>
    %7 = vector.shape_cast %6 : vector<1x16x16x128xbf16> to vector<16x16x128xbf16>
    %8 = vector.shape_cast %7 : vector<16x16x128xbf16> to vector<256x128xbf16>
    %c0_6 = arith.constant 0 : index
    %c0_7 = arith.constant 0 : index
    %c0_8 = arith.constant 0 : index
    %9 = vector.load %arg3[%c0_6, %c0_7, %c0_8] : memref<1x128x128xbf16, #tpu.memory_space<vmem>>, vector<1x128x128xbf16>
    %10 = vector.shape_cast %9 : vector<1x128x128xbf16> to vector<128x128xbf16>
    %cst = arith.constant dense<0.000000e+00> : vector<256x128xf32>
    %11 = tpu.matmul %8, %10, %cst {dimension_numbers = #tpu.dot_dimension_numbers<[1], [0], [0], [1], [0, 0, 1, 1], [], []>} : vector<256x128xbf16>, vector<128x128xbf16>, vector<256x128xf32> -> vector<256x128xf32>
    %c0_9 = arith.constant 0 : index
    %c0_10 = arith.constant 0 : index
    %c0_11 = arith.constant 0 : index
    %12 = vector.load %arg4[%c0_9, %c0_10, %c0_11] : memref<1x1x128xf32, #tpu.memory_space<vmem>>, vector<1x1x128xf32>
    %13 = vector.shape_cast %12 : vector<1x1x128xf32> to vector<1x128xf32>
    %14 = vector.broadcast %13 : vector<1x128xf32> to vector<256x128xf32>
    %15 = arith.addf %11, %14 : vector<256x128xf32>
    %cst_12 = arith.constant 1.000000e-01 : f32
    %16 = vector.broadcast %cst_12 : f32 to vector<256x128xf32>
    %17 = arith.mulf %16, %15 : vector<256x128xf32>
    %18 = arith.maximumf %15, %17 : vector<256x128xf32>
    %19 = vector.shape_cast %18 : vector<256x128xf32> to vector<16x16x128xf32>
    %20 = arith.truncf %19 : vector<16x16x128xf32> to vector<16x16x128xbf16>
    %21 = vector.extract_strided_slice %20 {offsets = [0, 0, 0], sizes = [16, 15, 128], strides = [1, 1, 1]} : vector<16x16x128xbf16> to vector<16x15x128xbf16>
    %c1 = arith.constant 1 : index
    %c1_13 = arith.constant 1 : index
    %c0_14 = arith.constant 0 : index
    %22 = vector.load %arg8[%c1, %c1_13, %c0_14] : memref<18x16x384xbf16, #tpu.memory_space<vmem>>, vector<16x15x128xbf16>
    tpu.vector_store %arg8[%c1, %c1_13, %c0_14], %21 {strides = array<i32>} : memref<18x16x384xbf16, #tpu.memory_space<vmem>>, vector<16x15x128xbf16>,
    %c1_15 = arith.constant 1 : index
    %c0_16 = arith.constant 0 : index
    %c128 = arith.constant 128 : index
    %23 = vector.load %arg8[%c1_15, %c0_16, %c128] : memref<18x16x384xbf16, #tpu.memory_space<vmem>>, vector<16x16x128xbf16>
    tpu.vector_store %arg8[%c1_15, %c0_16, %c128], %20 {strides = array<i32>} : memref<18x16x384xbf16, #tpu.memory_space<vmem>>, vector<16x16x128xbf16>,
    %24 = vector.extract_strided_slice %20 {offsets = [0, 1, 0], sizes = [16, 15, 128], strides = [1, 1, 1]} : vector<16x16x128xbf16> to vector<16x15x128xbf16>
    %c1_17 = arith.constant 1 : index
    %c0_18 = arith.constant 0 : index
    %c256 = arith.constant 256 : index
    %25 = vector.load %arg8[%c1_17, %c0_18, %c256] : memref<18x16x384xbf16, #tpu.memory_space<vmem>>, vector<16x15x128xbf16>
    tpu.vector_store %arg8[%c1_17, %c0_18, %c256], %24 {strides = array<i32>} : memref<18x16x384xbf16, #tpu.memory_space<vmem>>, vector<16x15x128xbf16>,
    %c0_19 = arith.constant 0 : index
    %c0_20 = arith.constant 0 : index
    %c0_21 = arith.constant 0 : index
    %26 = vector.load %arg8[%c0_19, %c0_20, %c0_21] : memref<18x16x384xbf16, #tpu.memory_space<vmem>>, vector<16x16x384xbf16>
    %27 = vector.shape_cast %26 : vector<16x16x384xbf16> to vector<256x384xbf16>
    %c0_22 = arith.constant 0 : index
    %c0_23 = arith.constant 0 : index
    %c0_24 = arith.constant 0 : index
    %c0_25 = arith.constant 0 : index
    %28 = vector.load %arg5[%c0_22, %c0_23, %c0_24, %c0_25] : memref<1x3x384x128xbf16, #tpu.memory_space<vmem>>, vector<1x1x384x128xbf16>
    %29 = vector.shape_cast %28 : vector<1x1x384x128xbf16> to vector<384x128xbf16>
    %cst_26 = arith.constant dense<0.000000e+00> : vector<256x128xf32>
    %30 = tpu.matmul %27, %29, %cst_26 {dimension_numbers = #tpu.dot_dimension_numbers<[1], [0], [0], [1], [0, 0, 1, 1], [], []>} : vector<256x384xbf16>, vector<384x128xbf16>, vector<256x128xf32> -> vector<256x128xf32>
    %c1_27 = arith.constant 1 : index
    %c0_28 = arith.constant 0 : index
    %c0_29 = arith.constant 0 : index
    %31 = vector.load %arg8[%c1_27, %c0_28, %c0_29] : memref<18x16x384xbf16, #tpu.memory_space<vmem>>, vector<16x16x384xbf16>
    %32 = vector.shape_cast %31 : vector<16x16x384xbf16> to vector<256x384xbf16>
    %c0_30 = arith.constant 0 : index
    %c1_31 = arith.constant 1 : index
    %c0_32 = arith.constant 0 : index
    %c0_33 = arith.constant 0 : index
    %33 = vector.load %arg5[%c0_30, %c1_31, %c0_32, %c0_33] : memref<1x3x384x128xbf16, #tpu.memory_space<vmem>>, vector<1x1x384x128xbf16>
    %34 = vector.shape_cast %33 : vector<1x1x384x128xbf16> to vector<384x128xbf16>
    %cst_34 = arith.constant dense<0.000000e+00> : vector<256x128xf32>
    %35 = tpu.matmul %32, %34, %cst_34 {dimension_numbers = #tpu.dot_dimension_numbers<[1], [0], [0], [1], [0, 0, 1, 1], [], []>} : vector<256x384xbf16>, vector<384x128xbf16>, vector<256x128xf32> -> vector<256x128xf32>
    %36 = arith.addf %30, %35 : vector<256x128xf32>
    %c2 = arith.constant 2 : index
    %c0_35 = arith.constant 0 : index
    %c0_36 = arith.constant 0 : index
    %37 = vector.load %arg8[%c2, %c0_35, %c0_36] : memref<18x16x384xbf16, #tpu.memory_space<vmem>>, vector<16x16x384xbf16>
    %38 = vector.shape_cast %37 : vector<16x16x384xbf16> to vector<256x384xbf16>
    %c0_37 = arith.constant 0 : index
    %c2_38 = arith.constant 2 : index
    %c0_39 = arith.constant 0 : index
    %c0_40 = arith.constant 0 : index
    %39 = vector.load %arg5[%c0_37, %c2_38, %c0_39, %c0_40] : memref<1x3x384x128xbf16, #tpu.memory_space<vmem>>, vector<1x1x384x128xbf16>
    %40 = vector.shape_cast %39 : vector<1x1x384x128xbf16> to vector<384x128xbf16>
    %cst_41 = arith.constant dense<0.000000e+00> : vector<256x128xf32>
    %41 = tpu.matmul %38, %40, %cst_41 {dimension_numbers = #tpu.dot_dimension_numbers<[1], [0], [0], [1], [0, 0, 1, 1], [], []>} : vector<256x384xbf16>, vector<384x128xbf16>, vector<256x128xf32> -> vector<256x128xf32>
    %42 = arith.addf %36, %41 : vector<256x128xf32>
    %c0_42 = arith.constant 0 : index
    %c0_43 = arith.constant 0 : index
    %c0_44 = arith.constant 0 : index
    %43 = vector.load %arg6[%c0_42, %c0_43, %c0_44] : memref<1x1x128xf32, #tpu.memory_space<vmem>>, vector<1x1x128xf32>
    %44 = vector.shape_cast %43 : vector<1x1x128xf32> to vector<1x128xf32>
    %45 = vector.broadcast %44 : vector<1x128xf32> to vector<256x128xf32>
    %46 = arith.addf %42, %45 : vector<256x128xf32>
    %cst_45 = arith.constant 1.000000e-01 : f32
    %47 = vector.broadcast %cst_45 : f32 to vector<256x128xf32>
    %48 = arith.mulf %47, %46 : vector<256x128xf32>
    %49 = arith.maximumf %46, %48 : vector<256x128xf32>
    %50 = vector.shape_cast %7 : vector<16x16x128xbf16> to vector<256x128xbf16>
    %51 = arith.extf %50 : vector<256x128xbf16> to vector<256x128xf32>
    %52 = arith.addf %49, %51 : vector<256x128xf32>
    %53 = vector.shape_cast %52 : vector<256x128xf32> to vector<16x16x128xf32>
    %54 = arith.truncf %53 : vector<16x16x128xf32> to vector<16x16x128xbf16>
    %c0_46 = arith.constant 0 : index
    %c0_47 = arith.constant 0 : index
    %c0_48 = arith.constant 0 : index
    %c0_49 = arith.constant 0 : index
    %55 = vector.load %arg7[%c0_46, %c0_47, %c0_48, %c0_49] : memref<1x16x16x128xbf16, #tpu.memory_space<vmem>>, vector<1x16x16x128xbf16>
    %56 = vector.shape_cast %55 : vector<1x16x16x128xbf16> to vector<16x16x128xbf16>
    %57 = vector.shape_cast %54 : vector<16x16x128xbf16> to vector<1x16x16x128xbf16>
    tpu.vector_store %arg7[%c0_46, %c0_47, %c0_48, %c0_49], %57 {strides = array<i32>} : memref<1x16x16x128xbf16, #tpu.memory_space<vmem>>, vector<1x16x16x128xbf16>,
    return
  }
  func.func @transform_0(%arg0: i32, %arg1: i32) -> (i32, i32, i32, i32) {
    %c0_i32 = arith.constant 0 : i32
    %c0_i32_0 = arith.constant 0 : i32
    %c0_i32_1 = arith.constant 0 : i32
    %c0_i32_2 = arith.constant 0 : i32
    return %arg0, %c0_i32, %c0_i32_0, %c0_i32_1 : i32, i32, i32, i32
  }
  func.func @transform_1(%arg0: i32, %arg1: i32) -> (i32, i32, i32) {
    %c0_i32 = arith.constant 0 : i32
    %c0_i32_0 = arith.constant 0 : i32
    %c0_i32_1 = arith.constant 0 : i32
    return %arg1, %c0_i32, %c0_i32_0 : i32, i32, i32
  }
  func.func @transform_2(%arg0: i32, %arg1: i32) -> (i32, i32, i32) {
    %c0_i32 = arith.constant 0 : i32
    %c0_i32_0 = arith.constant 0 : i32
    %c0_i32_1 = arith.constant 0 : i32
    return %arg1, %c0_i32, %c0_i32_0 : i32, i32, i32
  }
  func.func @transform_3(%arg0: i32, %arg1: i32) -> (i32, i32, i32, i32) {
    %c0_i32 = arith.constant 0 : i32
    %c0_i32_0 = arith.constant 0 : i32
    %c0_i32_1 = arith.constant 0 : i32
    %c0_i32_2 = arith.constant 0 : i32
    return %arg1, %c0_i32, %c0_i32_0, %c0_i32_1 : i32, i32, i32, i32
  }
  func.func @transform_4(%arg0: i32, %arg1: i32) -> (i32, i32, i32) {
    %c0_i32 = arith.constant 0 : i32
    %c0_i32_0 = arith.constant 0 : i32
    %c0_i32_1 = arith.constant 0 : i32
    return %arg1, %c0_i32, %c0_i32_0 : i32, i32, i32
  }
  func.func @transform_5(%arg0: i32, %arg1: i32) -> (i32, i32, i32, i32) {
    %c0_i32 = arith.constant 0 : i32
    %c0_i32_0 = arith.constant 0 : i32
    %c0_i32_1 = arith.constant 0 : i32
    %c0_i32_2 = arith.constant 0 : i32
    return %arg0, %c0_i32, %c0_i32_0, %c0_i32_1 : i32, i32, i32, i32
  }
}

</mosaic_0001>

<bundles_post_ra>
// kernel: tpu_custom_call.1
= control target key start
LH: loop header
LB: loop body
LE: loop exit
PB: predicated region body
PF: predicated region fallthrough
CT: control target
= control target key end

     0   :  { %s7886_s0 = inlined_call_operand.hbm [shape: bf16[2,16,16,128], index: 0, kind: input, shape index: {}]   ;;  %s7887_s1 = inlined_call_operand.hbm [shape: bf16[2,128,128], index: 1, kind: input, shape index: {}]   ;;  %s7888_s2 = inlined_call_operand.vmem [shape: f32[2,1,128], index: 2, kind: input, shape index: {}]   ;;  %s7889_s3 = inlined_call_operand.hbm [shape: bf16[2,3,384,128], index: 3, kind: input, shape index: {}]   ;;  %s7890_s4 = inlined_call_operand.vmem [shape: f32[2,1,128], index: 4, kind: input, shape index: {}]   ;;  %s7891_s5 = inlined_call_operand.hbm [shape: bf16[2,16,16,128], index: 5, kind: output, shape index: {}]  }
   0x1   :  { %7906 = sst [smem:[#allocation22_spill]] %s7887_s1 }
   0x2   :  { %7907 = sst [smem:[#allocation23_spill]] %s7888_s2 }
   0x3   :  { %7908 = sst [smem:[#allocation24_spill]] %s7890_s4 }
   0x4   :  { %7909 = sst [smem:[#allocation25_spill]] %s7891_s5 }
   0x5   :  { %10 = vsyncpa [#allocation4], 0 }
   0x6   :  { %12 = vsyncpa [#allocation4 + $0x1], 0 }
   0x7   :  { %13 = vsyncpa [#allocation7], 0 }
   0x8   :  { %15 = vsyncpa [#allocation7 + $0x1], 0 }
   0x9   :  { %16 = vsyncpa [#allocation5], 0 }
   0xa   :  { %18 = vsyncpa [#allocation5 + $0x1], 0  ;;  %s6606_s18 = smov 0   ;;  %s6608_s19 = smov 0  }
   0xb   :  { %s6610_s20 = smov 0   ;;  %s6612_s21 = smov 0  }
   0xc   :  { %s6614_s22 = smov 0   ;;  %s6616_s23 = smov 0  }
   0xd   :  { %s6618_s24 = smov 0   ;;  %s6620_s25 = smov 0  }
   0xe   :  { %s6622_s26 = smov 0   ;;  %s6624_s27 = smov 0  }
   0xf   :  { %s6626_s28 = smov 0  }
  0x10 LB: > { %7910 = sst [smem:[#allocation13_spill]] %s6533_s20  ;;  %s6660_s29 = sadd.s32 4294967295, %s6565_s28   ;;  %s6565_s28 = sphi %s6626_s28, %s24_s28   ;;  %s6561_s27 = sphi %s6624_s27, %s7960_s27   ;;  %s6557_s26 = sphi %s6622_s26, %s7967_s26   ;;  %s6553_s25 = sphi %s6620_s25, %s7958_s25   ;;  %s6549_s24 = sphi %s6618_s24, %s7966_s24   ;;  %s6545_s23 = sphi %s6616_s23, %s7965_s23   ;;  %s6541_s22 = sphi %s6614_s22, %s7964_s22   ;;  %s6537_s21 = sphi %s6612_s21, %s7963_s21   ;;  %s6533_s20 = sphi %s6610_s20, %s7956_s20   ;;  %s6529_s19 = sphi %s6608_s19, %s7962_s19   ;;  %s6525_s18 = sphi %s6606_s18, %s7961_s18  }
  0x11   : > { %7911 = sst [smem:[#allocation14_spill]] %s6537_s21  ;;  %s33_s30 = sadd.s32 1, %s6557_s26 }
  0x12   : > { %7912 = sst [smem:[#allocation15_spill]] %s6549_s24  ;;  %p6663_p0 = scmp.ge.s32.totalorder %s33_s30, 2 }
  0x13   : > { %7913 = sst [smem:[#allocation16_spill]] %s6553_s25  ;;  %p51_p1 = scmp.eq.s32.totalorder %s6565_s28, 0 }
  0x14   : > { %7914 = sst [smem:[#allocation17_spill]] %s6561_s27  ;;  %p7894_p2 = scmp.eq.s32.totalorder %s6660_s29, 0 }
  0x15   : > { %s69_s7 = sadd.s32 1, %s6533_s20  ;;  %s7969_s30 = smov (%p6663_p0, %s33_s30), 0 }
  0x16   : > { %7916 = sst [smem:[#allocation18_spill]] %s7969_s30  ;;  %p76_p3 = scmp.ne.s32.totalorder %s6533_s20, %s6529_s19 }
  0x17   : > { %p82_p4 = scmp.ne.s32.totalorder %s6529_s19, %s6525_s18  ;;  %s66_s8 = ssub.s32 %s6557_s26, %s7969_s30 }
  0x18   : > { %p67_p5 = scmp.eq.s32.totalorder %s66_s8, 0  ;;  %p78_p6 = por %p76_p3, %p51_p1 }
  0x19   : > { %p6683_p7 = por %p82_p4, %p7894_p2  ;;  %p7893_p8 = scmp.lt.s32.totalorder %s6565_s28, 4 }
  0x1a   : > { %s6689_s10 = scalar_select %p67_p5, %s6533_s20, %s69_s7  }
  0x1b   : > { %s231_s11 = sand.u32 1, %s6565_s28   ;;  %s233_s12 = sand.u32 1, %s6533_s20  }
  0x1c   : > { %7918 = sst [smem:[#allocation19_spill]] %s6689_s10  ;;  %s4758_s13 = sshll.u32 %s233_s12, 6 }
  0x1d   : > { %s5175_s14 = sshll.u32 %s6557_s26, 10  ;;  %s7919_s1 = sld [smem:[#allocation22_spill]] }
  0x1e   : > { %s235_s18 = scalar_lea.vmem [#allocation6], %s4758_s13  ;;  %p6701_p9 = pnand %p7893_p8, %p78_p6 }
  0x1f   : > { %s242_s8 = sshll.u32 %s235_s18, 4  ;;  %s6705_s7 = smul.u32 576, %s233_s12  ;;  %s243_s8 = int_to_ptr.vmem [resolvable:$true] %s242_s8 }
  0x20   : > { %p4762_p10 = scmp.ge.s32.totalorder %s6565_s28, 1  ;;  %p283_p11 = scmp.lt.s32.totalorder %s6565_s28, 5 }
  0x21   : > { %s6709_s10 = scalar_lea.sflag [#allocation7], %s231_s11  ;;  %p7897_p12 = pneg %p6701_p9 }
  0x22   : > { %s6567_s13 = smov [#allocation6]  }
  0x23   : > { %s6697_s17 = scalar_lea.hbm %s7919_s1, %s5175_s14  ;;  %s6370_s14 = scalar_lea.vmem %s243_s8, 1024 }
  0x24   : > { %p6371_p13 = scmp.ne.s32.totalorder %s243_s8, %s6370_s14  ;;  %s6375_s15 = sshll.u32 %s6567_s13, 4  ;;  %s6376_s15 = int_to_ptr.vmem [resolvable:$false] %s6375_s15 }
  0x25   : > { %s6377_s16 = scalar_lea.vmem %s6376_s15, 2048  ;;  %p6378_p5 = scmp.lt.s32.totalorder %s243_s8, %s6376_s15 }
  0x26   : > { %p6373_p3 = pnand %p6371_p13, %p7897_p12  ;;  %p6379_p6 = scmp.lt.s32.totalorder %s6377_s16, %s6370_s14 }
  0x28   : > { %p6374_p4 = pneg %p6373_p3  ;;  %p6380_p8 = por %p6379_p6, %p6378_p5 }
  0x2a   : > { %p6381_p2 = pnand %p6380_p8, %p6374_p4 }
  0x2c   : > { %6384 = shalt.err (!%p6381_p2)
}
  0x2d   : > { %s7895_s12 = smov 64   ;;  %s7898_s11 = smov 4  }
  0x2e   : > { %5977 = dma.hbm_to_vmem [thread:$0]  (!%p6701_p9), %s6697_s17, 1024, %s243_s8, %s6709_s10, %s7895_s12, %s7895_s12, %s7898_s11  }
  0x2f   : > { %p6727_p2 = pnand %p4762_p10, %p283_p11  ;;  %s4752_s14 = sadd.s32 4294967294, %s6565_s28  }
  0x30   : > { %s36_s13 = sadd.s32 1, %s6561_s27  ;;  %s43_s15 = sadd.s32 1, %s6545_s23 }
  0x31   : > { %s7971_s13 = smov (!%p6663_p0, %s36_s13), %s6561_s27  ;;  %p50_p8 = scmp.ne.s32.totalorder %s6545_s23, %s6541_s22 }
  0x32   : > { %p38_p13 = scmp.ge.s32.totalorder %s7971_s13, 2  ;;  %p56_p3 = scmp.ne.s32.totalorder %s6541_s22, %s6537_s21 }
  0x33   : > { %p6743_p4 = por %p51_p1, %p50_p8  ;;  %p184_p10 = scmp.eq.s32.totalorder %s6660_s29, 3 }
  0x34   : > { %s7973_s13 = smov (%p38_p13, %s7971_s13), 0  ;;  %p7924_p11 = scmp.eq.s32.totalorder %s6660_s29, 0 }
  0x35   : > { %7923 = sst [smem:[#allocation20_spill]] %s7973_s13  ;;  %p6756_p0 = por %p184_p10, %p50_p8 }
  0x36   : > { %p6752_p5 = por %p7924_p11, %p56_p3  ;;  %s40_s16 = ssub.s32 %s6561_s27, %s7973_s13 }
  0x37   : > { %p190_p1 = scmp.eq.s32.totalorder %s4752_s14, 3  ;;  %p41_p6 = scmp.eq.s32.totalorder %s40_s16, 0 }
  0x38   : > { %s210_s12 = sand.u32 1, %s6545_s23   ;;  %s5174_s21 = sshll.u32 %s6561_s27, 11 }
  0x39   : > { %p6763_p12 = por %p190_p1, %p56_p3  ;;  %s4755_s20 = sshll.u32 %s210_s12, 7 }
  0x3a   : > { %s6768_s1 = scalar_select %p41_p6, %s6545_s23, %s43_s15  }
  0x3b   : > { %s7927_s11 = scalar_select %p6763_p12, 1, 0 }
  0x3c   : > { %7928 = sst [smem:[#allocation21_spill]] %s6768_s1  ;;  %s220_s4 = scalar_lea.hbm %s7886_s0, %s5174_s21 }
  0x3d   : > { %s214_s2 = scalar_lea.vmem [#allocation3], %s4755_s20  ;;  %p7929_p8 = scmp.lt.s32.totalorder %s6565_s28, 4 }
  0x3e   : > { %s221_s24 = sshll.u32 %s214_s2, 4  ;;  %s5961_s16 = smul.u32 9216, %s6557_s26  ;;  %s222_s24 = int_to_ptr.vmem [resolvable:$true] %s221_s24 }
  0x3f   : > { %p6778_p13 = pnand %p7929_p8, %p6743_p4  ;;  %s262_s13 = scalar_lea.vmem [#allocation8], %s6705_s7 }
  0x40   : > { %s269_s15 = sshll.u32 %s262_s13, 4  ;;  %s211_s1 = scalar_lea.sflag [#allocation4], %s210_s12  ;;  %s270_s15 = int_to_ptr.vmem [resolvable:$true] %s269_s15 }
  0x41   : > { %p6387_p3 = pneg %p6778_p13  ;;  %s6398_s27 = scalar_lea.vmem %s222_s24, 2048 }
  0x42   : > { %p6399_p10 = scmp.ne.s32.totalorder %s222_s24, %s6398_s27  ;;  %s6570_s5 = smov [#allocation3]  }
  0x43   : > { %s6403_s2 = sshll.u32 %s6570_s5, 4  ;;  %s6404_s2 = int_to_ptr.vmem [resolvable:$false] %s6403_s2 }
  0x44   : > { %p6401_p11 = pnand %p6399_p10, %p6387_p3  ;;  %s6405_s20 = scalar_lea.vmem %s6404_s2, 4096 }
  0x45   : > { %p6406_p4 = scmp.lt.s32.totalorder %s222_s24, %s6404_s2  ;;  %p6407_p6 = scmp.lt.s32.totalorder %s6405_s20, %s6398_s27 }
  0x46   : > { %p6402_p1 = pneg %p6401_p11 }
  0x47   : > { %p6408_p8 = por %p6407_p6, %p6406_p4 }
  0x49   : > { %p6409_p12 = pnand %p6408_p8, %p6402_p1 }
  0x4b   : > { %6412 = shalt.err (!%p6409_p12)
}
  0x4c   : > { %s7931_s21 = smov 4   ;;  %s7932_s25 = smov 64  }
  0x4d   : > { %5974 = dma.hbm_to_vmem [thread:$0]  (!%p6778_p13), %s220_s4, 2048, %s222_s24, %s211_s1, %s7932_s25, %s7932_s25, %s7931_s21  }
  0x4e   : > { %s268_s13 = scalar_lea.hbm %s7889_s3, %s5961_s16  ;;  %s6426_s17 = scalar_lea.vmem %s270_s15, 9216 }
  0x4f   : > { %p6427_p3 = scmp.ne.s32.totalorder %s270_s15, %s6426_s17  ;;  %p7933_p10 = pneg %p6701_p9 }
  0x50   : > { %s6571_s27 = smov [#allocation8]  }
  0x51   : > { %p6429_p11 = pnand %p6427_p3, %p7933_p10  ;;  %s6431_s5 = sshll.u32 %s6571_s27, 4  ;;  %s6432_s5 = int_to_ptr.vmem [resolvable:$false] %s6431_s5 }
  0x52   : > { %s6433_s14 = scalar_lea.vmem %s6432_s5, 18432  ;;  %p6434_p12 = scmp.lt.s32.totalorder %s270_s15, %s6432_s5 }
  0x53   : > { %p6430_p4 = pneg %p6429_p11  ;;  %p6435_p1 = scmp.lt.s32.totalorder %s6433_s14, %s6426_s17 }
  0x55   : > { %p6436_p6 = por %p6435_p1, %p6434_p12 }
  0x57   : > { %p6437_p8 = pnand %p6436_p6, %p6430_p4 }
  0x59   : > { %6440 = shalt.err (!%p6437_p8)
}
  0x5a   : > { %5980 = dma.hbm_to_vmem [thread:$0]  (!%p6701_p9), %s268_s13, 9216, %s270_s15, %s6709_s10, %s7932_s25, %s7932_s25, %s7931_s21  }
  0x5b   : > { %287 = sbr.rel (%p6727_p2) target bundleno = 979 (0x3d3), region = 40  ;;  %s6806_s1 = sand.u32 (!%p6727_p2), 1, %s6541_s22  }
  0x5c   : > { %s4763_s4 = sshll.u32 (!%p6727_p2), %s6806_s1, 7  ;;  %s290_s24 = scalar_lea.sflag (!%p6727_p2), [#allocation4], %s6806_s1 }
  0x5d   : > { %s6810_s16 = scalar_lea.vmem (!%p6727_p2), [#allocation3], %s4763_s4 }
  0x60   : > { %6512 = dma.done.wait (%p6752_p5), %s290_s24, 2048  }
  0x61   : > { %6514 = vsyncadd (%p6752_p5), %s290_s24, 4294965248  ;;  %s298_s30 = sand.u32 1, %s6660_s29   ;;  %s300_s10 = sand.u32 1, %s6529_s19  }
  0x62   : > { %s4764_s18 = sshll.u32 %s300_s10, 6  ;;  %s299_s15 = scalar_lea.sflag [#allocation7], %s298_s30 }
  0x63   : > { %s6818_s2 = scalar_lea.vmem [#allocation6], %s4764_s18 }
  0x64   : > { %6516 = dma.done.wait (%p6683_p7), %s299_s15, 10240  }
  0x65   : > { %6518 = vsyncadd (%p6683_p7), %s299_s15, 4294957056  ;;  %s7934_s20 = sld [smem:[#allocation15_spill]]  ;;  %s5962_s21 = smul.u32 576, %s300_s10 }
  0x66   : > { %s7935_s29 = sld [smem:[#allocation23_spill]]  ;;  %s6840_s9 = scalar_lea.vmem [#allocation9], %s4763_s4 }
  0x67   : > { %s7936_s27 = sld [smem:[#allocation24_spill]]  ;;  %s6838_s14 = scalar_lea.vmem [#allocation8], %s5962_s21 }
  0x6b   : > { %p354_p9 = scmp.lt.s32.totalorder %s7934_s20, 1  ;;  %p4766_p7 = scmp.ne.s32.totalorder %s7934_s20, 0 }
  0x6d   : > { %s6826_s6 = scalar_select %p354_p9, %s7934_s20, 1 }
  0x6e   : > { %364 = sbr.rel (%p4766_p7) target bundleno = 153 (0x99), region = 56 }
  0x6f   : > { %s6832_s12 = scalar_lea.vmem %s7935_s29, %s6826_s6  ;;  %s359_s5 = scalar_lea.vmem %s7936_s27, %s6826_s6 }
  0x73   : > { %v365_v0 = vld [vmem:[%s6810_s16] sm:$0xff]   ;;  %v367_v1 = vld [vmem:[%s6810_s16 + $0x8] sm:$0xff]   ;;  %v369_v2 = vld [vmem:[%s6810_s16 + $0x10] sm:$0xff]   ;;  %v6572_v6 = vmov 0   ;;  %vm439_vm0 = vcmask 1040384   ;;  %vm490_vm4 = vcmask 1043459  }
  0x74   : > { %397 = vst [vmem:[%s6840_s9] sm:$0xff] %v365_v0   ;;  %399 = vst [vmem:[%s6840_s9 + $0x8] sm:$0xff] %v367_v1   ;;  %v371_v3 = vld [vmem:[%s6810_s16 + $0x18] sm:$0xff]   ;;  %v373_v4 = vld [vmem:[%s6810_s16 + $0x20] sm:$0xff]   ;;  %vm440_vm1 = vsmask.f32 256 }
  0x75   : > { %401 = vst [vmem:[%s6840_s9 + $0x10] sm:$0xff] %v369_v2   ;;  %v375_v5 = vld [vmem:[%s6810_s16 + $0x28] sm:$0xff]   ;;  %429 = vst [vmem:[#allocation2] sm:$0xff] %v6572_v6  ;;  %v377_v7 = vld [vmem:[%s6810_s16 + $0x30] sm:$0xff]   ;;  %vm491_vm3 = vsmask.f32 7950 }
  0x76   : > { %430 = vst [vmem:[#allocation2 + $0x8] sm:$0xf] %v6572_v6  ;;  %431 = vst [vmem:[#allocation2 + $0xc] sm:$0xff] %v6572_v6  ;;  %v379_v8 = vld [vmem:[%s6810_s16 + $0x38] sm:$0xff]   ;;  %v381_v9 = vld [vmem:[%s6810_s16 + $0x40] sm:$0xff]  }
  0x77   : > { %432 = vst [vmem:[#allocation2 + $0x14] sm:$0xf] %v6572_v6  ;;  %434 = vst [vmem:[#allocation2 + $0x198] sm:$0xff] %v6572_v6  ;;  %v383_v10 = vld [vmem:[%s6810_s16 + $0x48] sm:$0xff]   ;;  %v385_v11 = vld [vmem:[%s6810_s16 + $0x50] sm:$0xff]  }
  0x78   : > { %435 = vst [vmem:[#allocation2 + $0x1a0] sm:$0xf] %v6572_v6  ;;  %436 = vst [vmem:[#allocation2 + $0x1a4] sm:$0xff] %v6572_v6  ;;  %v387_v12 = vld [vmem:[%s6810_s16 + $0x58] sm:$0xff]   ;;  %v389_v13 = vld [vmem:[%s6810_s16 + $0x60] sm:$0xff]  }
  0x79   : > { %437 = vst [vmem:[#allocation2 + $0x1ac] sm:$0xf] %v6572_v6  ;;  %403 = vst [vmem:[%s6840_s9 + $0x18] sm:$0xff] %v371_v3   ;;  %v391_v14 = vld [vmem:[%s6810_s16 + $0x68] sm:$0xff]   ;;  %v393_v15 = vld [vmem:[%s6810_s16 + $0x70] sm:$0xff]  }
  0x7a   : > { %405 = vst [vmem:[%s6840_s9 + $0x20] sm:$0xff] %v373_v4   ;;  %407 = vst [vmem:[%s6840_s9 + $0x28] sm:$0xff] %v375_v5   ;;  %v395_v16 = vld [vmem:[%s6810_s16 + $0x78] sm:$0xff]   ;;  %v442_v18 = vld [vmem:[#allocation2 + $0x18] sm:$0x1] }
  0x7b   : > { %409 = vst [vmem:[%s6840_s9 + $0x30] sm:$0xff] %v377_v7   ;;  %411 = vst [vmem:[%s6840_s9 + $0x38] sm:$0xff] %v379_v8   ;;  %v445_v20 = vld [vmem:[#allocation2 + $0x30] sm:$0x1]  ;;  %v448_v21 = vld [vmem:[#allocation2 + $0x48] sm:$0x1] }
  0x7c   : > { %413 = vst [vmem:[%s6840_s9 + $0x40] sm:$0xff] %v381_v9   ;;  %415 = vst [vmem:[%s6840_s9 + $0x48] sm:$0xff] %v383_v10   ;;  %v451_v24 = vld [vmem:[#allocation2 + $0x60] sm:$0x1]  ;;  %v454_v25 = vld [vmem:[#allocation2 + $0x78] sm:$0x1] }
  0x7d   : > { %417 = vst [vmem:[%s6840_s9 + $0x50] sm:$0xff] %v385_v11   ;;  %419 = vst [vmem:[%s6840_s9 + $0x58] sm:$0xff] %v387_v12   ;;  %v457_v28 = vld [vmem:[#allocation2 + $0x90] sm:$0x1]  ;;  %v460_v29 = vld [vmem:[#allocation2 + $0xa8] sm:$0x1] }
  0x7e   : > { %421 = vst [vmem:[%s6840_s9 + $0x60] sm:$0xff] %v389_v13   ;;  %423 = vst [vmem:[%s6840_s9 + $0x68] sm:$0xff] %v391_v14   ;;  %v463_v32 = vld [vmem:[#allocation2 + $0xc0] sm:$0x1]  ;;  %v466_v33 = vld [vmem:[#allocation2 + $0xd8] sm:$0x1] }
  0x7f   : > { %425 = vst [vmem:[%s6840_s9 + $0x70] sm:$0xff] %v393_v15   ;;  %vm6876_vm2 = vmand %vm439_vm0, %vm440_vm1  ;;  %v469_v36 = vld [vmem:[#allocation2 + $0xf0] sm:$0x1]  ;;  %v472_v37 = vld [vmem:[#allocation2 + $0x108] sm:$0x1] }
  0x80   : > { %427 = vst [vmem:[%s6840_s9 + $0x78] sm:$0xff] %v395_v16   ;;  %v443_v19 = vsel %vm6876_vm2, 0, %v442_v18  ;;  %v446_v22 = vsel %vm6876_vm2, 0, %v445_v20  ;;  %v449_v23 = vsel %vm6876_vm2, 0, %v448_v21  ;;  %v452_v26 = vsel %vm6876_vm2, 0, %v451_v24  ;;  %vm6905_vm5 = vmand %vm490_vm4, %vm491_vm3 }
  0x81   : > { %444 = vst [vmem:[#allocation2 + $0x18] sm:$0x1] %v443_v19  ;;  %447 = vst [vmem:[#allocation2 + $0x30] sm:$0x1] %v446_v22  ;;  %v455_v27 = vsel %vm6876_vm2, 0, %v454_v25  ;;  %v458_v30 = vsel %vm6876_vm2, 0, %v457_v28 }
  0x82   : > { %450 = vst [vmem:[#allocation2 + $0x48] sm:$0x1] %v449_v23  ;;  %453 = vst [vmem:[#allocation2 + $0x60] sm:$0x1] %v452_v26  ;;  %v461_v31 = vsel %vm6876_vm2, 0, %v460_v29  ;;  %v464_v34 = vsel %vm6876_vm2, 0, %v463_v32 }
  0x83   : > { %456 = vst [vmem:[#allocation2 + $0x78] sm:$0x1] %v455_v27  ;;  %459 = vst [vmem:[#allocation2 + $0x90] sm:$0x1] %v458_v30  ;;  %v467_v35 = vsel %vm6876_vm2, 0, %v466_v33  ;;  %v470_v38 = vsel %vm6876_vm2, 0, %v469_v36 }
  0x84   : > { %462 = vst [vmem:[#allocation2 + $0xa8] sm:$0x1] %v461_v31  ;;  %465 = vst [vmem:[#allocation2 + $0xc0] sm:$0x1] %v464_v34  ;;  %v473_v39 = vsel %vm6876_vm2, 0, %v472_v37 }
  0x85   : > { %468 = vst [vmem:[#allocation2 + $0xd8] sm:$0x1] %v467_v35  ;;  %v475_v40 = vld [vmem:[#allocation2 + $0x120] sm:$0x1]  ;;  %v478_v41 = vld [vmem:[#allocation2 + $0x138] sm:$0x1] }
  0x86   : > { %471 = vst [vmem:[#allocation2 + $0xf0] sm:$0x1] %v470_v38  ;;  %474 = vst [vmem:[#allocation2 + $0x108] sm:$0x1] %v473_v39  ;;  %v476_v43 = vsel %vm6876_vm2, 0, %v475_v40  ;;  %v479_v44 = vsel %vm6876_vm2, 0, %v478_v41 }
  0x87   : > { %v481_v45 = vld [vmem:[#allocation2 + $0x150] sm:$0x1]  ;;  %v484_v46 = vld [vmem:[#allocation2 + $0x168] sm:$0x1]  ;;  %477 = vst [vmem:[#allocation2 + $0x120] sm:$0x1] %v476_v43 }
  0x88   : > { %480 = vst [vmem:[#allocation2 + $0x138] sm:$0x1] %v479_v44  ;;  %v482_v47 = vsel %vm6876_vm2, 0, %v481_v45  ;;  %v485_v48 = vsel %vm6876_vm2, 0, %v484_v46  ;;  %v487_v49 = vld [vmem:[#allocation2 + $0x180] sm:$0x1] }
  0x89   : > { %v493_v50 = vld [vmem:[#allocation2 + $0x2c] sm:$0x8]  ;;  %483 = vst [vmem:[#allocation2 + $0x150] sm:$0x1] %v482_v47  ;;  %486 = vst [vmem:[#allocation2 + $0x168] sm:$0x1] %v485_v48 }
  0x8a   : > { %v488_v51 = vsel %vm6876_vm2, 0, %v487_v49  ;;  %v494_v52 = vsel %vm6905_vm5, 0, %v493_v50  ;;  %v496_v53 = vld [vmem:[#allocation2 + $0x44] sm:$0x8]  ;;  %v499_v54 = vld [vmem:[#allocation2 + $0x5c] sm:$0x8] }
  0x8b   : > { %489 = vst [vmem:[#allocation2 + $0x180] sm:$0x1] %v488_v51  ;;  %495 = vst [vmem:[#allocation2 + $0x2c] sm:$0x8] %v494_v52  ;;  %v497_v55 = vsel %vm6905_vm5, 0, %v496_v53  ;;  %v500_v56 = vsel %vm6905_vm5, 0, %v499_v54 }
  0x8c   : > { %v502_v57 = vld [vmem:[#allocation2 + $0x74] sm:$0x8]  ;;  %v505_v58 = vld [vmem:[#allocation2 + $0x8c] sm:$0x8]  ;;  %498 = vst [vmem:[#allocation2 + $0x44] sm:$0x8] %v497_v55 }
  0x8d   : > { %501 = vst [vmem:[#allocation2 + $0x5c] sm:$0x8] %v500_v56  ;;  %v503_v59 = vsel %vm6905_vm5, 0, %v502_v57  ;;  %v506_v60 = vsel %vm6905_vm5, 0, %v505_v58  ;;  %v508_v61 = vld [vmem:[#allocation2 + $0xa4] sm:$0x8] }
  0x8e   : > { %v511_v62 = vld [vmem:[#allocation2 + $0xbc] sm:$0x8]  ;;  %504 = vst [vmem:[#allocation2 + $0x74] sm:$0x8] %v503_v59  ;;  %507 = vst [vmem:[#allocation2 + $0x8c] sm:$0x8] %v506_v60 }
  0x8f   : > { %v509_v63 = vsel %vm6905_vm5, 0, %v508_v61  ;;  %v512_v0 = vsel %vm6905_vm5, 0, %v511_v62  ;;  %v514_v1 = vld [vmem:[#allocation2 + $0xd4] sm:$0x8]  ;;  %v517_v2 = vld [vmem:[#allocation2 + $0xec] sm:$0x8] }
  0x90   : > { %510 = vst [vmem:[#allocation2 + $0xa4] sm:$0x8] %v509_v63  ;;  %513 = vst [vmem:[#allocation2 + $0xbc] sm:$0x8] %v512_v0  ;;  %v515_v3 = vsel %vm6905_vm5, 0, %v514_v1  ;;  %v518_v4 = vsel %vm6905_vm5, 0, %v517_v2 }
  0x91   : > { %v520_v5 = vld [vmem:[#allocation2 + $0x104] sm:$0x8]  ;;  %v523_v6 = vld [vmem:[#allocation2 + $0x11c] sm:$0x8]  ;;  %516 = vst [vmem:[#allocation2 + $0xd4] sm:$0x8] %v515_v3 }
  0x92   : > { %519 = vst [vmem:[#allocation2 + $0xec] sm:$0x8] %v518_v4  ;;  %v521_v7 = vsel %vm6905_vm5, 0, %v520_v5  ;;  %v524_v8 = vsel %vm6905_vm5, 0, %v523_v6  ;;  %v526_v9 = vld [vmem:[#allocation2 + $0x134] sm:$0x8] }
  0x93   : > { %v529_v10 = vld [vmem:[#allocation2 + $0x14c] sm:$0x8]  ;;  %522 = vst [vmem:[#allocation2 + $0x104] sm:$0x8] %v521_v7  ;;  %525 = vst [vmem:[#allocation2 + $0x11c] sm:$0x8] %v524_v8 }
  0x94   : > { %v527_v11 = vsel %vm6905_vm5, 0, %v526_v9  ;;  %v530_v12 = vsel %vm6905_vm5, 0, %v529_v10  ;;  %v532_v13 = vld [vmem:[#allocation2 + $0x164] sm:$0x8]  ;;  %v535_v14 = vld [vmem:[#allocation2 + $0x17c] sm:$0x8] }
  0x95   : > { %528 = vst [vmem:[#allocation2 + $0x134] sm:$0x8] %v527_v11  ;;  %531 = vst [vmem:[#allocation2 + $0x14c] sm:$0x8] %v530_v12  ;;  %v533_v15 = vsel %vm6905_vm5, 0, %v532_v13  ;;  %v536_v16 = vsel %vm6905_vm5, 0, %v535_v14 }
  0x96   : > { %v538_v17 = vld [vmem:[#allocation2 + $0x194] sm:$0x8]  ;;  %534 = vst [vmem:[#allocation2 + $0x164] sm:$0x8] %v533_v15  ;;  %537 = vst [vmem:[#allocation2 + $0x17c] sm:$0x8] %v536_v16 }
  0x97   : > { %v539_v18 = vsel %vm6905_vm5, 0, %v538_v17 }
  0x98   : > { %540 = vst [vmem:[#allocation2 + $0x194] sm:$0x8] %v539_v18 }
  0x99 PF: > { %v6080_v19 = vld [vmem:[%s6818_s2 + $0x38] sm:$0xff]   ;;  %v6081_v20 = vld [vmem:[%s6818_s2 + $0x30] sm:$0xff]   ;;  %v6082_v21 = vld [vmem:[%s6818_s2 + $0x28] sm:$0xff]   ;;  %vm1353_vm6 = vcmask 1043456   ;;  %vm1354_vm7 = vsmask.f32 7938 }
  0x9a   : > { %5768 = vmatprep.subr.bf16.mxu0 %v6080_v19  ;;  %v6083_v22 = vld [vmem:[%s6818_s2 + $0x20] sm:$0xff]   ;;  %v6084_v24 = vld [vmem:[%s6818_s2 + $0x18] sm:$0xff]   ;;  %v6085_v25 = vld [vmem:[%s6818_s2 + $0x10] sm:$0xff]   ;;  %vm1484_vm8 = vsmask.f32 3328  ;;  %s7950_s30 = sld [smem:[#allocation16_spill]] }
  0x9b   : > { %5769 = vmatpush3.bf16.msra.mxu0 %v6080_v19  ;;  %v541_v23 = vld [vmem:[%s6840_s9] sm:$0xff]   ;;  %v6086_v26 = vld [vmem:[%s6818_s2 + $0x8] sm:$0xff]   ;;  %v545_v29 = vld [vmem:[%s6840_s9 + $0x10] sm:$0xff]   ;;  %vm1485_vm9 = vsmask.f32 7440  ;;  %s4606_s18 = sshll.u32 %s6840_s9, 4  ;;  %s7823_s18 = int_to_ptr.vmem [resolvable:$true] %s4606_s18 }
  0x9c   : > { %5770 = vmatprep.subr.bf16.mxu0 %v6081_v20  ;;  %5784 = vmatprep.mubr.bf16.mxu0 %v541_v23  ;;  %v6087_v27 = vld [vmem:[%s6818_s2] sm:$0xff]   ;;  %v543_v28 = vld [vmem:[%s6840_s9 + $0x8] sm:$0xff]   ;;  %v547_v30 = vld [vmem:[%s6840_s9 + $0x18] sm:$0xff]   ;;  %vm1061_vm10 = vsmask.f32 256  ;;  %s7951_s20 = sld [smem:[#allocation25_spill]] }
  0x9d   : > { %v549_v31 = vld [vmem:[%s6840_s9 + $0x20] sm:$0xff]   ;;  %v551_v32 = vld [vmem:[%s6840_s9 + $0x28] sm:$0xff]   ;;  %v553_v33 = vld [vmem:[%s6840_s9 + $0x30] sm:$0xff]   ;;  %vm1062_vm11 = vsmask.f32 4368  ;;  %s4593_s25 = scalar_lea.sflag [#allocation5], %s6806_s1 }
  0x9e   : > { %v555_v34 = vld [vmem:[%s6840_s9 + $0x38] sm:$0xff]   ;;  %v557_v35 = vld [vmem:[%s6840_s9 + $0x40] sm:$0xff]   ;;  %v559_v36 = vld [vmem:[%s6840_s9 + $0x48] sm:$0xff]   ;;  %s6441_s7 = scalar_lea.vmem %s7823_s18, 2048  ;;  %s6573_s29 = smov [#allocation9]  }
  0x9f   : > { %5771 = vmatpush3.bf16.msra.mxu0 %v6081_v20  ;;  %v561_v37 = vld [vmem:[%s6840_s9 + $0x50] sm:$0xff]   ;;  %v563_v38 = vld [vmem:[%s6840_s9 + $0x58] sm:$0xff]   ;;  %v565_v39 = vld [vmem:[%s6840_s9 + $0x60] sm:$0xff]   ;;  %p6442_p2 = scmp.ne.s32.totalorder %s7823_s18, %s6441_s7 }
  0xa0   : > { %5772 = vmatprep.subr.bf16.mxu0 %v6082_v21  ;;  %v567_v40 = vld [vmem:[%s6840_s9 + $0x68] sm:$0xff]   ;;  %v569_v41 = vld [vmem:[%s6840_s9 + $0x70] sm:$0xff]   ;;  %v571_v42 = vld [vmem:[%s6840_s9 + $0x78] sm:$0xff]   ;;  %s5240_s10 = sshll.u32 %s7950_s30, 11 }
  0xa1   : > { %v6104_v43 = vld [vmem:[%s6838_s14 + $0x138] sm:$0xff]   ;;  %v6107_v46 = vld [vmem:[%s6838_s14 + $0x130] sm:$0xff]   ;;  %v6110_v49 = vld [vmem:[%s6838_s14 + $0x128] sm:$0xff]   ;;  %p6443_p5 = pnand %p6442_p2, %p6756_p0 }
  0xa2   : > { %v6105_v44 = vld [vmem:[%s6838_s14 + $0xf8] sm:$0xff]   ;;  %5360 = vmatprep.subr.bf16.mxu1 %v6104_v43  ;;  %v6108_v47 = vld [vmem:[%s6838_s14 + $0xf0] sm:$0xff]   ;;  %v6111_v50 = vld [vmem:[%s6838_s14 + $0xe8] sm:$0xff]   ;;  %s7952_s6 = smov %s7951_s20  ;;  %s7821_s21 = scalar_lea.hbm %s7951_s20, %s5240_s10 }
  0xa3   : > { %5773 = vmatpush3.bf16.msra.mxu0 %v6082_v21  ;;  %v6106_v45 = vld [vmem:[%s6838_s14 + $0x178] sm:$0xff]   ;;  %5361 = vmatpush3.bf16.msra.mxu1 %v6105_v44  ;;  %v6109_v48 = vld [vmem:[%s6838_s14 + $0x170] sm:$0xff]   ;;  %v6112_v51 = vld [vmem:[%s6838_s14 + $0x168] sm:$0xff]   ;;  %p6444_p13 = pneg %p6443_p5 }
  0xa4   : > { %5774 = vmatprep.subr.bf16.mxu0 %v6083_v22  ;;  %5362 = vmatprep.subr.bf16.mxu1 %v6107_v46  ;;  %v6113_v52 = vld [vmem:[%s6838_s14 + $0x120] sm:$0xff]   ;;  %v6116_v55 = vld [vmem:[%s6838_s14 + $0x118] sm:$0xff]   ;;  %v6119_v58 = vld [vmem:[%s6838_s14 + $0x110] sm:$0xff]  }
  0xa5   : > { %v6114_v53 = vld [vmem:[%s6838_s14 + $0xe0] sm:$0xff]   ;;  %v6117_v56 = vld [vmem:[%s6838_s14 + $0xd8] sm:$0xff]   ;;  %v6120_v59 = vld [vmem:[%s6838_s14 + $0xd0] sm:$0xff]  }
  0xa6   : > { %v6115_v54 = vld [vmem:[%s6838_s14 + $0x160] sm:$0xff]   ;;  %v6118_v57 = vld [vmem:[%s6838_s14 + $0x158] sm:$0xff]   ;;  %v6121_v60 = vld [vmem:[%s6838_s14 + $0x150] sm:$0xff]  }
  0xa7   : > { %5775 = vmatpush3.bf16.msra.mxu0 %v6083_v22  ;;  %5363 = vmatpush3.bf16.msra.mxu1 %v6108_v47  ;;  %v6122_v61 = vld [vmem:[%s6838_s14 + $0x108] sm:$0xff]   ;;  %v6125_v0 = vld [vmem:[%s6838_s14 + $0x100] sm:$0xff]   ;;  %v7000_v3 = vld [vmem:[%s6838_s14 + $0xb8] sm:$0xff]  }
  0xa8   : > { %5776 = vmatprep.subr.bf16.mxu0 %v6084_v24  ;;  %5364 = vmatprep.subr.bf16.mxu1 %v6110_v49  ;;  %v6123_v62 = vld [vmem:[%s6838_s14 + $0xc8] sm:$0xff]   ;;  %v6126_v1 = vld [vmem:[%s6838_s14 + $0xc0] sm:$0xff]   ;;  %v6157_v4 = vld [vmem:[%s6838_s14 + $0x78] sm:$0xff]  }
  0xa9   : > { %v6124_v63 = vld [vmem:[%s6838_s14 + $0x148] sm:$0xff]   ;;  %v6127_v2 = vld [vmem:[%s6838_s14 + $0x140] sm:$0xff]   ;;  %v7005_v5 = vld [vmem:[%s6832_s12] ss:$0 sm:$0xff] }
  0xaa   : > { %vm7014_vm12 = vmand %vm1353_vm6, %vm1354_vm7  ;;  %v1356_v43 = vld [vmem:[#allocation2 + $0x18] sm:$0xf] }
  0xab   : > { %5777 = vmatpush3.bf16.msra.mxu0 %v6084_v24  ;;  %5365 = vmatpush3.bf16.msra.mxu1 %v6111_v50  ;;  %vm7026_vm13 = vmor %vm1484_vm8, %vm1485_vm9 }
  0xac   : > { %5778 = vmatprep.subr.bf16.mxu0 %v6085_v25  ;;  %5366 = vmatprep.subr.bf16.mxu1 %v6113_v52  ;;  %vm7034_vm14 = vmor %vm1061_vm10, %vm1062_vm11 }
  0xad   : > { %vm7045_vm15 = vmand %vm1353_vm6, %vm1484_vm8 }
  0xaf   : > { %5779 = vmatpush3.bf16.msra.mxu0 %v6085_v25  ;;  %5367 = vmatpush3.bf16.msra.mxu1 %v6114_v53 }
  0xb0   : > { %5780 = vmatprep.subr.bf16.mxu0 %v6086_v26  ;;  %5368 = vmatprep.subr.bf16.mxu1 %v6116_v55 }
  0xb3   : > { %5781 = vmatpush3.bf16.msra.mxu0 %v6086_v26  ;;  %5369 = vmatpush3.bf16.msra.mxu1 %v6117_v56 }
  0xb4   : > { %5782 = vmatprep.subr.bf16.mxu0 %v6087_v27  ;;  %5370 = vmatprep.subr.bf16.mxu1 %v6119_v58 }
  0xb7   : > { %5783 = vmatpush3.bf16.msra.mxu0 %v6087_v27  ;;  %5371 = vmatpush3.bf16.msra.mxu1 %v6120_v59 }
  0xb8   : > { %5816 = vmatprep.subr.bf16.mxu0 %v6106_v45  ;;  %5372 = vmatprep.subr.bf16.mxu1 %v6122_v61 }
  0xba   : > { %5785 = vmatmul.mubr.bf16.vlgmr.msra.gmra.mxu0 %v543_v28 }
  0xbb   : > { %5788 = vmatprep.mubr.bf16.mxu0 %v545_v29  ;;  %5817 = vmatpush3.bf16.msra.mxu0 %v6106_v45 }
  0xbc   : > { %5818 = vmatprep.subr.bf16.mxu0 %v6109_v48  ;;  %5373 = vmatpush3.bf16.msra.mxu1 %v6123_v62 }
  0xbd   : > { %5374 = vmatprep.subr.bf16.mxu1 %v6125_v0 }
  0xbf   : > { %5819 = vmatpush3.bf16.msra.mxu0 %v6109_v48 }
  0xc0   : > { %5820 = vmatprep.subr.bf16.mxu0 %v6112_v51  ;;  %5375 = vmatpush3.bf16.msra.mxu1 %v6126_v1 }
  0xc1   : > { %5864 = vmatprep.subr.bf16.mxu1 %v7000_v3 }
  0xc2   : > { %5789 = vmatmul.mubr.bf16.gmra.mxu0 %v547_v30 }
  0xc3   : > { %5792 = vmatprep.mubr.bf16.mxu0 %v549_v31  ;;  %5821 = vmatpush3.bf16.msra.mxu0 %v6112_v51 }
  0xc4   : > { %5822 = vmatprep.subr.bf16.mxu0 %v6115_v54 }
  0xc7   : > { %5823 = vmatpush3.bf16.msra.mxu0 %v6115_v54 }
  0xc8   : > { %5824 = vmatprep.subr.bf16.mxu0 %v6118_v57 }
  0xca   : > { %5793 = vmatmul.mubr.bf16.gmra.mxu0 %v551_v32 }
  0xcb   : > { %5796 = vmatprep.mubr.bf16.mxu0 %v553_v33  ;;  %5825 = vmatpush3.bf16.msra.mxu0 %v6118_v57  ;;  %v1360_v33 = vld [vmem:[#allocation2 + $0x30] sm:$0xf] }
  0xcc   : > { %5826 = vmatprep.subr.bf16.mxu0 %v6121_v60 }
  0xcf   : > { %5827 = vmatpush3.bf16.msra.mxu0 %v6121_v60 }
  0xd0   : > { %5828 = vmatprep.subr.bf16.mxu0 %v6124_v63 }
  0xd2   : > { %5797 = vmatmul.mubr.bf16.gmra.mxu0 %v555_v34 }
  0xd3   : > { %5800 = vmatprep.mubr.bf16.mxu0 %v557_v35  ;;  %5829 = vmatpush3.bf16.msra.mxu0 %v6124_v63 }
  0xd4   : > { %5830 = vmatprep.subr.bf16.mxu0 %v6127_v2 }
  0xd7   : > { %5831 = vmatpush3.bf16.msra.mxu0 %v6127_v2 }
  0xd8   : > { %5496 = vmatprep.subr.bf16.mxu0 %v6157_v4 }
  0xda   : > { %5801 = vmatmul.mubr.bf16.gmra.mxu0 %v559_v36 }
  0xdb   : > { %5804 = vmatprep.mubr.bf16.mxu0 %v561_v37 }
  0xe2   : > { %5805 = vmatmul.mubr.bf16.gmra.mxu0 %v563_v38 }
  0xe3   : > { %5808 = vmatprep.mubr.bf16.mxu0 %v565_v39 }
  0xea   : > { %5809 = vmatmul.mubr.bf16.gmra.mxu0 %v567_v40 }
  0xeb   : > { %5812 = vmatprep.mubr.bf16.mxu0 %v569_v41 }
  0xf2   : > { %5813 = vmatmul.mubr.bf16.gmra.mxu0 %v571_v42 }
 0x17a   : > { %v5786_v6 = vpop.f32.mrf.mxu0 }
 0x17b   : > { %v783_v7 = vadd.f32 %v5786_v6, %v7005_v5 }
 0x17c   : > { %v774_v8 = vpop.f32.mrf.mxu0 }
 0x17d   : > { %v903_v9 = vmul.f32 0.1, %v783_v7  ;;  %v775_v10 = vadd.f32 %v7005_v5, %v774_v8  ;;  %v1669_v8 = vld [vmem:[#allocation2 + $0x44] sm:$0xf] }
 0x17e   : > { %v5787_v11 = vpop.f32.mrf.mxu0 }
 0x17f   : > { %v935_v12 = vmax.f32 %v783_v7, %v903_v9  ;;  %v901_v13 = vmul.f32 0.1, %v775_v10  ;;  %v786_v14 = vadd.f32 %v5787_v11, %v7005_v5 }
 0x180   : > { %v777_v15 = vpop.f32.mrf.mxu0 }
 0x181   : > { %v5178_v16 = vpack.c.bf16 %v935_v12, %v935_v12  ;;  %v933_v17 = vmax.f32 %v775_v10, %v901_v13  ;;  %v904_v18 = vmul.f32 0.1, %v786_v14  ;;  %v778_v19 = vadd.f32 %v7005_v5, %v777_v15 }
 0x182   : > { %v5790_v20 = vpop.f32.mrf.mxu0 }
 0x183   : > { %v1081_v21 = vshrl.u32 %v5178_v16, 16  ;;  %v1084_v22 = vshll.u32 %v5178_v16, 16  ;;  %1454 = vst [vmem:[#allocation2 + $0x34] sm:$0xf] %v5178_v16  ;;  %v5176_v23 = vpack.c.bf16 %v933_v17, %v933_v17  ;;  %v936_v24 = vmax.f32 %v786_v14, %v904_v18 }
 0x184   : > { %v902_v25 = vmul.f32 0.1, %v778_v19  ;;  %v799_v26 = vadd.f32 %v5790_v20, %v7005_v5  ;;  %v790_v27 = vpop.f32.mrf.mxu0 }
 0x185   : > { %v1083_v28 = vrot.slane %v1081_v21, 7  ;;  %v1496_v29 = vrot.slane %v1081_v21, 4  ;;  %v1497_v30 = vrot.slane %v1084_v22, 5  ;;  %v1065_v31 = vshrl.u32 %v5176_v23, 16  ;;  %1452 = vst [vmem:[#allocation2 + $0x1c] sm:$0xf] %v5176_v23 }
 0x186   : > { %v1068_v34 = vshll.u32 %v5176_v23, 16  ;;  %v5179_v35 = vpack.c.bf16 %v936_v24, %v936_v24  ;;  %v934_v36 = vmax.f32 %v778_v19, %v902_v25  ;;  %v907_v37 = vmul.f32 0.1, %v799_v26  ;;  %v5791_v38 = vpop.f32.mrf.mxu0 }
 0x187   : > { %v1086_v39 = vor.u32 %v1084_v22, %v1083_v28  ;;  %v1087_v40 = vrot.slane %v1083_v28, 4  ;;  %v1498_v41 = vor.u32 %v1497_v30, %v1496_v29  ;;  %v7018_v42 = vrot.slane %v1065_v31, 7  ;;  %v1665_v30 = vld [vmem:[#allocation2 + $0x2c] sm:$0xf] }
 0x188   : > { %v1487_v44 = vrot.slane %v1065_v31, 4  ;;  %v1488_v45 = vrot.slane %v1068_v34, 5  ;;  %v1089_v46 = vshrl.u32 %v5179_v35, 16  ;;  %v1092_v47 = vshll.u32 %v5179_v35, 16  ;;  %1455 = vst [vmem:[#allocation2 + $0x40] sm:$0xf] %v5179_v35  ;;  %v793_v48 = vpop.f32.mrf.mxu0 }
 0x189   : > { %v1361_v49 = vsel %vm7014_vm12, %v1086_v39, %v1360_v33  ;;  %v1499_v50 = vrot.slane %v1498_v41, 4  ;;  %v1070_v51 = vor.u32 %v1068_v34, %v7018_v42  ;;  %v1071_v52 = vrot.slane %v7018_v42, 4  ;;  %v1368_v31 = vld [vmem:[#allocation2 + $0x60] sm:$0xf] }
 0x18a   : > { %1362 = vst [vmem:[#allocation2 + $0x30] sm:$0xf] %v1361_v49  ;;  %v1489_v54 = vor.u32 %v1488_v45, %v1487_v44  ;;  %v1091_v55 = vrot.slane %v1089_v46, 7  ;;  %v1500_v56 = vrot.slane %v1092_v47, 5  ;;  %v1502_v57 = vrot.slane %v1089_v46, 4  ;;  %v5794_v58 = vpop.f32.mrf.mxu0 }
 0x18b   : > { %v1357_v59 = vsel %vm7014_vm12, %v1070_v51, %v1356_v43  ;;  %v5177_v61 = vpack.c.bf16 %v934_v36, %v934_v36  ;;  %v939_v62 = vmax.f32 %v799_v26, %v907_v37  ;;  %v791_v63 = vadd.f32 %v7005_v5, %v790_v27 }
 0x18c   : > { %1358 = vst [vmem:[#allocation2 + $0x18] sm:$0xf] %v1357_v59  ;;  %v1490_v0 = vrot.slane %v1489_v54, 4  ;;  %v1094_v1 = vor.u32 %v1092_v47, %v1091_v55  ;;  %v1501_v2 = vsel %vm7026_vm13, %v1499_v50, %v1500_v56  ;;  %v1503_v4 = vor.u32 %v1502_v57, %v1500_v56  ;;  %v7041_v6 = vpop.f32.mrf.mxu0  ;;  %v1364_v56 = vld [vmem:[#allocation2 + $0x48] sm:$0xf] }
 0x18d   : > { %1668 = vst [vmem:[#allocation2 + $0x38] sm:$0xf] %v1501_v2  ;;  %v1073_v9 = vshrl.u32 %v5177_v61, 16  ;;  %v1076_v10 = vshll.u32 %v5177_v61, 16  ;;  %1453 = vst [vmem:[#allocation2 + $0x28] sm:$0xf] %v5177_v61  ;;  %v5182_v11 = vpack.c.bf16 %v939_v62, %v939_v62  ;;  %v802_v15 = vadd.f32 %v5791_v38, %v7005_v5 }
 0x18e   : > { %v905_v12 = vmul.f32 0.1, %v791_v63  ;;  %v1095_v13 = vsel %vm7034_vm14, %v1087_v40, %v1094_v1  ;;  %v1504_v14 = vrot.slane %v1503_v4, 4  ;;  %v794_v16 = vadd.f32 %v7005_v5, %v793_v48  ;;  %v7053_v17 = vpop.f32.mrf.mxu0 }
 0x18f   : > { %1363 = vst [vmem:[#allocation2 + $0x3c] sm:$0xf] %v1095_v13  ;;  %v1075_v18 = vrot.slane %v1073_v9, 7  ;;  %v1491_v19 = vrot.slane %v1076_v10, 5  ;;  %v1493_v20 = vrot.slane %v1073_v9, 4  ;;  %v1113_v21 = vshrl.u32 %v5182_v11, 16 }
 0x190   : > { %1458 = vst [vmem:[#allocation2 + $0x64] sm:$0xf] %v5182_v11  ;;  %v1670_v22 = vsel %vm7045_vm15, %v1504_v14, %v1669_v8  ;;  %v1116_v23 = vshll.u32 %v5182_v11, 16  ;;  %v937_v24 = vmax.f32 %v791_v63, %v905_v12  ;;  %v908_v25 = vmul.f32 0.1, %v802_v15  ;;  %v7061_v37 = vpop.f32.mrf.mxu0 }
 0x191   : > { %1671 = vst [vmem:[#allocation2 + $0x44] sm:$0xf] %v1670_v22  ;;  %v1078_v26 = vor.u32 %v1076_v10, %v1075_v18  ;;  %v1492_v27 = vsel %vm7026_vm13, %v1490_v0, %v1491_v19  ;;  %v1494_v28 = vor.u32 %v1493_v20, %v1491_v19  ;;  %v7059_v29 = vrot.slane %v1113_v21, 7  ;;  %v1677_v19 = vld [vmem:[#allocation2 + $0x74] sm:$0xf] }
 0x192   : > { %1663 = vst [vmem:[#allocation2 + $0x20] sm:$0xf] %v1492_v27  ;;  %v1514_v33 = vrot.slane %v1113_v21, 4  ;;  %v1515_v34 = vrot.slane %v1116_v23, 5  ;;  %v5180_v35 = vpack.c.bf16 %v937_v24, %v937_v24  ;;  %v940_v36 = vmax.f32 %v802_v15, %v908_v25  ;;  %v7074_v55 = vpop.f32.mrf.mxu0  ;;  %v6158_v24 = vld [vmem:[%s6838_s14 + $0x38] sm:$0xff]  }
 0x193   : > { %v1079_v38 = vsel %vm7034_vm14, %v1071_v52, %v1078_v26  ;;  %v1495_v39 = vrot.slane %v1494_v28, 4  ;;  %v1118_v40 = vor.u32 %v1116_v23, %v7059_v29  ;;  %v1119_v41 = vrot.slane %v7059_v29, 4  ;;  %v6159_v29 = vld [vmem:[%s6838_s14 + $0x70] sm:$0xff]  }
 0x194   : > { %1359 = vst [vmem:[#allocation2 + $0x24] sm:$0xf] %v1079_v38  ;;  %v1516_v42 = vor.u32 %v1515_v34, %v1514_v33  ;;  %v1097_v43 = vshrl.u32 %v5180_v35, 16  ;;  %v1100_v44 = vshll.u32 %v5180_v35, 16  ;;  %1456 = vst [vmem:[#allocation2 + $0x4c] sm:$0xf] %v5180_v35  ;;  %v5183_v45 = vpack.c.bf16 %v940_v36, %v940_v36  ;;  %v7082_v14 = vpop.f32.mrf.mxu0 }
 0x195   : > { %v1666_v46 = vsel %vm7045_vm15, %v1495_v39, %v1665_v30  ;;  %v1369_v47 = vsel %vm7014_vm12, %v1118_v40, %v1368_v31  ;;  %v906_v48 = vmul.f32 0.1, %v794_v16  ;;  %v815_v49 = vadd.f32 %v5794_v58, %v7005_v5 }
 0x196   : > { %1667 = vst [vmem:[#allocation2 + $0x2c] sm:$0xf] %v1666_v46  ;;  %1370 = vst [vmem:[#allocation2 + $0x60] sm:$0xf] %v1369_v47  ;;  %v1517_v50 = vrot.slane %v1516_v42, 4  ;;  %v7072_v51 = vrot.slane %v1097_v43, 7  ;;  %v807_v1 = vadd.f32 %v7005_v5, %v7041_v6  ;;  %v818_v23 = vadd.f32 %v7053_v17, %v7005_v5  ;;  %v5799_v35 = vpop.f32.mrf.mxu0 }
 0x197   : > { %v1505_v52 = vrot.slane %v1097_v43, 4  ;;  %v1506_v54 = vrot.slane %v1100_v44, 5  ;;  %1459 = vst [vmem:[#allocation2 + $0x70] sm:$0xf] %v5183_v45  ;;  %v1121_v57 = vshrl.u32 %v5183_v45, 16  ;;  %v1124_v59 = vshll.u32 %v5183_v45, 16 }
 0x198   : > { %v938_v61 = vmax.f32 %v794_v16, %v906_v48  ;;  %v911_v62 = vmul.f32 0.1, %v815_v49  ;;  %v1102_v63 = vor.u32 %v1100_v44, %v7072_v51  ;;  %v1103_v0 = vrot.slane %v7072_v51, 4  ;;  %v1673_v44 = vld [vmem:[#allocation2 + $0x5c] sm:$0xf] }
 0x199   : > { %v1507_v58 = vor.u32 %v1506_v54, %v1505_v52  ;;  %v1123_v2 = vrot.slane %v1121_v57, 7  ;;  %v1518_v4 = vrot.slane %v1124_v59, 5  ;;  %v1520_v8 = vrot.slane %v1121_v57, 4  ;;  %v1376_v48 = vld [vmem:[#allocation2 + $0x90] sm:$0xf] }
 0x19a   : > { %v5181_v9 = vpack.c.bf16 %v938_v61, %v938_v61  ;;  %v1365_v10 = vsel %vm7014_vm12, %v1102_v63, %v1364_v56  ;;  %v943_v12 = vmax.f32 %v815_v49, %v911_v62  ;;  %v909_v13 = vmul.f32 0.1, %v807_v1  ;;  %v1372_v56 = vld [vmem:[#allocation2 + $0x78] sm:$0xf]  ;;  %v6160_v61 = vld [vmem:[%s6838_s14 + $0x30] sm:$0xff]  }
 0x19b   : > { %v1508_v11 = vrot.slane %v1507_v58, 4  ;;  %1366 = vst [vmem:[#allocation2 + $0x48] sm:$0xf] %v1365_v10  ;;  %v1126_v15 = vor.u32 %v1124_v59, %v1123_v2  ;;  %v1519_v16 = vsel %vm7026_vm13, %v1517_v50, %v1518_v4  ;;  %v1521_v6 = vor.u32 %v1520_v8, %v1518_v4  ;;  %v825_v59 = vpop.f32.mrf.mxu0 }
 0x19c   : > { %v1105_v18 = vshrl.u32 %v5181_v9, 16  ;;  %1457 = vst [vmem:[#allocation2 + $0x58] sm:$0xf] %v5181_v9  ;;  %1676 = vst [vmem:[#allocation2 + $0x68] sm:$0xf] %v1519_v16  ;;  %v1108_v20 = vshll.u32 %v5181_v9, 16  ;;  %v5186_v21 = vpack.c.bf16 %v943_v12, %v943_v12  ;;  %v941_v22 = vmax.f32 %v807_v1, %v909_v13 }
 0x19d   : > { %v1127_v25 = vsel %vm7034_vm14, %v1119_v41, %v1126_v15  ;;  %v1522_v26 = vrot.slane %v1521_v6, 4  ;;  %v6133_v36 = vld [vmem:[#allocation2 + $0x20] ss:$12 sps:$4 sm:$0xff]   ;;  %v912_v39 = vmul.f32 0.1, %v818_v23  ;;  %v810_v40 = vadd.f32 %v7005_v5, %v7061_v37  ;;  %v6166_v1 = vld [vmem:[%s6838_s14 + $0x68] sm:$0xff]  }
 0x19e   : > { %v1107_v27 = vrot.slane %v1105_v18, 7  ;;  %v1511_v28 = vrot.slane %v1105_v18, 4  ;;  %1371 = vst [vmem:[#allocation2 + $0x6c] sm:$0xf] %v1127_v25  ;;  %v1509_v30 = vrot.slane %v1108_v20, 5  ;;  %v1145_v31 = vshrl.u32 %v5186_v21, 16  ;;  %5832 = vmatprep.mubr.bf16.mxu0 %v6133_v36 }
 0x19f   : > { %v1148_v33 = vshll.u32 %v5186_v21, 16  ;;  %1462 = vst [vmem:[#allocation2 + $0x94] sm:$0xf] %v5186_v21  ;;  %v5184_v34 = vpack.c.bf16 %v941_v22, %v941_v22  ;;  %v1678_v38 = vsel %vm7045_vm15, %v1522_v26, %v1677_v19  ;;  %v6134_v41 = vld [vmem:[#allocation2 + $0x38] ss:$12 sps:$4 sm:$0xff]   ;;  %v944_v57 = vmax.f32 %v818_v23, %v912_v39  ;;  %v5802_v19 = vpop.f32.mrf.mxu0  ;;  %v6168_v25 = vld [vmem:[%s6838_s14 + $0x60] sm:$0xff]  }
 0x1a0   : > { %v1110_v17 = vor.u32 %v1108_v20, %v1107_v27  ;;  %1679 = vst [vmem:[#allocation2 + $0x74] sm:$0xf] %v1678_v38  ;;  %v1510_v42 = vsel %vm7026_vm13, %v1508_v11, %v1509_v30  ;;  %v1512_v43 = vor.u32 %v1511_v28, %v1509_v30  ;;  %v7098_v45 = vrot.slane %v1145_v31, 7  ;;  %5833 = vmatmul.mubr.bf16.vlgmr.msra.gmra.mxu0 %v6134_v41  ;;  %v6167_v20 = vld [vmem:[%s6838_s14 + $0x28] sm:$0xff]   ;;  %v6169_v39 = vld [vmem:[%s6838_s14 + $0x20] sm:$0xff]  }
 0x1a1   : > { %v1532_v46 = vrot.slane %v1145_v31, 4  ;;  %1460 = vst [vmem:[#allocation2 + $0x7c] sm:$0xf] %v5184_v34  ;;  %1672 = vst [vmem:[#allocation2 + $0x50] sm:$0xf] %v1510_v42  ;;  %v1533_v49 = vrot.slane %v1148_v33, 5  ;;  %5497 = vmatpush3.bf16.msra.mxu0 %v6158_v24  ;;  %v5187_v8 = vpack.c.bf16 %v944_v57, %v944_v57  ;;  %v831_v18 = vadd.f32 %v7074_v55, %v7005_v5 }
 0x1a2   : > { %v1111_v47 = vsel %vm7034_vm14, %v1103_v0, %v1110_v17  ;;  %v1129_v37 = vshrl.u32 %v5184_v34, 16  ;;  %v1132_v50 = vshll.u32 %v5184_v34, 16  ;;  %v1513_v51 = vrot.slane %v1512_v43, 4  ;;  %5498 = vmatprep.subr.bf16.mxu0 %v6159_v29  ;;  %v1685_v29 = vld [vmem:[#allocation2 + $0xa4] sm:$0xf]  ;;  %v7128_v17 = vpop.f32.mrf.mxu0 }
 0x1a3   : > { %1367 = vst [vmem:[#allocation2 + $0x54] sm:$0xf] %v1111_v47  ;;  %v1150_v52 = vor.u32 %v1148_v33, %v7098_v45  ;;  %v1151_v54 = vrot.slane %v7098_v45, 4  ;;  %v1534_v62 = vor.u32 %v1533_v49, %v1532_v46  ;;  %v910_v9 = vmul.f32 0.1, %v810_v40 }
 0x1a4   : > { %v7105_v63 = vrot.slane %v1129_v37, 7  ;;  %v1523_v0 = vrot.slane %v1129_v37, 4  ;;  %v1524_v58 = vrot.slane %v1132_v50, 5  ;;  %v1674_v2 = vsel %vm7045_vm15, %v1513_v51, %v1673_v44  ;;  %1463 = vst [vmem:[#allocation2 + $0xa0] sm:$0xf] %v5187_v8 }
 0x1a5   : > { %v1377_v4 = vsel %vm7014_vm12, %v1150_v52, %v1376_v48  ;;  %1675 = vst [vmem:[#allocation2 + $0x5c] sm:$0xf] %v1674_v2  ;;  %v1535_v10 = vrot.slane %v1534_v62, 4  ;;  %v1153_v15 = vshrl.u32 %v5187_v8, 16  ;;  %v1156_v16 = vshll.u32 %v5187_v8, 16  ;;  %5499 = vmatpush3.bf16.msra.mxu0 %v6160_v61  ;;  %v7140_v62 = vpop.f32.mrf.mxu0 }
 0x1a6   : > { %1378 = vst [vmem:[#allocation2 + $0x90] sm:$0xf] %v1377_v4  ;;  %v1134_v11 = vor.u32 %v1132_v50, %v7105_v63  ;;  %v1135_v12 = vrot.slane %v7105_v63, 4  ;;  %v1525_v13 = vor.u32 %v1524_v58, %v1523_v0  ;;  %v942_v6 = vmax.f32 %v810_v40, %v910_v9  ;;  %5500 = vmatprep.subr.bf16.mxu0 %v6166_v1  ;;  %v6176_v40 = vld [vmem:[%s6838_s14 + $0x58] sm:$0xff]   ;;  %v6178_v9 = vld [vmem:[%s6838_s14 + $0x50] sm:$0xff]  }
 0x1a7   : > { %v823_v23 = vadd.f32 %v7005_v5, %v7082_v14  ;;  %v834_v24 = vadd.f32 %v5799_v35, %v7005_v5  ;;  %v1155_v26 = vrot.slane %v1153_v15, 7  ;;  %v1536_v27 = vrot.slane %v1156_v16, 5  ;;  %v6139_v0 = vld [vmem:[#allocation2 + $0x68] ss:$12 sps:$4 sm:$0xff]  }
 0x1a8   : > { %v1373_v21 = vsel %vm7014_vm12, %v1134_v11, %v1372_v56  ;;  %v1526_v22 = vrot.slane %v1525_v13, 4  ;;  %v1538_v55 = vrot.slane %v1153_v15, 4  ;;  %v5185_v28 = vpack.c.bf16 %v942_v6, %v942_v6  ;;  %v6177_v58 = vld [vmem:[%s6838_s14 + $0x18] sm:$0xff]   ;;  %v1384_v11 = vld [vmem:[#allocation2 + $0xc0] sm:$0xf] }
 0x1a9   : > { %1374 = vst [vmem:[#allocation2 + $0x78] sm:$0xf] %v1373_v21  ;;  %v915_v30 = vmul.f32 0.1, %v831_v18  ;;  %v913_v31 = vmul.f32 0.1, %v823_v23  ;;  %v7124_v34 = vadd.f32 %v7005_v5, %v825_v59  ;;  %v1158_v36 = vor.u32 %v1156_v16, %v1155_v26  ;;  %5501 = vmatpush3.bf16.msra.mxu0 %v6167_v20 }
 0x1aa   : > { %v916_v33 = vmul.f32 0.1, %v834_v24  ;;  %v1537_v14 = vsel %vm7026_vm13, %v1535_v10, %v1536_v27  ;;  %v1539_v35 = vor.u32 %v1538_v55, %v1536_v27  ;;  %v1137_v38 = vshrl.u32 %v5185_v28, 16  ;;  %1461 = vst [vmem:[#allocation2 + $0x88] sm:$0xf] %v5185_v28  ;;  %5502 = vmatprep.subr.bf16.mxu0 %v6168_v25  ;;  %v6179_v6 = vld [vmem:[%s6838_s14 + $0x10] sm:$0xff]   ;;  %v841_v25 = vpop.f32.mrf.mxu0 }
 0x1ab   : > { %1684 = vst [vmem:[#allocation2 + $0x98] sm:$0xf] %v1537_v14  ;;  %v1140_v41 = vshll.u32 %v5185_v28, 16  ;;  %v947_v42 = vmax.f32 %v831_v18, %v915_v30  ;;  %v945_v43 = vmax.f32 %v823_v23, %v913_v31  ;;  %v1159_v45 = vsel %vm7034_vm14, %v1151_v54, %v1158_v36  ;;  %v1681_v59 = vld [vmem:[#allocation2 + $0x8c] sm:$0xf]  ;;  %v1842_v14 = vld [vmem:[#allocation2 + $0x24] sm:$0xff] }
 0x1ac   : > { %v948_v44 = vmax.f32 %v834_v24, %v916_v33  ;;  %v1540_v46 = vrot.slane %v1539_v35, 4  ;;  %v1139_v47 = vrot.slane %v1137_v38, 7  ;;  %v1529_v48 = vrot.slane %v1137_v38, 4  ;;  %1379 = vst [vmem:[#allocation2 + $0x9c] sm:$0xf] %v1159_v45  ;;  %v1840_v45 = vld [vmem:[#allocation2 + $0x18] sm:$0xff] }
 0x1ad   : > { %v1527_v49 = vrot.slane %v1140_v41, 5  ;;  %v5190_v37 = vpack.c.bf16 %v947_v42, %v947_v42  ;;  %v5188_v50 = vpack.c.bf16 %v945_v43, %v945_v43  ;;  %v6138_v52 = vld [vmem:[#allocation2 + $0x50] ss:$12 sps:$4 sm:$0xff]   ;;  %v914_v61 = vmul.f32 0.1, %v7124_v34  ;;  %5503 = vmatpush3.bf16.msra.mxu0 %v6169_v39 }
 0x1ae   : > { %v5191_v51 = vpack.c.bf16 %v948_v44, %v948_v44  ;;  %v1686_v56 = vsel %vm7045_vm15, %v1540_v46, %v1685_v29  ;;  %v1142_v57 = vor.u32 %v1140_v41, %v1139_v47  ;;  %v7138_v54 = vadd.f32 %v5802_v19, %v7005_v5  ;;  %5836 = vmatprep.mubr.bf16.mxu0 %v6138_v52  ;;  %v1380_v28 = vld [vmem:[#allocation2 + $0xa8] sm:$0xf]  ;;  %v6185_v29 = vld [vmem:[%s6838_s14 + $0x48] sm:$0xff]   ;;  %v5806_v46 = vpop.f32.mrf.mxu0  ;;  %v6187_v52 = vld [vmem:[%s6838_s14 + $0x40] sm:$0xff]  }
 0x1af   : > { %1687 = vst [vmem:[#allocation2 + $0xa4] sm:$0xf] %v1686_v56  ;;  %v1528_v1 = vsel %vm7026_vm13, %v1526_v22, %v1527_v49  ;;  %v1530_v2 = vor.u32 %v1529_v48, %v1527_v49  ;;  %v1177_v4 = vshrl.u32 %v5190_v37, 16  ;;  %v1180_v8 = vshll.u32 %v5190_v37, 16  ;;  %1466 = vst [vmem:[#allocation2 + $0xc4] sm:$0xf] %v5190_v37  ;;  %5504 = vmatprep.subr.bf16.mxu0 %v6176_v40 }
 0x1b0   : > { %1464 = vst [vmem:[#allocation2 + $0xac] sm:$0xf] %v5188_v50  ;;  %1467 = vst [vmem:[#allocation2 + $0xd0] sm:$0xf] %v5191_v51  ;;  %v1143_v10 = vsel %vm7034_vm14, %v1135_v12, %v1142_v57  ;;  %v1161_v13 = vshrl.u32 %v5188_v50, 16  ;;  %v1164_v15 = vshll.u32 %v5188_v50, 16  ;;  %5837 = vmatmul.mubr.bf16.gmra.mxu0 %v6139_v0  ;;  %v946_v40 = vmax.f32 %v7124_v34, %v914_v61 }
 0x1b1   : > { %1680 = vst [vmem:[#allocation2 + $0x80] sm:$0xf] %v1528_v1  ;;  %v1185_v16 = vshrl.u32 %v5191_v51, 16  ;;  %1375 = vst [vmem:[#allocation2 + $0x84] sm:$0xf] %v1143_v10  ;;  %v1531_v18 = vrot.slane %v1530_v2, 4  ;;  %5505 = vmatpush3.bf16.msra.mxu0 %v6177_v58  ;;  %v7165_v34 = vcombine.low %v1840_v45, %v1842_v14  ;;  %v7167_v50 = vcombine.high %v1840_v45, %v1842_v14 }
 0x1b2   : > { %v1179_v19 = vrot.slane %v1177_v4, 7  ;;  %v1550_v20 = vrot.slane %v1177_v4, 4  ;;  %v1551_v21 = vrot.slane %v1180_v8, 5  ;;  %v7151_v22 = vrot.slane %v1161_v13, 7  ;;  %5506 = vmatprep.subr.bf16.mxu0 %v6178_v9  ;;  %v6186_v47 = vld [vmem:[%s6838_s14 + $0x8] sm:$0xff]   ;;  %v6188_v58 = vld [vmem:[%s6838_s14] sm:$0xff]  }
 0x1b3   : > { %v1541_v23 = vrot.slane %v1161_v13, 4  ;;  %v1542_v63 = vrot.slane %v1164_v15, 5  ;;  %v1187_v24 = vrot.slane %v1185_v16, 7  ;;  %v1682_v12 = vsel %vm7045_vm15, %v1531_v18, %v1681_v59  ;;  %v1693_v48 = vld [vmem:[#allocation2 + $0xd4] sm:$0xf]  ;;  %2385 = vmatprep.mubr.bf16.mxu1 %v7167_v50  ;;  %v7187_v13 = vpop.f32.mrf.mxu0 }
 0x1b4   : > { %v1182_v26 = vor.u32 %v1180_v8, %v1179_v19  ;;  %v1183_v27 = vrot.slane %v1179_v19, 4  ;;  %v1552_v55 = vor.u32 %v1551_v21, %v1550_v20  ;;  %1683 = vst [vmem:[#allocation2 + $0x8c] sm:$0xf] %v1682_v12  ;;  %v1166_v30 = vor.u32 %v1164_v15, %v7151_v22  ;;  %v6131_v0 = vld [vmem:[#allocation2 + $0x34] ss:$12 sps:$4 sm:$0xff]   ;;  %2386 = vmatmul.mubr.bf16.vlgmr.msra.gmra.mxu1 %v7165_v34 }
 0x1b5   : > { %v1167_v31 = vrot.slane %v7151_v22, 4  ;;  %v1543_v33 = vor.u32 %v1542_v63, %v1541_v23  ;;  %v1188_v36 = vshll.u32 %v5191_v51, 16  ;;  %v1556_v39 = vrot.slane %v1185_v16, 4  ;;  %5507 = vmatpush3.bf16.msra.mxu0 %v6179_v6  ;;  %v6140_v51 = vld [vmem:[%s6838_s14 + $0xb0] sm:$0xff]   ;;  %5865 = vmatpush3.bf16.msra.mxu1 %v7000_v3  ;;  %v1689_v12 = vld [vmem:[#allocation2 + $0xbc] sm:$0xf] }
 0x1b6   : > { %v1385_v35 = vsel %vm7014_vm12, %v1182_v26, %v1384_v11  ;;  %v1553_v38 = vrot.slane %v1552_v55, 4  ;;  %v1381_v41 = vsel %vm7014_vm12, %v1166_v30, %v1380_v28  ;;  %v5189_v49 = vpack.c.bf16 %v946_v40, %v946_v40  ;;  %5508 = vmatprep.subr.bf16.mxu0 %v6185_v29  ;;  %v6145_v15 = vld [vmem:[#allocation2 + $0x98] ss:$12 sps:$4 sm:$0xff]   ;;  %2393 = vmatprep.mubr.bf16.mxu1 %v6131_v0  ;;  %v7195_v30 = vld [vmem:[#allocation2 + $0x30] ss:$12 sps:$4 sm:$0xff]  }
 0x1b7   : > { %1386 = vst [vmem:[#allocation2 + $0xc0] sm:$0xf] %v1385_v35  ;;  %v1544_v42 = vrot.slane %v1543_v33, 4  ;;  %v1190_v43 = vor.u32 %v1188_v36, %v1187_v24  ;;  %v1554_v44 = vrot.slane %v1188_v36, 5  ;;  %1382 = vst [vmem:[#allocation2 + $0xa8] sm:$0xf] %v1381_v41  ;;  %v839_v61 = vadd.f32 %v7005_v5, %v7128_v17  ;;  %5866 = vmatprep.subr.bf16.mxu1 %v6140_v51  ;;  %v7197_v33 = vpop.f32.mrf.mxu0 }
 0x1b8   : > { %v919_v37 = vmul.f32 0.1, %v7138_v54  ;;  %v1169_v1 = vshrl.u32 %v5189_v49, 16  ;;  %v1172_v2 = vshll.u32 %v5189_v49, 16  ;;  %1465 = vst [vmem:[#allocation2 + $0xb8] sm:$0xf] %v5189_v49  ;;  %v850_v8 = vadd.f32 %v7140_v62, %v7005_v5 }
 0x1b9   : > { %v1191_v56 = vsel %vm7034_vm14, %v1183_v27, %v1190_v43  ;;  %v1555_v57 = vsel %vm7026_vm13, %v1553_v38, %v1554_v44  ;;  %v1557_v59 = vor.u32 %v1556_v39, %v1554_v44  ;;  %v917_v10 = vmul.f32 0.1, %v839_v61  ;;  %5509 = vmatpush3.bf16.msra.mxu0 %v6186_v47  ;;  %v6151_v62 = vld [vmem:[%s6838_s14 + $0xa8] sm:$0xff]   ;;  %v1392_v27 = vld [vmem:[#allocation2 + $0xf0] sm:$0xf]  ;;  %5867 = vmatpush3.bf16.msra.mxu1 %v6140_v51 }
 0x1ba   : > { %1387 = vst [vmem:[#allocation2 + $0xcc] sm:$0xf] %v1191_v56  ;;  %1692 = vst [vmem:[#allocation2 + $0xc8] sm:$0xf] %v1555_v57  ;;  %v951_v4 = vmax.f32 %v7138_v54, %v919_v37  ;;  %v842_v17 = vadd.f32 %v7005_v5, %v841_v25  ;;  %v7185_v11 = vadd.f32 %v5806_v46, %v7005_v5  ;;  %v1171_v54 = vrot.slane %v1169_v1, 7  ;;  %v6170_v36 = vld [vmem:[%s6838_s14 + $0xa0] sm:$0xff]  }
 0x1bb   : > { %v1558_v9 = vrot.slane %v1557_v59, 4  ;;  %v1545_v16 = vrot.slane %v1172_v2, 5  ;;  %v1547_v6 = vrot.slane %v1169_v1, 4  ;;  %v949_v20 = vmax.f32 %v839_v61, %v917_v10  ;;  %v6144_v5 = vld [vmem:[#allocation2 + $0x80] ss:$12 sps:$4 sm:$0xff]   ;;  %5510 = vmatprep.subr.bf16.mxu0 %v6187_v52  ;;  %5868 = vmatprep.subr.bf16.mxu1 %v6151_v62  ;;  %v857_v52 = vpop.f32.mrf.mxu0 }
 0x1bc   : > { %v5194_v18 = vpack.c.bf16 %v951_v4, %v951_v4  ;;  %v920_v21 = vmul.f32 0.1, %v850_v8  ;;  %v918_v23 = vmul.f32 0.1, %v842_v17  ;;  %v1174_v63 = vor.u32 %v1172_v2, %v1171_v54  ;;  %5840 = vmatprep.mubr.bf16.mxu0 %v6144_v5  ;;  %v1388_v45 = vld [vmem:[#allocation2 + $0xd8] sm:$0xf]  ;;  %2394 = vmatmul.mubr.bf16.gmra.mxu1 %v7195_v30 }
 0x1bd   : > { %v1694_v19 = vsel %vm7045_vm15, %v1558_v9, %v1693_v48  ;;  %v1546_v24 = vsel %vm7026_vm13, %v1544_v42, %v1545_v16  ;;  %v1548_v25 = vor.u32 %v1547_v6, %v1545_v16  ;;  %v5192_v55 = vpack.c.bf16 %v949_v20, %v949_v20  ;;  %5511 = vmatpush3.bf16.msra.mxu0 %v6188_v58  ;;  %v7210_v47 = vld [vmem:[#allocation2 + $0x4c] ss:$12 sps:$4 sm:$0xff]   ;;  %v1701_v16 = vld [vmem:[#allocation2 + $0x104] sm:$0xf] }
 0x1be   : > { %1695 = vst [vmem:[#allocation2 + $0xd4] sm:$0xf] %v1694_v19  ;;  %v1209_v3 = vshrl.u32 %v5194_v18, 16  ;;  %1470 = vst [vmem:[#allocation2 + $0xf4] sm:$0xf] %v5194_v18  ;;  %v1212_v26 = vshll.u32 %v5194_v18, 16  ;;  %v952_v28 = vmax.f32 %v850_v8, %v920_v21  ;;  %v950_v29 = vmax.f32 %v842_v17, %v918_v23  ;;  %5841 = vmatmul.mubr.bf16.gmra.mxu0 %v6145_v15 }
 0x1bf   : > { %1688 = vst [vmem:[#allocation2 + $0xb0] sm:$0xf] %v1546_v24  ;;  %v1175_v14 = vsel %vm7034_vm14, %v1167_v31, %v1174_v63  ;;  %v1549_v35 = vrot.slane %v1548_v25, 4  ;;  %v1193_v41 = vshrl.u32 %v5192_v55, 16  ;;  %v1196_v42 = vshll.u32 %v5192_v55, 16  ;;  %2401 = vmatprep.mubr.bf16.mxu1 %v7210_v47  ;;  %5869 = vmatpush3.bf16.msra.mxu1 %v6151_v62  ;;  %v6189_v4 = vld [vmem:[%s6838_s14 + $0x98] sm:$0xff]   ;;  %v5810_v62 = vpop.f32.mrf.mxu0 }
 0x1c0   : > { %v7204_v38 = vrot.slane %v1209_v3, 7  ;;  %v1568_v39 = vrot.slane %v1209_v3, 4  ;;  %1383 = vst [vmem:[#allocation2 + $0xb4] sm:$0xf] %v1175_v14  ;;  %v1569_v40 = vrot.slane %v1212_v26, 5  ;;  %v5195_v43 = vpack.c.bf16 %v952_v28, %v952_v28  ;;  %5870 = vmatprep.subr.bf16.mxu1 %v6170_v36 }
 0x1c1   : > { %1468 = vst [vmem:[#allocation2 + $0xdc] sm:$0xf] %v5192_v55  ;;  %v1690_v44 = vsel %vm7045_vm15, %v1549_v35, %v1689_v12  ;;  %v5193_v46 = vpack.c.bf16 %v950_v29, %v950_v29  ;;  %v1195_v49 = vrot.slane %v1193_v41, 7  ;;  %v1559_v37 = vrot.slane %v1193_v41, 4  ;;  %v7222_v5 = vld [vmem:[#allocation2 + $0x64] ss:$12 sps:$4 sm:$0xff]  }
 0x1c2   : > { %v1214_v22 = vor.u32 %v1212_v26, %v7204_v38  ;;  %v1215_v31 = vrot.slane %v7204_v38, 4  ;;  %1691 = vst [vmem:[#allocation2 + $0xbc] sm:$0xf] %v1690_v44  ;;  %v1570_v48 = vor.u32 %v1569_v40, %v1568_v39  ;;  %v1560_v51 = vrot.slane %v1196_v42, 5  ;;  %1471 = vst [vmem:[#allocation2 + $0x100] sm:$0xf] %v5195_v43 }
 0x1c3   : > { %v1217_v57 = vshrl.u32 %v5195_v43, 16  ;;  %v1220_v59 = vshll.u32 %v5195_v43, 16  ;;  %v1201_v61 = vshrl.u32 %v5193_v46, 16  ;;  %1469 = vst [vmem:[#allocation2 + $0xe8] sm:$0xf] %v5193_v46  ;;  %v1198_v58 = vor.u32 %v1196_v42, %v1195_v49  ;;  %5871 = vmatpush3.bf16.msra.mxu1 %v6170_v36  ;;  %v6200_v55 = vld [vmem:[%s6838_s14 + $0x90] sm:$0xff]   ;;  %v870_v42 = vpop.f32.mrf.mxu0 }
 0x1c4   : > { %v1393_v56 = vsel %vm7014_vm12, %v1214_v22, %v1392_v27  ;;  %v1571_v0 = vrot.slane %v1570_v48, 4  ;;  %v1199_v1 = vrot.slane %v1195_v49, 4  ;;  %v1561_v2 = vor.u32 %v1560_v51, %v1559_v37  ;;  %v7225_v25 = vld [vmem:[%s6832_s12] ss:$0 sm:$0xff]  ;;  %v7231_v26 = vld [vmem:[#allocation2 + $0x48] ss:$12 sps:$4 sm:$0xff]   ;;  %5872 = vmatprep.subr.bf16.mxu1 %v6189_v4 }
 0x1c5   : > { %1394 = vst [vmem:[#allocation2 + $0xf0] sm:$0xf] %v1393_v56  ;;  %v1219_v8 = vrot.slane %v1217_v57, 7  ;;  %v1572_v9 = vrot.slane %v1220_v59, 5  ;;  %v1574_v10 = vrot.slane %v1217_v57, 4  ;;  %v1203_v17 = vrot.slane %v1201_v61, 7  ;;  %2402 = vmatmul.mubr.bf16.gmra.mxu1 %v7231_v26 }
 0x1c6   : > { %v1389_v15 = vsel %vm7014_vm12, %v1198_v58, %v1388_v45  ;;  %v1562_v54 = vrot.slane %v1561_v2, 4  ;;  %v1204_v6 = vshll.u32 %v5193_v46, 16  ;;  %v1565_v18 = vrot.slane %v1201_v61, 4  ;;  %v6150_v27 = vld [vmem:[#allocation2 + $0xc8] ss:$12 sps:$4 sm:$0xff]   ;;  %2409 = vmatprep.mubr.bf16.mxu1 %v7222_v5  ;;  %v6207_v56 = vld [vmem:[%s6838_s14 + $0x88] sm:$0xff]  }
 0x1c7   : > { %1390 = vst [vmem:[#allocation2 + $0xd8] sm:$0xf] %v1389_v15  ;;  %v1222_v19 = vor.u32 %v1220_v59, %v1219_v8  ;;  %v1573_v20 = vsel %vm7026_vm13, %v1571_v0, %v1572_v9  ;;  %v1575_v21 = vor.u32 %v1574_v10, %v1572_v9  ;;  %v923_v23 = vmul.f32 0.1, %v7185_v11  ;;  %v7239_v38 = vld [vmem:[%s6838_s14 + $0x238] sm:$0xff]   ;;  %5873 = vmatpush3.bf16.msra.mxu1 %v6189_v4  ;;  %s6445_s12 = sshll.u32 %s6573_s29, 4  ;;  %s6446_s12 = int_to_ptr.vmem [resolvable:$false] %s6445_s12 }
 0x1c8   : > { %1700 = vst [vmem:[#allocation2 + $0xf8] sm:$0xf] %v1573_v20  ;;  %v1206_v63 = vor.u32 %v1204_v6, %v1203_v17  ;;  %v1563_v24 = vrot.slane %v1204_v6, 5  ;;  %v855_v12 = vadd.f32 %v7225_v25, %v7187_v13  ;;  %v866_v3 = vadd.f32 %v7225_v25, %v7197_v33  ;;  %v1697_v40 = vld [vmem:[#allocation2 + $0xec] sm:$0xf]  ;;  %5874 = vmatprep.subr.bf16.mxu1 %v6200_v55  ;;  %v6214_v6 = vld [vmem:[%s6838_s14 + $0x80] sm:$0xff]   ;;  %p6448_p3 = scmp.lt.s32.totalorder %s7823_s18, %s6446_s12 }
 0x1c9   : > { %v1223_v28 = vsel %vm7034_vm14, %v1215_v31, %v1222_v19  ;;  %v1576_v29 = vrot.slane %v1575_v21, 4  ;;  %v955_v36 = vmax.f32 %v7185_v11, %v923_v23  ;;  %v858_v14 = vadd.f32 %v7225_v25, %v857_v52  ;;  %v6149_v35 = vld [vmem:[#allocation2 + $0xb0] ss:$12 sps:$4 sm:$0xff]   ;;  %5912 = vmatprep.subr.bf16.mxu0 %v7239_v38  ;;  %v1400_v59 = vld [vmem:[#allocation2 + $0x120] sm:$0xf]  ;;  %s6447_s13 = scalar_lea.vmem %s6446_s12, 4096 }
 0x1ca   : > { %1395 = vst [vmem:[#allocation2 + $0xfc] sm:$0xf] %v1223_v28  ;;  %v1207_v13 = vsel %vm7034_vm14, %v1199_v1, %v1206_v63  ;;  %v1564_v33 = vsel %vm7026_vm13, %v1562_v54, %v1563_v24  ;;  %v1566_v39 = vor.u32 %v1565_v18, %v1563_v24  ;;  %v921_v41 = vmul.f32 0.1, %v855_v12  ;;  %5844 = vmatprep.mubr.bf16.mxu0 %v6149_v35  ;;  %v7260_v1 = vpop.f32.mrf.mxu0  ;;  %v7262_v2 = vld [vmem:[#allocation2 + $0x60] ss:$12 sps:$4 sm:$0xff]   ;;  %p6449_p10 = scmp.lt.s32.totalorder %s6447_s13, %s6441_s7 }
 0x1cb   : > { %v1702_v11 = vsel %vm7045_vm15, %v1576_v29, %v1701_v16  ;;  %1391 = vst [vmem:[#allocation2 + $0xe4] sm:$0xf] %v1207_v13  ;;  %1696 = vst [vmem:[#allocation2 + $0xe0] sm:$0xf] %v1564_v33  ;;  %v5198_v43 = vpack.c.bf16 %v955_v36, %v955_v36  ;;  %v924_v44 = vmul.f32 0.1, %v866_v3  ;;  %v879_v46 = vadd.f32 %v7225_v25, %v5810_v62 }
 0x1cc   : > { %v922_v22 = vmul.f32 0.1, %v858_v14  ;;  %1703 = vst [vmem:[#allocation2 + $0x104] sm:$0xf] %v1702_v11  ;;  %v1567_v31 = vrot.slane %v1566_v39, 4  ;;  %v953_v45 = vmax.f32 %v855_v12, %v921_v41  ;;  %v7251_v48 = vadd.f32 %v7225_v25, %v870_v42  ;;  %5845 = vmatmul.mubr.bf16.gmra.mxu0 %v6150_v27  ;;  %5875 = vmatpush3.bf16.msra.mxu1 %v6200_v55  ;;  %v7269_v27 = vpop.f32.mrf.mxu0  ;;  %p6450_p11 = por %p6449_p10, %p6448_p3 }
 0x1cd   : > { %v1241_v49 = vshrl.u32 %v5198_v43, 16  ;;  %v1244_v37 = vshll.u32 %v5198_v43, 16  ;;  %1474 = vst [vmem:[#allocation2 + $0x124] sm:$0xf] %v5198_v43  ;;  %v956_v51 = vmax.f32 %v866_v3, %v924_v44  ;;  %v927_v0 = vmul.f32 0.1, %v879_v46  ;;  %5876 = vmatprep.subr.bf16.mxu1 %v6207_v56  ;;  %2410 = vmatmul.mubr.bf16.gmra.mxu1 %v7262_v2 }
 0x1ce   : > { %v954_v52 = vmax.f32 %v858_v14, %v922_v22  ;;  %v1698_v57 = vsel %vm7045_vm15, %v1567_v31, %v1697_v40  ;;  %v5196_v61 = vpack.c.bf16 %v953_v45, %v953_v45  ;;  %v7258_v58 = vmul.f32 0.1, %v7251_v48  ;;  %v1396_v20 = vld [vmem:[#allocation2 + $0x108] sm:$0xf]  ;;  %v1709_v40 = vld [vmem:[#allocation2 + $0x134] sm:$0xf]  ;;  %p6451_p4 = pnand %p6450_p11, %p6444_p13 }
 0x1cf   : > { %1699 = vst [vmem:[#allocation2 + $0xec] sm:$0xf] %v1698_v57  ;;  %v1243_v4 = vrot.slane %v1241_v49, 7  ;;  %v1586_v8 = vrot.slane %v1241_v49, 4  ;;  %v1587_v9 = vrot.slane %v1244_v37, 5  ;;  %v5199_v10 = vpack.c.bf16 %v956_v51, %v956_v51  ;;  %v6220_v44 = vld [vmem:[%s6838_s14 + $0x1f8] sm:$0xff]   ;;  %v5814_v49 = vpop.f32.mrf.mxu0 }
 0x1d0   : > { %v1225_v17 = vshrl.u32 %v5196_v61, 16  ;;  %v1228_v15 = vshll.u32 %v5196_v61, 16  ;;  %1472 = vst [vmem:[#allocation2 + $0x10c] sm:$0xf] %v5196_v61  ;;  %v5197_v54 = vpack.c.bf16 %v954_v52, %v954_v52  ;;  %v959_v16 = vmax.f32 %v879_v46, %v927_v0  ;;  %v7265_v23 = vld [vmem:[#allocation2 + $0x7c] ss:$12 sps:$4 sm:$0xff]   ;;  %5877 = vmatpush3.bf16.msra.mxu1 %v6207_v56 }
 0x1d1   : > { %v1246_v18 = vor.u32 %v1244_v37, %v1243_v4  ;;  %v1247_v62 = vrot.slane %v1243_v4, 4  ;;  %v1588_v19 = vor.u32 %v1587_v9, %v1586_v8  ;;  %v1249_v21 = vshrl.u32 %v5199_v10, 16  ;;  %1475 = vst [vmem:[#allocation2 + $0x130] sm:$0xf] %v5199_v10  ;;  %2417 = vmatprep.mubr.bf16.mxu1 %v7265_v23  ;;  %5878 = vmatprep.subr.bf16.mxu1 %v6214_v6  ;;  %v1705_v0 = vld [vmem:[#allocation2 + $0x11c] sm:$0xf] }
 0x1d2   : > { %v7267_v63 = vrot.slane %v1225_v17, 7  ;;  %v1577_v24 = vrot.slane %v1225_v17, 4  ;;  %v1578_v12 = vrot.slane %v1228_v15, 5  ;;  %v1252_v3 = vshll.u32 %v5199_v10, 16  ;;  %1473 = vst [vmem:[#allocation2 + $0x118] sm:$0xf] %v5197_v54 }
 0x1d3   : > { %v1401_v55 = vsel %vm7014_vm12, %v1246_v18, %v1400_v59  ;;  %v1589_v28 = vrot.slane %v1588_v19, 4  ;;  %v1251_v29 = vrot.slane %v1249_v21, 7  ;;  %v1592_v36 = vrot.slane %v1249_v21, 4  ;;  %v6156_v43 = vld [vmem:[#allocation2 + $0xf8] ss:$12 sps:$4 sm:$0xff]   ;;  %v886_v19 = vpop.f32.mrf.mxu0 }
 0x1d4   : > { %1402 = vst [vmem:[#allocation2 + $0x120] sm:$0xf] %v1401_v55  ;;  %v1230_v14 = vor.u32 %v1228_v15, %v7267_v63  ;;  %v1231_v35 = vrot.slane %v7267_v63, 4  ;;  %v1579_v13 = vor.u32 %v1578_v12, %v1577_v24  ;;  %v1590_v33 = vrot.slane %v1252_v3, 5  ;;  %v7284_v59 = vld [vmem:[#allocation2 + $0x78] ss:$12 sps:$4 sm:$0xff]   ;;  %5879 = vmatpush3.bf16.msra.mxu1 %v6214_v6 }
 0x1d5   : > { %v1254_v39 = vor.u32 %v1252_v3, %v1251_v29  ;;  %v1233_v41 = vshrl.u32 %v5197_v54, 16  ;;  %v1236_v42 = vshll.u32 %v5197_v54, 16  ;;  %v5202_v11 = vpack.c.bf16 %v959_v16, %v959_v16  ;;  %v7292_v16 = vld [vmem:[#allocation2 + $0x94] ss:$12 sps:$4 sm:$0xff]   ;;  %2418 = vmatmul.mubr.bf16.gmra.mxu1 %v7284_v59  ;;  %5632 = vmatprep.subr.bf16.mxu1 %v6220_v44 }
 0x1d6   : > { %v1397_v22 = vsel %vm7014_vm12, %v1230_v14, %v1396_v20  ;;  %v1580_v31 = vrot.slane %v1579_v13, 4  ;;  %v1591_v45 = vsel %vm7026_vm13, %v1589_v28, %v1590_v33  ;;  %v1593_v46 = vor.u32 %v1592_v36, %v1590_v33  ;;  %v6155_v37 = vld [vmem:[#allocation2 + $0xe0] ss:$12 sps:$4 sm:$0xff]   ;;  %2425 = vmatprep.mubr.bf16.mxu1 %v7292_v16 }
 0x1d7   : > { %1398 = vst [vmem:[#allocation2 + $0x108] sm:$0xf] %v1397_v22  ;;  %v1255_v51 = vsel %vm7034_vm14, %v1247_v62, %v1254_v39  ;;  %1708 = vst [vmem:[#allocation2 + $0x128] sm:$0xf] %v1591_v45  ;;  %v1235_v52 = vrot.slane %v1233_v41, 7  ;;  %v1581_v56 = vrot.slane %v1236_v42, 5  ;;  %v957_v9 = vmax.f32 %v7251_v48, %v7258_v58  ;;  %5848 = vmatprep.mubr.bf16.mxu0 %v6155_v37 }
 0x1d8   : > { %v1583_v57 = vrot.slane %v1233_v41, 4  ;;  %1478 = vst [vmem:[#allocation2 + $0x154] sm:$0xf] %v5202_v11  ;;  %1403 = vst [vmem:[#allocation2 + $0x12c] sm:$0xf] %v1255_v51  ;;  %v1594_v61 = vrot.slane %v1593_v46, 4  ;;  %v882_v54 = vadd.f32 %v7225_v25, %v7260_v1  ;;  %5849 = vmatmul.mubr.bf16.gmra.mxu0 %v6156_v43  ;;  %v874_v55 = vadd.f32 %v7225_v25, %v7269_v27 }
 0x1d9   : > { %v1273_v4 = vshrl.u32 %v5202_v11, 16  ;;  %v1276_v8 = vshll.u32 %v5202_v11, 16  ;;  %v1238_v10 = vor.u32 %v1236_v42, %v1235_v52  ;;  %v1582_v17 = vsel %vm7026_vm13, %v1580_v31, %v1581_v56  ;;  %v1408_v48 = vld [vmem:[#allocation2 + $0x150] sm:$0xf]  ;;  %v1404_v27 = vld [vmem:[#allocation2 + $0x138] sm:$0xf] }
 0x1da   : > { %v1584_v15 = vor.u32 %v1583_v57, %v1581_v56  ;;  %v1710_v18 = vsel %vm7045_vm15, %v1594_v61, %v1709_v40  ;;  %1704 = vst [vmem:[#allocation2 + $0x110] sm:$0xf] %v1582_v17  ;;  %v5200_v21 = vpack.c.bf16 %v957_v9, %v957_v9  ;;  %v928_v63 = vmul.f32 0.1, %v882_v54  ;;  %v5815_v40 = vpop.f32.mrf.mxu0  ;;  %v7317_v46 = vld [vmem:[#allocation2 + $0x90] ss:$12 sps:$4 sm:$0xff]  }
 0x1db   : > { %v7296_v62 = vrot.slane %v1273_v4, 7  ;;  %v1604_v58 = vrot.slane %v1273_v4, 4  ;;  %v1605_v6 = vrot.slane %v1276_v8, 5  ;;  %1711 = vst [vmem:[#allocation2 + $0x134] sm:$0xf] %v1710_v18  ;;  %v1239_v1 = vsel %vm7034_vm14, %v1231_v35, %v1238_v10 }
 0x1dc   : > { %v1585_v20 = vrot.slane %v1584_v15, 4  ;;  %1399 = vst [vmem:[#allocation2 + $0x114] sm:$0xf] %v1239_v1  ;;  %v1257_v29 = vshrl.u32 %v5200_v21, 16  ;;  %v1260_v36 = vshll.u32 %v5200_v21, 16  ;;  %v960_v14 = vmax.f32 %v882_v54, %v928_v63 }
 0x1dd   : > { %v1278_v24 = vor.u32 %v1276_v8, %v7296_v62  ;;  %v1279_v12 = vrot.slane %v7296_v62, 4  ;;  %v1606_v3 = vor.u32 %v1605_v6, %v1604_v58  ;;  %1476 = vst [vmem:[#allocation2 + $0x13c] sm:$0xf] %v5200_v21  ;;  %v926_v33 = vmul.f32 0.1, %v874_v55  ;;  %v889_v8 = vpop.f32.mrf.mxu0  ;;  %2426 = vmatmul.mubr.bf16.gmra.mxu1 %v7317_v46 }
 0x1de   : > { %v1706_v28 = vsel %vm7045_vm15, %v1585_v20, %v1705_v0  ;;  %v895_v39 = vadd.f32 %v7225_v25, %v5814_v49  ;;  %v7311_v41 = vrot.slane %v1257_v29, 7  ;;  %v1595_v42 = vrot.slane %v1257_v29, 4  ;;  %v7319_v37 = vld [vmem:[#allocation2 + $0xac] ss:$12 sps:$4 sm:$0xff]  }
 0x1df   : > { %1707 = vst [vmem:[#allocation2 + $0x11c] sm:$0xf] %v1706_v28  ;;  %v1409_v35 = vsel %vm7014_vm12, %v1278_v24, %v1408_v48  ;;  %v1607_v13 = vrot.slane %v1606_v3, 4  ;;  %v1596_v11 = vrot.slane %v1260_v36, 5  ;;  %v5203_v43 = vpack.c.bf16 %v960_v14, %v960_v14  ;;  %2433 = vmatprep.mubr.bf16.mxu1 %v7319_v37  ;;  %v1717_v3 = vld [vmem:[#allocation2 + $0x164] sm:$0xf] }
 0x1e0   : > { %1410 = vst [vmem:[#allocation2 + $0x150] sm:$0xf] %v1409_v35  ;;  %v958_v44 = vmax.f32 %v874_v55, %v926_v33  ;;  %v931_v22 = vmul.f32 0.1, %v895_v39  ;;  %v887_v31 = vadd.f32 %v7225_v25, %v886_v19  ;;  %v7315_v45 = vadd.f32 %v7225_v25, %v5815_v40  ;;  %v7333_v33 = vld [vmem:[#allocation2 + $0xc4] ss:$12 sps:$4 sm:$0xff]  }
 0x1e1   : > { %v1262_v49 = vor.u32 %v1260_v36, %v7311_v41  ;;  %v1263_v51 = vrot.slane %v7311_v41, 4  ;;  %v1597_v52 = vor.u32 %v1596_v11, %v1595_v42  ;;  %v1281_v56 = vshrl.u32 %v5203_v43, 16  ;;  %1479 = vst [vmem:[#allocation2 + $0x160] sm:$0xf] %v5203_v43  ;;  %v1713_v40 = vld [vmem:[#allocation2 + $0x14c] sm:$0xf] }
 0x1e2   : > { %v1284_v57 = vshll.u32 %v5203_v43, 16  ;;  %v5201_v61 = vpack.c.bf16 %v958_v44, %v958_v44  ;;  %v963_v0 = vmax.f32 %v895_v39, %v931_v22  ;;  %v929_v4 = vmul.f32 0.1, %v887_v31  ;;  %v6165_v58 = vld [vmem:[#allocation2 + $0x128] ss:$12 sps:$4 sm:$0xff]  }
 0x1e3   : > { %v1405_v9 = vsel %vm7014_vm12, %v1262_v49, %v1404_v27  ;;  %v1598_v10 = vrot.slane %v1597_v52, 4  ;;  %v1283_v17 = vrot.slane %v1281_v56, 7  ;;  %v1610_v15 = vrot.slane %v1281_v56, 4  ;;  %v7337_v27 = vld [vmem:[#allocation2 + $0xa8] ss:$12 sps:$4 sm:$0xff]  }
 0x1e4   : > { %1406 = vst [vmem:[#allocation2 + $0x138] sm:$0xf] %v1405_v9  ;;  %v1608_v54 = vrot.slane %v1284_v57, 5  ;;  %v1265_v18 = vshrl.u32 %v5201_v61, 16  ;;  %v1268_v62 = vshll.u32 %v5201_v61, 16  ;;  %v5206_v48 = vpack.c.bf16 %v963_v0, %v963_v0 }
 0x1e5   : > { %1477 = vst [vmem:[#allocation2 + $0x148] sm:$0xf] %v5201_v61  ;;  %v1286_v6 = vor.u32 %v1284_v57, %v1283_v17  ;;  %v961_v19 = vmax.f32 %v887_v31, %v929_v4  ;;  %v932_v1 = vmul.f32 0.1, %v7315_v45  ;;  %v890_v20 = vadd.f32 %v7225_v25, %v889_v8  ;;  %v1416_v31 = vld [vmem:[#allocation2 + $0x180] sm:$0xf]  ;;  %2434 = vmatmul.mubr.bf16.gmra.mxu1 %v7337_v27 }
 0x1e6   : > { %v6164_v21 = vld [vmem:[#allocation2 + $0x110] ss:$12 sps:$4 sm:$0xff]   ;;  %v1609_v63 = vsel %vm7026_vm13, %v1607_v13, %v1608_v54  ;;  %v1611_v24 = vor.u32 %v1610_v15, %v1608_v54  ;;  %v1267_v55 = vrot.slane %v1265_v18, 7  ;;  %v1599_v28 = vrot.slane %v1268_v62, 5  ;;  %1482 = vst [vmem:[#allocation2 + $0x184] sm:$0xf] %v5206_v48  ;;  %2441 = vmatprep.mubr.bf16.mxu1 %v7333_v33 }
 0x1e7   : > { %v1287_v29 = vsel %vm7034_vm14, %v1279_v12, %v1286_v6  ;;  %1716 = vst [vmem:[#allocation2 + $0x158] sm:$0xf] %v1609_v63  ;;  %v1601_v36 = vrot.slane %v1265_v18, 4  ;;  %v1305_v14 = vshrl.u32 %v5206_v48, 16  ;;  %v1308_v35 = vshll.u32 %v5206_v48, 16  ;;  %5852 = vmatprep.mubr.bf16.mxu0 %v6164_v21 }
 0x1e8   : > { %1411 = vst [vmem:[#allocation2 + $0x15c] sm:$0xf] %v1287_v29  ;;  %v1612_v25 = vrot.slane %v1611_v24, 4  ;;  %v1270_v39 = vor.u32 %v1268_v62, %v1267_v55  ;;  %v1600_v13 = vsel %vm7026_vm13, %v1598_v10, %v1599_v28  ;;  %v5204_v41 = vpack.c.bf16 %v961_v19, %v961_v19  ;;  %5853 = vmatmul.mubr.bf16.gmra.mxu0 %v6165_v58  ;;  %v1412_v17 = vld [vmem:[#allocation2 + $0x168] sm:$0xf] }
 0x1e9   : > { %v1602_v42 = vor.u32 %v1601_v36, %v1599_v28  ;;  %1712 = vst [vmem:[#allocation2 + $0x140] sm:$0xf] %v1600_v13  ;;  %v1307_v12 = vrot.slane %v1305_v14, 7  ;;  %v1622_v11 = vrot.slane %v1305_v14, 4  ;;  %v1623_v43 = vrot.slane %v1308_v35, 5 }
 0x1ea   : > { %v1718_v44 = vsel %vm7045_vm15, %v1612_v25, %v1717_v3  ;;  %v1271_v22 = vsel %vm7034_vm14, %v1263_v51, %v1270_v39  ;;  %v1289_v49 = vshrl.u32 %v5204_v41, 16  ;;  %v1292_v52 = vshll.u32 %v5204_v41, 16  ;;  %1480 = vst [vmem:[#allocation2 + $0x16c] sm:$0xf] %v5204_v41  ;;  %v7350_v58 = vld [vmem:[#allocation2 + $0xc0] ss:$12 sps:$4 sm:$0xff]  }
 0x1eb   : > { %1719 = vst [vmem:[#allocation2 + $0x164] sm:$0xf] %v1718_v44  ;;  %1407 = vst [vmem:[#allocation2 + $0x144] sm:$0xf] %v1271_v22  ;;  %v1603_v56 = vrot.slane %v1602_v42, 4  ;;  %v1310_v57 = vor.u32 %v1308_v35, %v1307_v12  ;;  %v1624_v61 = vor.u32 %v1623_v43, %v1622_v11  ;;  %v964_v9 = vmax.f32 %v7315_v45, %v932_v1 }
 0x1ec   : > { %v1291_v0 = vrot.slane %v1289_v49, 7  ;;  %v1613_v4 = vrot.slane %v1289_v49, 4  ;;  %v1614_v8 = vrot.slane %v1292_v52, 5  ;;  %v930_v15 = vmul.f32 0.1, %v890_v20 }
 0x1ed   : > { %v1714_v51 = vsel %vm7045_vm15, %v1603_v56, %v1713_v40  ;;  %v1417_v10 = vsel %vm7014_vm12, %v1310_v57, %v1416_v31  ;;  %v5207_v18 = vpack.c.bf16 %v964_v9, %v964_v9  ;;  %v7352_v6 = vld [vmem:[#allocation2 + $0xdc] ss:$12 sps:$4 sm:$0xff]   ;;  %v1625_v19 = vrot.slane %v1624_v61, 4  ;;  %2442 = vmatmul.mubr.bf16.gmra.mxu1 %v7350_v58  ;;  %v1725_v29 = vld [vmem:[#allocation2 + $0x194] sm:$0xf] }
 0x1ee   : > { %1715 = vst [vmem:[#allocation2 + $0x14c] sm:$0xf] %v1714_v51  ;;  %1418 = vst [vmem:[#allocation2 + $0x180] sm:$0xf] %v1417_v10  ;;  %v1294_v54 = vor.u32 %v1292_v52, %v1291_v0  ;;  %v1615_v62 = vor.u32 %v1614_v8, %v1613_v4  ;;  %v962_v48 = vmax.f32 %v890_v20, %v930_v15  ;;  %v1311_v63 = vrot.slane %v1307_v12, 4  ;;  %v6233_v15 = vld [vmem:[%s6838_s14 + $0x230] sm:$0xff]  }
 0x1ef   : > { %v1313_v1 = vshrl.u32 %v5207_v18, 16  ;;  %v1316_v21 = vshll.u32 %v5207_v18, 16  ;;  %1483 = vst [vmem:[#allocation2 + $0x190] sm:$0xf] %v5207_v18  ;;  %2449 = vmatprep.mubr.bf16.mxu1 %v7352_v6  ;;  %v1295_v32 = vrot.slane %v1291_v0, 4  ;;  %v6242_v18 = vld [vmem:[%s6838_s14 + $0x228] sm:$0xff]  }
 0x1f0   : > { %v1413_v45 = vsel %vm7014_vm12, %v1294_v54, %v1412_v17  ;;  %v5205_v24 = vpack.c.bf16 %v962_v48, %v962_v48  ;;  %v1616_v20 = vrot.slane %v1615_v62, 4  ;;  %v1721_v52 = vld [vmem:[#allocation2 + $0x17c] sm:$0xf]  ;;  %v7366_v56 = vld [vmem:[#allocation2 + $0xd8] ss:$12 sps:$4 sm:$0xff]   ;;  %v6247_v48 = vld [vmem:[%s6838_s14 + $0x220] sm:$0xff]  }
 0x1f1   : > { %1414 = vst [vmem:[#allocation2 + $0x168] sm:$0xf] %v1413_v45  ;;  %v1315_v3 = vrot.slane %v1313_v1, 7  ;;  %v1626_v55 = vrot.slane %v1316_v21, 5  ;;  %v1628_v28 = vrot.slane %v1313_v1, 4  ;;  %v6253_v1 = vld [vmem:[%s6838_s14 + $0x210] sm:$0xff]  }
 0x1f2   : > { %v1297_v36 = vshrl.u32 %v5205_v24, 16  ;;  %v1300_v14 = vshll.u32 %v5205_v24, 16  ;;  %1481 = vst [vmem:[#allocation2 + $0x178] sm:$0xf] %v5205_v24  ;;  %v6175_v13 = vld [vmem:[#allocation2 + $0x158] ss:$12 sps:$4 sm:$0xff]  }
 0x1f3   : > { %v1318_v35 = vor.u32 %v1316_v21, %v1315_v3  ;;  %v1627_v25 = vsel %vm7026_vm13, %v1625_v19, %v1626_v55  ;;  %v1629_v39 = vor.u32 %v1628_v28, %v1626_v55  ;;  %v7370_v0 = vld [vmem:[#allocation2 + $0xf4] ss:$12 sps:$4 sm:$0xff]   ;;  %v7376_v4 = vld [vmem:[#allocation2 + $0xf0] ss:$12 sps:$4 sm:$0xff]   ;;  %v7378_v8 = vld [vmem:[#allocation2 + $0x10c] ss:$12 sps:$4 sm:$0xff]  }
 0x1f4   : > { %1724 = vst [vmem:[#allocation2 + $0x188] sm:$0xf] %v1627_v25  ;;  %v1299_v40 = vrot.slane %v1297_v36, 7  ;;  %v1617_v41 = vrot.slane %v1300_v14, 5  ;;  %v1619_v42 = vrot.slane %v1297_v36, 4  ;;  %v6260_v21 = vld [vmem:[%s6838_s14 + $0x208] sm:$0xff]  }
 0x1f5   : > { %v1319_v12 = vsel %vm7034_vm14, %v1311_v63, %v1318_v35  ;;  %v1630_v11 = vrot.slane %v1629_v39, 4  ;;  %v6174_v43 = vld [vmem:[#allocation2 + $0x140] ss:$12 sps:$4 sm:$0xff]   ;;  %2450 = vmatmul.mubr.bf16.gmra.mxu1 %v7366_v56  ;;  %v6195_v9 = vld [vmem:[#allocation2 + $0x4] ss:$12 sps:$4 sm:$0xff]  }
 0x1f6   : > { %1419 = vst [vmem:[#allocation2 + $0x18c] sm:$0xf] %v1319_v12  ;;  %v1302_v44 = vor.u32 %v1300_v14, %v1299_v40  ;;  %v1618_v22 = vsel %vm7026_vm13, %v1616_v20, %v1617_v41  ;;  %v1620_v31 = vor.u32 %v1619_v42, %v1617_v41  ;;  %5856 = vmatprep.mubr.bf16.mxu0 %v6174_v43  ;;  %v7382_v7 = vld [vmem:[#allocation2 + $0x108] ss:$12 sps:$4 sm:$0xff]   ;;  %v7384_v10 = vld [vmem:[#allocation2 + $0x124] ss:$12 sps:$4 sm:$0xff]  }
 0x1f7   : > { %v1726_v49 = vsel %vm7045_vm15, %v1630_v11, %v1725_v29  ;;  %1720 = vst [vmem:[#allocation2 + $0x170] sm:$0xf] %v1618_v22  ;;  %5857 = vmatmul.mubr.bf16.gmra.mxu0 %v6175_v13  ;;  %2457 = vmatprep.mubr.bf16.mxu1 %v7370_v0  ;;  %v6193_v17 = vld [vmem:[#allocation2] ss:$12 sps:$4 sm:$0xff]   ;;  %v7394_v62 = vld [vmem:[#allocation2 + $0x13c] ss:$12 sps:$4 sm:$0xff]  }
 0x1f8   : > { %1727 = vst [vmem:[#allocation2 + $0x194] sm:$0xf] %v1726_v49  ;;  %v1303_v57 = vsel %vm7034_vm14, %v1295_v32, %v1302_v44  ;;  %v1621_v61 = vrot.slane %v1620_v31, 4  ;;  %v7390_v54 = vld [vmem:[#allocation2 + $0x120] ss:$12 sps:$4 sm:$0xff]   ;;  %v6262_v24 = vld [vmem:[%s6838_s14 + $0x200] sm:$0xff]  }
 0x1f9   : > { %1415 = vst [vmem:[#allocation2 + $0x174] sm:$0xf] %v1303_v57  ;;  %v7400_v19 = vld [vmem:[#allocation2 + $0x138] ss:$12 sps:$4 sm:$0xff]   ;;  %v7403_v45 = vld [vmem:[#allocation2 + $0x154] ss:$12 sps:$4 sm:$0xff]  }
 0x1fa   : > { %v1722_v53 = vsel %vm7045_vm15, %v1621_v61, %v1721_v52  ;;  %v7413_v63 = vld [vmem:[#allocation2 + $0x16c] ss:$12 sps:$4 sm:$0xff]   ;;  %v6225_v28 = vld [vmem:[%s6838_s14 + $0x1f0] sm:$0xff]   ;;  %v6234_v29 = vld [vmem:[%s6838_s14 + $0x1e0] sm:$0xff]  }
 0x1fb   : > { %1723 = vst [vmem:[#allocation2 + $0x17c] sm:$0xf] %v1722_v53  ;;  %v6221_v55 = vld [vmem:[#allocation2 + $0x20] ss:$12 sps:$4 sm:$0xff]   ;;  %v6223_v20 = vld [vmem:[#allocation2 + $0x38] ss:$12 sps:$4 sm:$0xff]  }
 0x1fc   : > { %v6228_v36 = vld [vmem:[#allocation2 + $0x68] ss:$12 sps:$4 sm:$0xff]   ;;  %v6243_v35 = vld [vmem:[%s6838_s14 + $0x1d0] sm:$0xff]   ;;  %v6248_v13 = vld [vmem:[%s6838_s14 + $0x1c8] sm:$0xff]  }
 0x1fd   : > { %2458 = vmatmul.mubr.bf16.gmra.mxu1 %v7376_v4  ;;  %v6218_v3 = vld [vmem:[#allocation2 + $0x180] ss:$12 sps:$4 sm:$0xff]   ;;  %v6236_v14 = vld [vmem:[%s6838_s14 + $0x1a0] sm:$0xff]   ;;  %v6232_v25 = vld [vmem:[#allocation2 + $0x98] ss:$12 sps:$4 sm:$0xff]  }
 0x1fe   : > { %2465 = vmatprep.mubr.bf16.mxu1 %v7378_v8  ;;  %v6238_v32 = vld [vmem:[%s6838_s14 + $0x1d8] sm:$0xff]   ;;  %v6245_v39 = vld [vmem:[%s6838_s14 + $0x190] sm:$0xff]   ;;  %v6254_v40 = vld [vmem:[%s6838_s14 + $0x1c0] sm:$0xff]  }
 0x1ff   : > { %v6184_v60 = vld [vmem:[#allocation2 + $0x188] ss:$12 sps:$4 sm:$0xff]   ;;  %v6239_v12 = vld [vmem:[#allocation2 + $0xe0] ss:$12 sps:$4 sm:$0xff]   ;;  %v6251_v49 = vld [vmem:[#allocation2 + $0x158] ss:$12 sps:$4 sm:$0xff]  }
 0x200   : > { %v6237_v41 = vld [vmem:[#allocation2 + $0xc8] ss:$12 sps:$4 sm:$0xff]   ;;  %v6249_v22 = vld [vmem:[#allocation2 + $0x140] ss:$12 sps:$4 sm:$0xff]  }
 0x201   : > { %v6256_v42 = vld [vmem:[%s6838_s14 + $0x180] sm:$0xff]  }
 0x202   : > { %v6183_v51 = vld [vmem:[#allocation2 + $0x170] ss:$12 sps:$4 sm:$0xff]   ;;  %v6246_v11 = vld [vmem:[#allocation2 + $0x128] ss:$12 sps:$4 sm:$0xff]  }
 0x203   : > { %5860 = vmatprep.mubr.bf16.mxu0 %v6183_v51  ;;  %v6259_v61 = vld [vmem:[#allocation2 + $0x34] ss:$12 sps:$4 sm:$0xff]  }
 0x204   : > { %5861 = vmatmul.mubr.bf16.gmra.mxu0 %v6184_v60 }
 0x205   : > { %3107 = vmatprep.mubr.bf16.mxu0 %v6195_v9  ;;  %2466 = vmatmul.mubr.bf16.gmra.mxu1 %v7382_v7 }
 0x206   : > { %2473 = vmatprep.mubr.bf16.mxu1 %v7384_v10 }
 0x20c   : > { %3108 = vmatmul.mubr.bf16.vlgmr.msra.gmra.mxu0 %v6193_v17 }
 0x20d   : > { %3115 = vmatprep.mubr.bf16.mxu0 %v7167_v50  ;;  %5913 = vmatpush3.bf16.msra.mxu0 %v7239_v38  ;;  %v6340_v50 = vld [vmem:[#allocation2 + $0x34] ss:$12 sps:$4 sm:$0xff]   ;;  %v6252_v38 = vld [vmem:[%s6838_s14 + $0x218] sm:$0xff]  }
 0x20e   : > { %5914 = vmatprep.subr.bf16.mxu0 %v6233_v15  ;;  %2474 = vmatmul.mubr.bf16.gmra.mxu1 %v7390_v54 }
 0x20f   : > { %2481 = vmatprep.mubr.bf16.mxu1 %v7394_v62 }
 0x211   : > { %5915 = vmatpush3.bf16.msra.mxu0 %v6233_v15 }
 0x212   : > { %5916 = vmatprep.subr.bf16.mxu0 %v6242_v18 }
 0x214   : > { %3116 = vmatmul.mubr.bf16.gmra.mxu0 %v7165_v34  ;;  %v7410_v34 = vld [vmem:[#allocation2 + $0x150] ss:$12 sps:$4 sm:$0xff]  }
 0x215   : > { %3123 = vmatprep.mubr.bf16.mxu0 %v6340_v50  ;;  %5917 = vmatpush3.bf16.msra.mxu0 %v6242_v18  ;;  %v6267_v18 = vld [vmem:[#allocation2 + $0x48] ss:$12 sps:$4 sm:$0xff]  }
 0x216   : > { %5918 = vmatprep.subr.bf16.mxu0 %v6247_v48  ;;  %2482 = vmatmul.mubr.bf16.gmra.mxu1 %v7400_v19 }
 0x217   : > { %2489 = vmatprep.mubr.bf16.mxu1 %v7403_v45 }
 0x219   : > { %5919 = vmatpush3.bf16.msra.mxu0 %v6247_v48  ;;  %v6268_v48 = vld [vmem:[#allocation2 + $0x64] ss:$12 sps:$4 sm:$0xff]  }
 0x21a   : > { %5920 = vmatprep.subr.bf16.mxu0 %v6252_v38 }
 0x21c   : > { %3124 = vmatmul.mubr.bf16.gmra.mxu0 %v7195_v30  ;;  %v7420_v30 = vld [vmem:[#allocation2 + $0x168] ss:$12 sps:$4 sm:$0xff]  }
 0x21d   : > { %3131 = vmatprep.mubr.bf16.mxu0 %v7210_v47  ;;  %5921 = vmatpush3.bf16.msra.mxu0 %v6252_v38  ;;  %v6216_v47 = vld [vmem:[#allocation2 + $0x184] ss:$12 sps:$4 sm:$0xff]  }
 0x21e   : > { %5922 = vmatprep.subr.bf16.mxu0 %v6253_v1  ;;  %2490 = vmatmul.mubr.bf16.gmra.mxu1 %v7410_v34 }
 0x21f   : > { %2497 = vmatprep.mubr.bf16.mxu1 %v7413_v63 }
 0x221   : > { %5923 = vmatpush3.bf16.msra.mxu0 %v6253_v1 }
 0x222   : > { %5924 = vmatprep.subr.bf16.mxu0 %v6260_v21 }
 0x224   : > { %3132 = vmatmul.mubr.bf16.gmra.mxu0 %v7231_v26  ;;  %v6219_v26 = vld [vmem:[#allocation2 + $0x8] ss:$12 sps:$4 sm:$0xff]  }
 0x225   : > { %3139 = vmatprep.mubr.bf16.mxu0 %v7222_v5  ;;  %5925 = vmatpush3.bf16.msra.mxu0 %v6260_v21  ;;  %v6222_v5 = vld [vmem:[%s6838_s14 + $0x1b8] sm:$0xff]  }
 0x226   : > { %5926 = vmatprep.subr.bf16.mxu0 %v6262_v24  ;;  %2498 = vmatmul.mubr.bf16.gmra.mxu1 %v7420_v30 }
 0x227   : > { %2505 = vmatprep.mubr.bf16.mxu1 %v6216_v47 }
 0x229   : > { %5927 = vmatpush3.bf16.msra.mxu0 %v6262_v24 }
 0x22c   : > { %3140 = vmatmul.mubr.bf16.gmra.mxu0 %v7262_v2  ;;  %v6227_v2 = vld [vmem:[%s6838_s14 + $0x1b0] sm:$0xff]  }
 0x22d   : > { %3147 = vmatprep.mubr.bf16.mxu0 %v7265_v23  ;;  %v6229_v23 = vld [vmem:[%s6838_s14 + $0x1e8] sm:$0xff]  }
 0x22e   : > { %2506 = vmatmul.mubr.bf16.gmra.mxu1 %v6218_v3 }
 0x22f   : > { %5880 = vmatprep.mubr.bf16.mxu1 %v6219_v26  ;;  %v6272_v26 = vld [vmem:[#allocation2 + $0x60] ss:$12 sps:$4 sm:$0xff]  }
 0x234   : > { %3148 = vmatmul.mubr.bf16.gmra.mxu0 %v7284_v59  ;;  %v6231_v59 = vld [vmem:[%s6838_s14 + $0x1a8] sm:$0xff]  }
 0x235   : > { %3155 = vmatprep.mubr.bf16.mxu0 %v7292_v16  ;;  %v6226_v16 = vld [vmem:[#allocation2 + $0x50] ss:$12 sps:$4 sm:$0xff]  }
 0x236   : > { %5881 = vmatmul.mubr.bf16.vlgmr.msra.gmra.mxu1 %v6221_v55  ;;  %v6273_v55 = vld [vmem:[#allocation2 + $0x7c] ss:$12 sps:$4 sm:$0xff]  }
 0x237   : > { %5633 = vmatpush3.bf16.msra.mxu1 %v6222_v5  ;;  %5884 = vmatprep.mubr.bf16.mxu1 %v6223_v20 }
 0x238   : > { %5634 = vmatprep.subr.bf16.mxu1 %v6225_v28 }
 0x23b   : > { %5635 = vmatpush3.bf16.msra.mxu1 %v6227_v2  ;;  %v6265_v2 = vld [vmem:[#allocation2 + $0x50] ss:$12 sps:$4 sm:$0xff]  }
 0x23c   : > { %3156 = vmatmul.mubr.bf16.gmra.mxu0 %v7317_v46  ;;  %5636 = vmatprep.subr.bf16.mxu1 %v6229_v23  ;;  %v6240_v46 = vld [vmem:[%s6838_s14 + $0x198] sm:$0xff]  }
 0x23d   : > { %3163 = vmatprep.mubr.bf16.mxu0 %v7319_v37  ;;  %v6230_v37 = vld [vmem:[#allocation2 + $0x80] ss:$12 sps:$4 sm:$0xff]  }
 0x23e   : > { %5885 = vmatmul.mubr.bf16.gmra.mxu1 %v6226_v16  ;;  %v6266_v16 = vld [vmem:[#allocation2 + $0x68] ss:$12 sps:$4 sm:$0xff]  }
 0x23f   : > { %5888 = vmatprep.mubr.bf16.mxu1 %v6228_v36  ;;  %5637 = vmatpush3.bf16.msra.mxu1 %v6231_v59 }
 0x240   : > { %5638 = vmatprep.subr.bf16.mxu1 %v6234_v29 }
 0x243   : > { %5639 = vmatpush3.bf16.msra.mxu1 %v6236_v14 }
 0x244   : > { %3164 = vmatmul.mubr.bf16.gmra.mxu0 %v7337_v27  ;;  %5640 = vmatprep.subr.bf16.mxu1 %v6238_v32  ;;  %v6235_v27 = vld [vmem:[#allocation2 + $0xb0] ss:$12 sps:$4 sm:$0xff]  }
 0x245   : > { %3171 = vmatprep.mubr.bf16.mxu0 %v7333_v33  ;;  %v6250_v33 = vld [vmem:[%s6838_s14 + $0x188] sm:$0xff]  }
 0x246   : > { %5889 = vmatmul.mubr.bf16.gmra.mxu1 %v6230_v37 }
 0x247   : > { %5892 = vmatprep.mubr.bf16.mxu1 %v6232_v25  ;;  %5641 = vmatpush3.bf16.msra.mxu1 %v6240_v46  ;;  %v6277_v46 = vld [vmem:[#allocation2 + $0x78] ss:$12 sps:$4 sm:$0xff]  }
 0x248   : > { %5642 = vmatprep.subr.bf16.mxu1 %v6243_v35  ;;  %v6280_v35 = vld [vmem:[#allocation2 + $0x94] ss:$12 sps:$4 sm:$0xff]  }
 0x24b   : > { %5643 = vmatpush3.bf16.msra.mxu1 %v6245_v39 }
 0x24c   : > { %3172 = vmatmul.mubr.bf16.gmra.mxu0 %v7350_v58  ;;  %5644 = vmatprep.subr.bf16.mxu1 %v6248_v13  ;;  %v6241_v58 = vld [vmem:[#allocation2 + $0xf8] ss:$12 sps:$4 sm:$0xff]  }
 0x24d   : > { %3179 = vmatprep.mubr.bf16.mxu0 %v7352_v6  ;;  %v6244_v6 = vld [vmem:[#allocation2 + $0x110] ss:$12 sps:$4 sm:$0xff]  }
 0x24e   : > { %5893 = vmatmul.mubr.bf16.gmra.mxu1 %v6235_v27 }
 0x24f   : > { %5896 = vmatprep.mubr.bf16.mxu1 %v6237_v41  ;;  %5645 = vmatpush3.bf16.msra.mxu1 %v6250_v33  ;;  %v6270_v33 = vld [vmem:[#allocation2 + $0x80] ss:$12 sps:$4 sm:$0xff]  }
 0x250   : > { %5646 = vmatprep.subr.bf16.mxu1 %v6254_v40  ;;  %v6271_v40 = vld [vmem:[#allocation2 + $0x98] ss:$12 sps:$4 sm:$0xff]  }
 0x253   : > { %5647 = vmatpush3.bf16.msra.mxu1 %v6256_v42 }
 0x254   : > { %3180 = vmatmul.mubr.bf16.gmra.mxu0 %v7366_v56  ;;  %v6255_v56 = vld [vmem:[#allocation2 + $0x170] ss:$12 sps:$4 sm:$0xff]  }
 0x255   : > { %3187 = vmatprep.mubr.bf16.mxu0 %v7370_v0 }
 0x256   : > { %5897 = vmatmul.mubr.bf16.gmra.mxu1 %v6239_v12 }
 0x257   : > { %5900 = vmatprep.mubr.bf16.mxu1 %v6241_v58 }
 0x25c   : > { %3188 = vmatmul.mubr.bf16.gmra.mxu0 %v7376_v4  ;;  %v6257_v4 = vld [vmem:[#allocation2 + $0x30] ss:$12 sps:$4 sm:$0xff]  }
 0x25d   : > { %3195 = vmatprep.mubr.bf16.mxu0 %v7378_v8  ;;  %v6263_v8 = vld [vmem:[#allocation2 + $0x4c] ss:$12 sps:$4 sm:$0xff]  }
 0x25e   : > { %5901 = vmatmul.mubr.bf16.gmra.mxu1 %v6244_v6  ;;  %v6278_v6 = vld [vmem:[#allocation2 + $0x90] ss:$12 sps:$4 sm:$0xff]  }
 0x25f   : > { %5904 = vmatprep.mubr.bf16.mxu1 %v6246_v11 }
 0x260   : > { %v5834_v43 = vpop.f32.mrf.mxu0 }
 0x262   : > { %v2548_v44 = vpop.f32.mrf.mxu0 }
 0x264   : > { %3196 = vmatmul.mubr.bf16.gmra.mxu0 %v7382_v7  ;;  %v5835_v31 = vpop.f32.mrf.mxu0 }
 0x265   : > { %3203 = vmatprep.mubr.bf16.mxu0 %v7384_v10 }
 0x266   : > { %5905 = vmatmul.mubr.bf16.gmra.mxu1 %v6249_v22  ;;  %v2551_v52 = vpop.f32.mrf.mxu0 }
 0x267   : > { %5908 = vmatprep.mubr.bf16.mxu1 %v6251_v49 }
 0x26c   : > { %3204 = vmatmul.mubr.bf16.gmra.mxu0 %v7390_v54 }
 0x26d   : > { %3211 = vmatprep.mubr.bf16.mxu0 %v7394_v62 }
 0x26e   : > { %5909 = vmatmul.mubr.bf16.gmra.mxu1 %v6255_v56 }
 0x26f   : > { %3943 = vmatprep.mubr.bf16.mxu1 %v6259_v61  ;;  %v6276_v61 = vld [vmem:[#allocation2 + $0xc8] ss:$12 sps:$4 sm:$0xff]  }
 0x270   : > { %v7456_v57 = vpop.f32.mrf.mxu0 }
 0x272   : > { %v2564_v0 = vpop.f32.mrf.mxu0 }
 0x274   : > { %3212 = vmatmul.mubr.bf16.gmra.mxu0 %v7400_v19  ;;  %v7460_v53 = vpop.f32.mrf.mxu0  ;;  %v5376_v60 = vpop.f32.mrf.mxu1 }
 0x275   : > { %3219 = vmatprep.mubr.bf16.mxu0 %v7403_v45 }
 0x276   : > { %3944 = vmatmul.mubr.bf16.vlgmr.msra.gmra.mxu1 %v6257_v4  ;;  %v2567_v9 = vpop.f32.mrf.mxu0  ;;  %v5377_v51 = vpop.f32.mrf.mxu1 }
 0x277   : > { %3951 = vmatprep.mubr.bf16.mxu1 %v6263_v8  ;;  %v5378_v7 = vadd.f32 %v5377_v51, %v5376_v60  ;;  %v6283_v60 = vld [vmem:[#allocation2 + $0xa8] ss:$12 sps:$4 sm:$0xff]  }
 0x278   : > { %v5379_v10 = vpop.f32.mrf.mxu1 }
 0x279   : > { %v7464_v17 = vadd.f32 %v5378_v7, %v2548_v44  ;;  %v6285_v44 = vld [vmem:[#allocation2 + $0xac] ss:$12 sps:$4 sm:$0xff]  }
 0x27a   : > { %v5380_v54 = vpop.f32.mrf.mxu1 }
 0x27b   : > { %v5381_v62 = vadd.f32 %v5380_v54, %v5379_v10 }
 0x27c   : > { %3220 = vmatmul.mubr.bf16.gmra.mxu0 %v7410_v34  ;;  %v5382_v19 = vpop.f32.mrf.mxu1  ;;  %v6261_v34 = vld [vmem:[#allocation2 + $0x38] ss:$12 sps:$4 sm:$0xff]  }
 0x27d   : > { %3227 = vmatprep.mubr.bf16.mxu0 %v7413_v63  ;;  %v7470_v38 = vadd.f32 %v5381_v62, %v2551_v52  ;;  %v6275_v52 = vld [vmem:[#allocation2 + $0xb0] ss:$12 sps:$4 sm:$0xff]  }
 0x27e   : > { %v7466_v15 = vpop.f32.mrf.mxu0  ;;  %3952 = vmatmul.mubr.bf16.gmra.mxu1 %v6267_v18  ;;  %v5383_v45 = vpop.f32.mrf.mxu1  ;;  %v6281_v18 = vld [vmem:[#allocation2 + $0xe0] ss:$12 sps:$4 sm:$0xff]  }
 0x27f   : > { %3959 = vmatprep.mubr.bf16.mxu1 %v6268_v48  ;;  %v5384_v21 = vadd.f32 %v5383_v45, %v5382_v19  ;;  %v6282_v48 = vld [vmem:[#allocation2 + $0xf8] ss:$12 sps:$4 sm:$0xff]  }
 0x280   : > { %v7468_v50 = vpop.f32.mrf.mxu0  ;;  %v5385_v63 = vpop.f32.mrf.mxu1 }
 0x281   : > { %v7475_v24 = vadd.f32 %v5834_v43, %v5384_v21  ;;  %v6288_v21 = vld [vmem:[#allocation2 + $0xc0] ss:$12 sps:$4 sm:$0xff]  }
 0x282   : > { %v7472_v1 = vpop.f32.mrf.mxu0  ;;  %v5386_v47 = vpop.f32.mrf.mxu1 }
 0x283   : > { %v5387_v5 = vadd.f32 %v5386_v47, %v5385_v63 }
 0x284   : > { %3228 = vmatmul.mubr.bf16.gmra.mxu0 %v7420_v30  ;;  %v2583_v3 = vpop.f32.mrf.mxu0 }
 0x285   : > { %5928 = vmatprep.mubr.bf16.mxu0 %v6261_v34  ;;  %v5388_v28 = vpop.f32.mrf.mxu1  ;;  %v7477_v20 = vadd.f32 %v5835_v31, %v5387_v5 }
 0x286   : > { %3960 = vmatmul.mubr.bf16.gmra.mxu1 %v6272_v26 }
 0x287   : > { %3967 = vmatprep.mubr.bf16.mxu1 %v6273_v55  ;;  %v5389_v23 = vpop.f32.mrf.mxu1 }
 0x288   : > { %v5390_v30 = vadd.f32 %v5389_v23, %v5388_v28  ;;  %v6286_v28 = vld [vmem:[#allocation2 + $0x110] ss:$12 sps:$4 sm:$0xff]   ;;  %v6287_v23 = vld [vmem:[#allocation2 + $0x128] ss:$12 sps:$4 sm:$0xff]  }
 0x289   : > { %v5391_v29 = vpop.f32.mrf.mxu1 }
 0x28a   : > { %v7483_v14 = vadd.f32 %v5390_v30, %v2564_v0 }
 0x28b   : > { %v5392_v32 = vpop.f32.mrf.mxu1 }
 0x28c   : > { %v7479_v59 = vpop.f32.mrf.mxu0  ;;  %5929 = vmatmul.mubr.bf16.vlgmr.msra.gmra.mxu0 %v6265_v2  ;;  %v5393_v37 = vadd.f32 %v5392_v32, %v5391_v29  ;;  %v6293_v32 = vld [vmem:[#allocation2 + $0xd8] ss:$12 sps:$4 sm:$0xff]  }
 0x28d   : > { %5932 = vmatprep.mubr.bf16.mxu0 %v6266_v16  ;;  %v5394_v39 = vpop.f32.mrf.mxu1 }
 0x28e   : > { %v7481_v36 = vpop.f32.mrf.mxu0  ;;  %3968 = vmatmul.mubr.bf16.gmra.mxu1 %v6277_v46  ;;  %v7487_v13 = vadd.f32 %v5393_v37, %v2567_v9 }
 0x28f   : > { %3975 = vmatprep.mubr.bf16.mxu1 %v6280_v35  ;;  %v5395_v27 = vpop.f32.mrf.mxu1 }
 0x290   : > { %v7485_v25 = vpop.f32.mrf.mxu0  ;;  %v5396_v41 = vadd.f32 %v5395_v27, %v5394_v39  ;;  %v6291_v27 = vld [vmem:[#allocation2 + $0x140] ss:$12 sps:$4 sm:$0xff]  }
 0x291   : > { %v5397_v12 = vpop.f32.mrf.mxu1 }
 0x292   : > { %v7489_v42 = vpop.f32.mrf.mxu0  ;;  %v7492_v58 = vadd.f32 %v7456_v57, %v5396_v41  ;;  %v6292_v41 = vld [vmem:[#allocation2 + $0x158] ss:$12 sps:$4 sm:$0xff]  }
 0x293   : > { %v5398_v11 = vpop.f32.mrf.mxu1 }
 0x294   : > { %5933 = vmatmul.mubr.bf16.gmra.mxu0 %v6270_v33  ;;  %v5399_v43 = vadd.f32 %v5398_v11, %v5397_v12 }
 0x295   : > { %5936 = vmatprep.mubr.bf16.mxu0 %v6271_v40  ;;  %v5400_v31 = vpop.f32.mrf.mxu1 }
 0x296   : > { %3976 = vmatmul.mubr.bf16.gmra.mxu1 %v6278_v6  ;;  %v7497_v49 = vadd.f32 %v7460_v53, %v5399_v43  ;;  %v6290_v53 = vld [vmem:[#allocation2 + $0xc4] ss:$12 sps:$4 sm:$0xff]  }
 0x297   : > { %3983 = vmatprep.mubr.bf16.mxu1 %v6285_v44  ;;  %v5401_v56 = vpop.f32.mrf.mxu1  ;;  %v6298_v43 = vld [vmem:[#allocation2 + $0xf0] ss:$12 sps:$4 sm:$0xff]  }
 0x298   : > { %v7494_v22 = vpop.f32.mrf.mxu0  ;;  %v5402_v0 = vadd.f32 %v5401_v56, %v5400_v31 }
 0x299   : > { %v5403_v57 = vpop.f32.mrf.mxu1 }
 0x29a   : > { %v7499_v4 = vpop.f32.mrf.mxu0  ;;  %v7502_v8 = vadd.f32 %v5402_v0, %v7468_v50 }
 0x29b   : > { %v5404_v9 = vpop.f32.mrf.mxu1 }
 0x29c   : > { %5937 = vmatmul.mubr.bf16.gmra.mxu0 %v6275_v52  ;;  %v5405_v51 = vadd.f32 %v5404_v9, %v5403_v57  ;;  %v7504_v7 = vpop.f32.mrf.mxu0  ;;  %v6296_v57 = vld [vmem:[#allocation2 + $0x170] ss:$12 sps:$4 sm:$0xff]   ;;  %v6297_v9 = vld [vmem:[#allocation2 + $0x188] ss:$12 sps:$4 sm:$0xff]  }
 0x29d   : > { %5940 = vmatprep.mubr.bf16.mxu0 %v6276_v61  ;;  %v5406_v10 = vpop.f32.mrf.mxu1 }
 0x29e   : > { %3984 = vmatmul.mubr.bf16.gmra.mxu1 %v6283_v60  ;;  %v7506_v54 = vadd.f32 %v5405_v51, %v2583_v3  ;;  %v7508_v19 = vpop.f32.mrf.mxu0  ;;  %v6295_v3 = vld [vmem:[#allocation2 + $0xdc] ss:$12 sps:$4 sm:$0xff]  }
 0x29f   : > { %3991 = vmatprep.mubr.bf16.mxu1 %v6290_v53  ;;  %v5407_v62 = vpop.f32.mrf.mxu1 }
 0x2a0   : > { %v5408_v45 = vadd.f32 %v5407_v62, %v5406_v10 }
 0x2a1   : > { %v5409_v50 = vpop.f32.mrf.mxu1 }
 0x2a2   : > { %v7511_v34 = vadd.f32 %v7466_v15, %v5408_v45  ;;  %v6306_v45 = vld [vmem:[#allocation2 + $0x124] ss:$12 sps:$4 sm:$0xff]  }
 0x2a3   : > { %v5410_v63 = vpop.f32.mrf.mxu1 }
 0x2a4   : > { %5941 = vmatmul.mubr.bf16.gmra.mxu0 %v6281_v18  ;;  %v5411_v26 = vadd.f32 %v5410_v63, %v5409_v50  ;;  %v6301_v18 = vld [vmem:[#allocation2 + $0x108] ss:$12 sps:$4 sm:$0xff]  }
 0x2a5   : > { %5944 = vmatprep.mubr.bf16.mxu0 %v6282_v48  ;;  %v5412_v5 = vpop.f32.mrf.mxu1 }
 0x2a6   : > { %3992 = vmatmul.mubr.bf16.gmra.mxu1 %v6288_v21  ;;  %v7516_v55 = vadd.f32 %v7472_v1, %v5411_v26  ;;  %v6300_v1 = vld [vmem:[#allocation2 + $0xf4] ss:$12 sps:$4 sm:$0xff]  }
 0x2a7   : > { %3999 = vmatprep.mubr.bf16.mxu1 %v6295_v3  ;;  %v5413_v2 = vpop.f32.mrf.mxu1  ;;  %v6319_v21 = vld [vmem:[#allocation2 + $0x1a0] ss:$12 sps:$4 sm:$0xff]  }
 0x2a8   : > { %v7513_v47 = vpop.f32.mrf.mxu0  ;;  %v5414_v30 = vadd.f32 %v5413_v2, %v5412_v5 }
 0x2a9   : > { %v5415_v15 = vpop.f32.mrf.mxu1 }
 0x2aa   : > { %v7518_v16 = vpop.f32.mrf.mxu0  ;;  %v7521_v29 = vadd.f32 %v5414_v30, %v7481_v36 }
 0x2ab   : > { %v5416_v46 = vpop.f32.mrf.mxu1 }
 0x2ac   : > { %5945 = vmatmul.mubr.bf16.gmra.mxu0 %v6286_v28  ;;  %v7523_v37 = vpop.f32.mrf.mxu0  ;;  %v5417_v35 = vadd.f32 %v5416_v46, %v5415_v15 }
 0x2ad   : > { %5948 = vmatprep.mubr.bf16.mxu0 %v6287_v23  ;;  %v5418_v39 = vpop.f32.mrf.mxu1  ;;  %v6304_v23 = vld [vmem:[#allocation2 + $0x120] ss:$12 sps:$4 sm:$0xff]  }
 0x2ae   : > { %4000 = vmatmul.mubr.bf16.gmra.mxu1 %v6293_v32  ;;  %v7526_v33 = vadd.f32 %v5417_v35, %v7489_v42  ;;  %v7528_v12 = vpop.f32.mrf.mxu0  ;;  %v6303_v42 = vld [vmem:[#allocation2 + $0x10c] ss:$12 sps:$4 sm:$0xff]   ;;  %v6309_v32 = vld [vmem:[#allocation2 + $0x13c] ss:$12 sps:$4 sm:$0xff]  }
 0x2af   : > { %4007 = vmatprep.mubr.bf16.mxu1 %v6300_v1  ;;  %v5419_v40 = vpop.f32.mrf.mxu1 }
 0x2b0   : > { %v5420_v6 = vadd.f32 %v5419_v40, %v5418_v39 }
 0x2b1   : > { %v5421_v36 = vpop.f32.mrf.mxu1 }
 0x2b2   : > { %v7531_v11 = vadd.f32 %v7479_v59, %v5420_v6 }
 0x2b3   : > { %v5422_v44 = vpop.f32.mrf.mxu1 }
 0x2b4   : > { %5949 = vmatmul.mubr.bf16.gmra.mxu0 %v6291_v27  ;;  %v5423_v52 = vadd.f32 %v5422_v44, %v5421_v36  ;;  %v6307_v36 = vld [vmem:[#allocation2 + $0x138] ss:$12 sps:$4 sm:$0xff]  }
 0x2b5   : > { %5952 = vmatprep.mubr.bf16.mxu0 %v6292_v41  ;;  %v5424_v56 = vpop.f32.mrf.mxu1 }
 0x2b6   : > { %4008 = vmatmul.mubr.bf16.gmra.mxu1 %v6298_v43  ;;  %v7538_v0 = vadd.f32 %v7485_v25, %v5423_v52 }
 0x2b7   : > { %v7533_v31 = vpop.f32.mrf.mxu0  ;;  %4015 = vmatprep.mubr.bf16.mxu1 %v6303_v42  ;;  %v5425_v60 = vpop.f32.mrf.mxu1  ;;  %v6312_v42 = vld [vmem:[#allocation2 + $0x154] ss:$12 sps:$4 sm:$0xff]  }
 0x2b8   : > { %v5426_v51 = vadd.f32 %v5425_v60, %v5424_v56 }
 0x2b9   : > { %v7535_v61 = vpop.f32.mrf.mxu0  ;;  %v5427_v53 = vpop.f32.mrf.mxu1 }
 0x2ba   : > { %v7543_v10 = vadd.f32 %v5426_v51, %v7499_v4 }
 0x2bb   : > { %v7540_v59 = vpop.f32.mrf.mxu0  ;;  %v5428_v62 = vpop.f32.mrf.mxu1 }
 0x2bc   : > { %5953 = vmatmul.mubr.bf16.gmra.mxu0 %v6296_v57  ;;  %v5429_v48 = vadd.f32 %v5428_v62, %v5427_v53 }
 0x2bd   : > { %5956 = vmatprep.mubr.bf16.mxu0 %v6297_v9  ;;  %v7545_v50 = vpop.f32.mrf.mxu0  ;;  %v5430_v25 = vpop.f32.mrf.mxu1 }
 0x2be   : > { %4016 = vmatmul.mubr.bf16.gmra.mxu1 %v6301_v18  ;;  %v7548_v63 = vadd.f32 %v5429_v48, %v7508_v19 }
 0x2bf   : > { %4023 = vmatprep.mubr.bf16.mxu1 %v6306_v45  ;;  %v5431_v26 = vpop.f32.mrf.mxu1 }
 0x2c0   : > { %v5432_v3 = vadd.f32 %v5431_v26, %v5430_v25 }
 0x2c1   : > { %v5433_v28 = vpop.f32.mrf.mxu1 }
 0x2c2   : > { %v7553_v4 = vadd.f32 %v7494_v22, %v5432_v3 }
 0x2c3   : > { %v5434_v30 = vpop.f32.mrf.mxu1 }
 0x2c4   : > { %v7550_v5 = vpop.f32.mrf.mxu0  ;;  %5957 = vmatmul.mubr.bf16.gmra.mxu0 %v6319_v21  ;;  %v5435_v15 = vadd.f32 %v5434_v30, %v5433_v28  ;;  %v6310_v21 = vld [vmem:[#allocation2 + $0x150] ss:$12 sps:$4 sm:$0xff]   ;;  %v6315_v28 = vld [vmem:[#allocation2 + $0x16c] ss:$12 sps:$4 sm:$0xff]  }
 0x2c5   : > { %v5436_v19 = vpop.f32.mrf.mxu1 }
 0x2c6   : > { %v7555_v2 = vpop.f32.mrf.mxu0  ;;  %4024 = vmatmul.mubr.bf16.gmra.mxu1 %v6304_v23  ;;  %v7560_v35 = vadd.f32 %v7504_v7, %v5435_v15 }
 0x2c7   : > { %4031 = vmatprep.mubr.bf16.mxu1 %v6309_v32  ;;  %v5437_v39 = vpop.f32.mrf.mxu1 }
 0x2c8   : > { %v7557_v46 = vpop.f32.mrf.mxu0  ;;  %v5438_v27 = vadd.f32 %v5437_v39, %v5436_v19 }
 0x2c9   : > { %v5439_v40 = vpop.f32.mrf.mxu1 }
 0x2ca   : > { %v7562_v1 = vpop.f32.mrf.mxu0  ;;  %v7565_v41 = vadd.f32 %v5438_v27, %v7518_v16 }
 0x2cb   : > { %v5440_v43 = vpop.f32.mrf.mxu1 }
 0x2cc   : > { %v5512_v22 = vpop.f32.mrf.mxu0  ;;  %v5441_v52 = vadd.f32 %v5440_v43, %v5439_v40 }
 0x2ce   : > { %v5513_v6 = vpop.f32.mrf.mxu0  ;;  %v5442_v57 = vpop.f32.mrf.mxu1  ;;  %4032 = vmatmul.mubr.bf16.gmra.mxu1 %v6307_v36  ;;  %v7568_v7 = vadd.f32 %v5441_v52, %v7528_v12  ;;  %v6313_v36 = vld [vmem:[#allocation2 + $0x168] ss:$12 sps:$4 sm:$0xff]   ;;  %v6318_v52 = vld [vmem:[#allocation2 + $0x184] ss:$12 sps:$4 sm:$0xff]  }
 0x2cf   : > { %v5514_v44 = vadd.f32 %v5513_v6, %v5512_v22  ;;  %4039 = vmatprep.mubr.bf16.mxu1 %v6312_v42 }
 0x2d0   : > { %v5515_v56 = vpop.f32.mrf.mxu0  ;;  %v5443_v51 = vpop.f32.mrf.mxu1 }
 0x2d1   : > { %v7571_v60 = vadd.f32 %v5514_v44, %v7464_v17  ;;  %v5444_v53 = vadd.f32 %v5443_v51, %v5442_v57 }
 0x2d2   : > { %v5516_v9 = vpop.f32.mrf.mxu0  ;;  %v5445_v62 = vpop.f32.mrf.mxu1 }
 0x2d3   : > { %v5517_v16 = vadd.f32 %v5516_v9, %v5515_v56  ;;  %v7574_v48 = vadd.f32 %v7513_v47, %v5444_v53 }
 0x2d4   : > { %v5518_v18 = vpop.f32.mrf.mxu0  ;;  %v5446_v12 = vpop.f32.mrf.mxu1 }
 0x2d5   : > { %v7577_v45 = vadd.f32 %v5517_v16, %v7470_v38  ;;  %v5447_v3 = vadd.f32 %v5446_v12, %v5445_v62  ;;  %v6322_v62 = vld [vmem:[#allocation2 + $0x19c] ss:$12 sps:$4 sm:$0xff]  }
 0x2d6   : > { %v5519_v25 = vpop.f32.mrf.mxu0  ;;  %v5448_v23 = vpop.f32.mrf.mxu1  ;;  %4040 = vmatmul.mubr.bf16.gmra.mxu1 %v6310_v21 }
 0x2d7   : > { %v5520_v26 = vadd.f32 %v5519_v25, %v5518_v18  ;;  %v7580_v30 = vadd.f32 %v7523_v37, %v5447_v3  ;;  %4047 = vmatprep.mubr.bf16.mxu1 %v6315_v28 }
 0x2d8   : > { %v5521_v17 = vpop.f32.mrf.mxu0  ;;  %v5449_v32 = vpop.f32.mrf.mxu1 }
 0x2d9   : > { %v7583_v15 = vadd.f32 %v5520_v26, %v7475_v24  ;;  %v5450_v19 = vadd.f32 %v5449_v32, %v5448_v23 }
 0x2da   : > { %v5522_v47 = vpop.f32.mrf.mxu0  ;;  %v5451_v27 = vpop.f32.mrf.mxu1 }
 0x2db   : > { %v5523_v38 = vadd.f32 %v5522_v47, %v5521_v17  ;;  %v7586_v22 = vadd.f32 %v5450_v19, %v7535_v61 }
 0x2dc   : > { %v5524_v39 = vpop.f32.mrf.mxu0  ;;  %v5452_v37 = vpop.f32.mrf.mxu1 }
 0x2dd   : > { %v7589_v40 = vadd.f32 %v5523_v38, %v7477_v20  ;;  %v5453_v44 = vadd.f32 %v5452_v37, %v5451_v27 }
 0x2de   : > { %v5525_v6 = vpop.f32.mrf.mxu0  ;;  %v5454_v42 = vpop.f32.mrf.mxu1  ;;  %4048 = vmatmul.mubr.bf16.gmra.mxu1 %v6313_v36 }
 0x2df   : > { %v5526_v43 = vadd.f32 %v5525_v6, %v5524_v39  ;;  %v7592_v56 = vadd.f32 %v5453_v44, %v7545_v50  ;;  %4055 = vmatprep.mubr.bf16.mxu1 %v6318_v52  ;;  %v6316_v50 = vld [vmem:[#allocation2 + $0x180] ss:$12 sps:$4 sm:$0xff]   ;;  %v6320_v39 = vld [vmem:[#allocation2 + $0x198] ss:$12 sps:$4 sm:$0xff]  }
 0x2e0   : > { %v5527_v24 = vpop.f32.mrf.mxu0  ;;  %v5455_v9 = vpop.f32.mrf.mxu1 }
 0x2e1   : > { %v7595_v57 = vadd.f32 %v5526_v43, %v7483_v14  ;;  %v5456_v51 = vadd.f32 %v5455_v9, %v5454_v42 }
 0x2e2   : > { %v5528_v61 = vpop.f32.mrf.mxu0  ;;  %v5457_v53 = vpop.f32.mrf.mxu1 }
 0x2e3   : > { %v5529_v20 = vadd.f32 %v5528_v61, %v5527_v24  ;;  %v7598_v18 = vadd.f32 %v7533_v31, %v5456_v51 }
 0x2e4   : > { %v5530_v16 = vpop.f32.mrf.mxu0  ;;  %v5458_v12 = vpop.f32.mrf.mxu1 }
 0x2e5   : > { %v7601_v25 = vadd.f32 %v5529_v20, %v7487_v13  ;;  %v5459_v3 = vadd.f32 %v5458_v12, %v5457_v53 }
 0x2e6   : > { %v5531_v21 = vpop.f32.mrf.mxu0  ;;  %v5460_v28 = vpop.f32.mrf.mxu1  ;;  %4056 = vmatmul.mubr.bf16.gmra.mxu1 %v6316_v50 }
 0x2e7   : > { %v5532_v26 = vadd.f32 %v5531_v21, %v5530_v16  ;;  %v7604_v17 = vadd.f32 %v7540_v59, %v5459_v3  ;;  %4063 = vmatprep.mubr.bf16.mxu1 %v6322_v62 }
 0x2e8   : > { %v5533_v14 = vpop.f32.mrf.mxu0  ;;  %v5461_v47 = vpop.f32.mrf.mxu1 }
 0x2e9   : > { %v3134_v23 = vadd.f32 %v5532_v26, %v7492_v58  ;;  %v5462_v38 = vadd.f32 %v5461_v47, %v5460_v28 }
 0x2ea   : > { %v5534_v31 = vpop.f32.mrf.mxu0  ;;  %v5463_v19 = vpop.f32.mrf.mxu1 }
 0x2eb   : > { %v5535_v32 = vadd.f32 %v5534_v31, %v5533_v14  ;;  %v7608_v27 = vadd.f32 %v5462_v38, %v7555_v2 }
 0x2ec   : > { %v5536_v13 = vpop.f32.mrf.mxu0  ;;  %v5464_v37 = vpop.f32.mrf.mxu1 }
 0x2ed   : > { %v3137_v6 = vadd.f32 %v5535_v32, %v7497_v49  ;;  %v5465_v59 = vadd.f32 %v5464_v37, %v5463_v19 }
 0x2ee   : > { %v5537_v36 = vpop.f32.mrf.mxu0  ;;  %v5466_v52 = vpop.f32.mrf.mxu1  ;;  %4064 = vmatmul.mubr.bf16.gmra.mxu1 %v6320_v39 }
 0x2ef   : > { %v5538_v43 = vadd.f32 %v5537_v36, %v5536_v13  ;;  %v7612_v58 = vadd.f32 %v5465_v59, %v7562_v1 }
 0x2f0   : > { %v5539_v44 = vpop.f32.mrf.mxu0  ;;  %v5467_v61 = vpop.f32.mrf.mxu1 }
 0x2f1   : > { %v3142_v24 = vadd.f32 %v5538_v43, %v7502_v8  ;;  %v5468_v20 = vadd.f32 %v5467_v61, %v5466_v52 }
 0x2f2   : > { %v5540_v42 = vpop.f32.mrf.mxu0  ;;  %v5469_v51 = vpop.f32.mrf.mxu1 }
 0x2f3   : > { %v5541_v9 = vadd.f32 %v5540_v42, %v5539_v44  ;;  %v7616_v49 = vadd.f32 %v7550_v5, %v5468_v20 }
 0x2f4   : > { %v5542_v2 = vpop.f32.mrf.mxu0  ;;  %v5470_v62 = vpop.f32.mrf.mxu1 }
 0x2f5   : > { %v3145_v16 = vadd.f32 %v5541_v9, %v7506_v54  ;;  %v5471_v50 = vadd.f32 %v5470_v62, %v5469_v51 }
 0x2f6   : > { %v5543_v53 = vpop.f32.mrf.mxu0  ;;  %v5882_v1 = vpop.f32.mrf.mxu1 }
 0x2f7   : > { %v5544_v21 = vadd.f32 %v5543_v53, %v5542_v2  ;;  %v7620_v26 = vadd.f32 %v7557_v46, %v5471_v50  ;;  %v7623_v8 = vadd.f32 %v5882_v1, %v7583_v15 }
 0x2f8   : > { %v5545_v12 = vpop.f32.mrf.mxu0  ;;  %v3270_v28 = vpop.f32.mrf.mxu1 }
 0x2f9   : > { %v3150_v3 = vadd.f32 %v5544_v21, %v7511_v34  ;;  %v7627_v31 = vadd.f32 %v3270_v28, %v7571_v60 }
 0x2fa   : > { %v5546_v14 = vpop.f32.mrf.mxu0  ;;  %v5883_v47 = vpop.f32.mrf.mxu1 }
 0x2fb   : > { %v5547_v5 = vadd.f32 %v5546_v14, %v5545_v12  ;;  %v7630_v32 = vadd.f32 %v5883_v47, %v7589_v40 }
 0x2fc   : > { %v5548_v54 = vpop.f32.mrf.mxu0  ;;  %v3273_v13 = vpop.f32.mrf.mxu1 }
 0x2fd   : > { %v3153_v38 = vadd.f32 %v5547_v5, %v7516_v55  ;;  %v7634_v15 = vadd.f32 %v3273_v13, %v7577_v45 }
 0x2fe   : > { %v5549_v46 = vpop.f32.mrf.mxu0  ;;  %v5886_v39 = vpop.f32.mrf.mxu1 }
 0x2ff   : > { %v5550_v19 = vadd.f32 %v5549_v46, %v5548_v54  ;;  %v7636_v36 = vadd.f32 %v5886_v39, %v3134_v23 }
 0x300   : > { %v5551_v34 = vpop.f32.mrf.mxu0  ;;  %v3286_v43 = vpop.f32.mrf.mxu1 }
 0x301   : > { %v3158_v60 = vadd.f32 %v5550_v19, %v7521_v29  ;;  %v7640_v40 = vadd.f32 %v3286_v43, %v7595_v57 }
 0x302   : > { %v5552_v37 = vpop.f32.mrf.mxu0  ;;  %v5887_v55 = vpop.f32.mrf.mxu1 }
 0x303   : > { %v5553_v59 = vadd.f32 %v5552_v37, %v5551_v34  ;;  %v7642_v52 = vadd.f32 %v5887_v55, %v3137_v6 }
 0x304   : > { %v5554_v44 = vpop.f32.mrf.mxu0  ;;  %v3289_v61 = vpop.f32.mrf.mxu1 }
 0x305   : > { %v3161_v42 = vadd.f32 %v5553_v59, %v7526_v33  ;;  %v7646_v23 = vadd.f32 %v3289_v61, %v7601_v25 }
 0x306   : > { %v5555_v45 = vpop.f32.mrf.mxu0  ;;  %v5890_v29 = vpop.f32.mrf.mxu1 }
 0x307   : > { %v5556_v9 = vadd.f32 %v5555_v45, %v5554_v44  ;;  %v7648_v2 = vadd.f32 %v5890_v29, %v3150_v3 }
 0x308   : > { %v5557_v20 = vpop.f32.mrf.mxu0  ;;  %v3302_v53 = vpop.f32.mrf.mxu1 }
 0x309   : > { %v3166_v51 = vadd.f32 %v5556_v9, %v7531_v11  ;;  %v7651_v21 = vadd.f32 %v3302_v53, %v3142_v24 }
 0x30a   : > { %v5558_v57 = vpop.f32.mrf.mxu0  ;;  %v5891_v50 = vpop.f32.mrf.mxu1 }
 0x30b   : > { %v5559_v62 = vadd.f32 %v5558_v57, %v5557_v20  ;;  %v7653_v33 = vadd.f32 %v5891_v50, %v3153_v38 }
 0x30c   : > { %v5560_v6 = vpop.f32.mrf.mxu0  ;;  %v3305_v25 = vpop.f32.mrf.mxu1 }
 0x30d   : > { %v3169_v12 = vadd.f32 %v5559_v62, %v7538_v0  ;;  %v7656_v28 = vadd.f32 %v3305_v25, %v3145_v16 }
 0x30e   : > { %v5561_v1 = vpop.f32.mrf.mxu0  ;;  %v5894_v5 = vpop.f32.mrf.mxu1 }
 0x30f   : > { %v5562_v14 = vadd.f32 %v5561_v1, %v5560_v6  ;;  %v7658_v54 = vadd.f32 %v5894_v5, %v3166_v51 }
 0x310   : > { %v5563_v3 = vpop.f32.mrf.mxu0  ;;  %v3318_v24 = vpop.f32.mrf.mxu1 }
 0x311   : > { %v3174_v11 = vadd.f32 %v5562_v14, %v7543_v10  ;;  %v7661_v13 = vadd.f32 %v3318_v24, %v3158_v60 }
 0x312   : > { %v5564_v47 = vpop.f32.mrf.mxu0  ;;  %v5895_v19 = vpop.f32.mrf.mxu1 }
 0x313   : > { %v5565_v46 = vadd.f32 %v5564_v47, %v5563_v3  ;;  %v7663_v34 = vadd.f32 %v5895_v19, %v3169_v12 }
 0x314   : > { %v5566_v38 = vpop.f32.mrf.mxu0  ;;  %v3321_v16 = vpop.f32.mrf.mxu1 }
 0x315   : > { %v3177_v0 = vadd.f32 %v5565_v46, %v7548_v63  ;;  %v7666_v43 = vadd.f32 %v3321_v16, %v3161_v42 }
 0x316   : > { %v5567_v39 = vpop.f32.mrf.mxu0  ;;  %v5898_v44 = vpop.f32.mrf.mxu1 }
 0x317   : > { %v5568_v37 = vadd.f32 %v5567_v39, %v5566_v38 }
 0x318   : > { %v5569_v59 = vpop.f32.mrf.mxu0  ;;  %v3334_v45 = vpop.f32.mrf.mxu1 }
 0x319   : > { %v3182_v10 = vadd.f32 %v5568_v37, %v7553_v4  ;;  %v7671_v9 = vadd.f32 %v3334_v45, %v3174_v11 }
 0x31a   : > { %v5570_v55 = vpop.f32.mrf.mxu0  ;;  %v5899_v29 = vpop.f32.mrf.mxu1 }
 0x31b   : > { %v5571_v61 = vadd.f32 %v5570_v55, %v5569_v59  ;;  %v7669_v60 = vadd.f32 %v5898_v44, %v3182_v10 }
 0x31c   : > { %v5572_v20 = vpop.f32.mrf.mxu0  ;;  %v3337_v57 = vpop.f32.mrf.mxu1 }
 0x31d   : > { %v3185_v63 = vadd.f32 %v5571_v61, %v7560_v35  ;;  %v7676_v62 = vadd.f32 %v3337_v57, %v3177_v0 }
 0x31e   : > { %v5573_v51 = vpop.f32.mrf.mxu0  ;;  %v5902_v4 = vpop.f32.mrf.mxu1 }
 0x31f   : > { %v5574_v53 = vadd.f32 %v5573_v51, %v5572_v20  ;;  %v7674_v42 = vadd.f32 %v5899_v29, %v3185_v63 }
 0x320   : > { %v5575_v6 = vpop.f32.mrf.mxu0  ;;  %v3350_v1 = vpop.f32.mrf.mxu1 }
 0x321   : > { %v3190_v50 = vadd.f32 %v5574_v53, %v7565_v41 }
 0x322   : > { %v5576_v12 = vpop.f32.mrf.mxu0  ;;  %v5903_v5 = vpop.f32.mrf.mxu1 }
 0x323   : > { %v5577_v25 = vadd.f32 %v5576_v12, %v5575_v6  ;;  %v7679_v14 = vadd.f32 %v3350_v1, %v3190_v50 }
 0x324   : > { %v5578_v3 = vpop.f32.mrf.mxu0  ;;  %v3353_v47 = vpop.f32.mrf.mxu1 }
 0x325   : > { %v3193_v35 = vadd.f32 %v5577_v25, %v7568_v7 }
 0x326   : > { %v5579_v11 = vpop.f32.mrf.mxu0  ;;  %v5906_v19 = vpop.f32.mrf.mxu1 }
 0x327   : > { %v5580_v24 = vadd.f32 %v5579_v11, %v5578_v3  ;;  %v7682_v46 = vadd.f32 %v3353_v47, %v3193_v35 }
 0x328   : > { %v5581_v38 = vpop.f32.mrf.mxu0  ;;  %v3366_v41 = vpop.f32.mrf.mxu1 }
 0x329   : > { %v3198_v0 = vadd.f32 %v5580_v24, %v7574_v48 }
 0x32a   : > { %v5582_v39 = vpop.f32.mrf.mxu0  ;;  %v5907_v44 = vpop.f32.mrf.mxu1 }
 0x32b   : > { %v5583_v16 = vadd.f32 %v5582_v39, %v5581_v38  ;;  %v7685_v37 = vadd.f32 %v5902_v4, %v3198_v0 }
 0x32c   : > { %v5584_v59 = vpop.f32.mrf.mxu0  ;;  %v3369_v7 = vpop.f32.mrf.mxu1 }
 0x32d   : > { %v3201_v10 = vadd.f32 %v5583_v16, %v7580_v30 }
 0x32e   : > { %v5585_v55 = vpop.f32.mrf.mxu0  ;;  %v5910_v29 = vpop.f32.mrf.mxu1 }
 0x32f   : > { %v5586_v45 = vadd.f32 %v5585_v55, %v5584_v59  ;;  %v7688_v61 = vadd.f32 %v5903_v5, %v3201_v10 }
 0x330   : > { %v5587_v20 = vpop.f32.mrf.mxu0  ;;  %v3382_v48 = vpop.f32.mrf.mxu1 }
 0x331   : > { %v3206_v63 = vadd.f32 %v5586_v45, %v7586_v22 }
 0x332   : > { %v5588_v51 = vpop.f32.mrf.mxu0  ;;  %v5911_v4 = vpop.f32.mrf.mxu1 }
 0x333   : > { %v5589_v57 = vadd.f32 %v5588_v51, %v5587_v20  ;;  %v7691_v53 = vadd.f32 %v3366_v41, %v3206_v63 }
 0x334   : > { %v5590_v6 = vpop.f32.mrf.mxu0  ;;  %v3385_v30 = vpop.f32.mrf.mxu1 }
 0x335   : > { %v3209_v50 = vadd.f32 %v5589_v57, %v7592_v56 }
 0x336   : > { %v5591_v12 = vpop.f32.mrf.mxu0  ;;  %v5648_v5 = vpop.f32.mrf.mxu1 }
 0x337   : > { %v5592_v1 = vadd.f32 %v5591_v12, %v5590_v6  ;;  %v7694_v25 = vadd.f32 %v3369_v7, %v3209_v50 }
 0x338   : > { %v5593_v3 = vpop.f32.mrf.mxu0  ;;  %v5649_v22 = vpop.f32.mrf.mxu1 }
 0x339   : > { %v3214_v35 = vadd.f32 %v5592_v1, %v7598_v18 }
 0x33a   : > { %v5594_v11 = vpop.f32.mrf.mxu0  ;;  %v5651_v0 = vpop.f32.mrf.mxu1 }
 0x33b   : > { %v5595_v47 = vadd.f32 %v5594_v11, %v5593_v3  ;;  %v7697_v24 = vadd.f32 %v5906_v19, %v3214_v35 }
 0x33c   : > { %v5596_v38 = vpop.f32.mrf.mxu0  ;;  %v5652_v56 = vpop.f32.mrf.mxu1 }
 0x33d   : > { %v3217_v39 = vadd.f32 %v5595_v47, %v7604_v17 }
 0x33e   : > { %v5597_v41 = vpop.f32.mrf.mxu0  ;;  %v5654_v55 = vpop.f32.mrf.mxu1 }
 0x33f   : > { %v5598_v16 = vadd.f32 %v5597_v41, %v5596_v38  ;;  %v7700_v59 = vadd.f32 %v5907_v44, %v3217_v39  ;;  %v5650_v38 = vadd.f32 %v5649_v22, %v5648_v5 }
 0x340   : > { %v5599_v10 = vpop.f32.mrf.mxu0  ;;  %v5655_v18 = vpop.f32.mrf.mxu1 }
 0x341   : > { %v3222_v7 = vadd.f32 %v5598_v16, %v7608_v27  ;;  %v5656_v35 = vadd.f32 %v5655_v18, %v5654_v55 }
 0x342   : > { %v5600_v45 = vpop.f32.mrf.mxu0  ;;  %v5657_v51 = vpop.f32.mrf.mxu1 }
 0x343   : > { %v5601_v20 = vadd.f32 %v5600_v45, %v5599_v10  ;;  %v7703_v63 = vadd.f32 %v3382_v48, %v3222_v7 }
 0x344   : > { %v5602_v19 = vpop.f32.mrf.mxu0  ;;  %v5658_v17 = vpop.f32.mrf.mxu1 }
 0x345   : > { %v3225_v57 = vadd.f32 %v5601_v20, %v7612_v58  ;;  %v5659_v10 = vadd.f32 %v5658_v17, %v5657_v51 }
 0x346   : > { %v5603_v6 = vpop.f32.mrf.mxu0  ;;  %v5660_v1 = vpop.f32.mrf.mxu1 }
 0x347   : > { %v5604_v50 = vadd.f32 %v5603_v6, %v5602_v19  ;;  %v7706_v12 = vadd.f32 %v3385_v30, %v3225_v57 }
 0x348   : > { %v5605_v44 = vpop.f32.mrf.mxu0  ;;  %v5661_v11 = vpop.f32.mrf.mxu1 }
 0x349   : > { %v3230_v3 = vadd.f32 %v5604_v50, %v7616_v49  ;;  %v5653_v49 = vadd.f32 %v5652_v56, %v5651_v0  ;;  %v5662_v17 = vadd.f32 %v5661_v11, %v5660_v1  ;;  %v6342_v1 = vld [vmem:[%s6840_s9] sm:$0xff]  }
 0x34a   : > { %v5606_v27 = vpop.f32.mrf.mxu0  ;;  %v5663_v41 = vpop.f32.mrf.mxu1  ;;  %v4368_v11 = vunpack.c.l.bf16 %v6342_v1 }
 0x34b   : > { %v7709_v47 = vadd.f32 %v5910_v29, %v3230_v3  ;;  %v5607_v48 = vadd.f32 %v5606_v27, %v5605_v44  ;;  %v7720_v29 = vld [vmem:[%s359_s5] ss:$0 sm:$0xff]  ;;  %v6341_v27 = vld [vmem:[%s6840_s9 + $0x8] sm:$0xff]  }
 0x34c   : > { %v5930_v39 = vpop.f32.mrf.mxu0  ;;  %v5664_v7 = vpop.f32.mrf.mxu1 }
 0x34d   : > { %v3233_v58 = vadd.f32 %v5607_v48, %v7620_v26  ;;  %v4115_v16 = vadd.f32 %v5930_v39, %v5656_v35  ;;  %v4370_v48 = vunpack.c.l.bf16 %v6341_v27 }
 0x34e   : > { %v4106_v30 = vpop.f32.mrf.mxu0  ;;  %v5666_v22 = vpop.f32.mrf.mxu1 }
 0x34f   : > { %v7712_v45 = vadd.f32 %v5911_v4, %v3233_v58  ;;  %v4107_v20 = vadd.f32 %v5650_v38, %v4106_v30  ;;  %v4235_v55 = vadd.f32 %v4115_v16, %v7623_v8 }
 0x350   : > { %v5931_v5 = vpop.f32.mrf.mxu0  ;;  %v5667_v51 = vpop.f32.mrf.mxu1 }
 0x351   : > { %v4233_v26 = vadd.f32 %v4107_v20, %v7627_v31  ;;  %v4274_v18 = vadd.f32 %v7720_v29, %v4235_v55  ;;  %v4118_v19 = vadd.f32 %v5931_v5, %v5659_v10  ;;  %v5668_v50 = vadd.f32 %v5667_v51, %v5666_v22 }
 0x352   : > { %v4109_v4 = vpop.f32.mrf.mxu0  ;;  %v5669_v44 = vpop.f32.mrf.mxu1  ;;  %v4371_v10 = vunpack.c.h.bf16 %v6341_v27  ;;  %v5665_v20 = vadd.f32 %v5664_v7, %v5663_v41 }
 0x353   : > { %v4272_v0 = vadd.f32 %v7720_v29, %v4233_v26  ;;  %v4110_v56 = vadd.f32 %v5653_v49, %v4109_v4  ;;  %v4306_v8 = vmul.f32 0.1, %v4274_v18  ;;  %v4236_v57 = vadd.f32 %v4118_v19, %v7630_v32 }
 0x354   : > { %v5934_v6 = vpop.f32.mrf.mxu0  ;;  %v5670_v16 = vpop.f32.mrf.mxu1  ;;  %v4369_v26 = vunpack.c.h.bf16 %v6342_v1 }
 0x355   : > { %v4304_v3 = vmul.f32 0.1, %v4272_v0  ;;  %v4234_v31 = vadd.f32 %v4110_v56, %v7634_v15  ;;  %v4275_v35 = vadd.f32 %v7720_v29, %v4236_v57  ;;  %v4338_v38 = vmax.f32 %v4274_v18, %v4306_v8 }
 0x356   : > { %v4122_v39 = vpop.f32.mrf.mxu0  ;;  %v4131_v58 = vadd.f32 %v5934_v6, %v5668_v50  ;;  %v5671_v15 = vadd.f32 %v5670_v16, %v5669_v44  ;;  %v5672_v22 = vpop.f32.mrf.mxu1  ;;  %v6344_v16 = vld [vmem:[%s6840_s9 + $0x18] sm:$0xff]  }
 0x357   : > { %v4273_v30 = vadd.f32 %v7720_v29, %v4234_v31  ;;  %v4307_v32 = vmul.f32 0.1, %v4275_v35  ;;  %v4123_v55 = vadd.f32 %v5662_v17, %v4122_v39  ;;  %v4336_v19 = vmax.f32 %v4272_v0, %v4304_v3  ;;  %v6343_v39 = vld [vmem:[%s6840_s9 + $0x10] sm:$0xff]  }
 0x358   : > { %v5935_v49 = vpop.f32.mrf.mxu0  ;;  %v4239_v5 = vadd.f32 %v4131_v58, %v7636_v36  ;;  %v4402_v51 = vadd.f32 %v4370_v48, %v4338_v38  ;;  %v5673_v7 = vpop.f32.mrf.mxu1  ;;  %v4372_v58 = vunpack.c.l.bf16 %v6343_v39 }
 0x359   : > { %v4305_v4 = vmul.f32 0.1, %v4273_v30  ;;  %v4339_v18 = vmax.f32 %v4275_v35, %v4307_v32  ;;  %v4237_v8 = vadd.f32 %v4123_v55, %v7640_v40  ;;  %v4134_v41 = vadd.f32 %v5935_v49, %v5671_v15 }
 0x35a   : > { %v4125_v56 = vpop.f32.mrf.mxu0  ;;  %v4278_v57 = vadd.f32 %v7720_v29, %v4239_v5  ;;  %v5674_v36 = vadd.f32 %v5673_v7, %v5672_v22  ;;  %v5675_v35 = vpop.f32.mrf.mxu1  ;;  %v4400_v27 = vadd.f32 %v4368_v11, %v4336_v19  ;;  %v4375_v5 = vunpack.c.h.bf16 %v6344_v16 }
 0x35b   : > { %v4337_v6 = vmax.f32 %v4273_v30, %v4305_v4  ;;  %v4403_v17 = vadd.f32 %v4371_v10, %v4339_v18  ;;  %v4126_v50 = vadd.f32 %v5665_v20, %v4125_v56  ;;  %v4276_v44 = vadd.f32 %v7720_v29, %v4237_v8 }
 0x35c   : > { %v5938_v31 = vpop.f32.mrf.mxu0  ;;  %v4310_v0 = vmul.f32 0.1, %v4278_v57  ;;  %v4240_v3 = vadd.f32 %v4134_v41, %v7642_v52  ;;  %v4374_v30 = vunpack.c.l.bf16 %v6344_v16  ;;  %v5676_v1 = vpop.f32.mrf.mxu1  ;;  %v4373_v4 = vunpack.c.h.bf16 %v6343_v39 }
 0x35d   : > { %v4401_v40 = vadd.f32 %v4369_v26, %v4337_v6  ;;  %v5249_v48 = vpack.c.bf16 %v4403_v17, %v4402_v51  ;;  %v4238_v38 = vadd.f32 %v4126_v50, %v7646_v23  ;;  %v4308_v10 = vmul.f32 0.1, %v4276_v44 }
 0x35e   : > { %v4138_v32 = vpop.f32.mrf.mxu0  ;;  %v4279_v20 = vadd.f32 %v7720_v29, %v4240_v3  ;;  %v5677_v11 = vadd.f32 %v5676_v1, %v5675_v35  ;;  %v4342_v23 = vmax.f32 %v4278_v57, %v4310_v0  ;;  %v5678_v19 = vpop.f32.mrf.mxu1 }
 0x35f   : > { %v5244_v49 = vpack.c.bf16 %v4401_v40, %v4400_v27  ;;  %5321 = vst [vmem:[%s6840_s9 + $0x8] sm:$0xff] %v5249_v48   ;;  %v4277_v52 = vadd.f32 %v7720_v29, %v4238_v38  ;;  %v4139_v55 = vadd.f32 %v5674_v36, %v4138_v32  ;;  %v4340_v15 = vmax.f32 %v4276_v44, %v4308_v10  ;;  %v6345_v32 = vld [vmem:[%s6840_s9 + $0x20] sm:$0xff]  }
 0x360   : > { %v5939_v22 = vpop.f32.mrf.mxu0  ;;  %v4311_v26 = vmul.f32 0.1, %v4279_v20  ;;  %v5679_v41 = vpop.f32.mrf.mxu1  ;;  %v4406_v44 = vadd.f32 %v4374_v30, %v4342_v23 }
 0x361   : > { %5245 = vst [vmem:[%s6840_s9] sm:$0xff] %v5244_v49   ;;  %v4309_v18 = vmul.f32 0.1, %v4277_v52  ;;  %v4241_v51 = vadd.f32 %v4139_v55, %v7651_v21  ;;  %v5680_v50 = vadd.f32 %v5679_v41, %v5678_v19  ;;  %v4404_v36 = vadd.f32 %v4372_v58, %v4340_v15 }
 0x362   : > { %v4141_v56 = vpop.f32.mrf.mxu0  ;;  %v4343_v8 = vmax.f32 %v4279_v20, %v4311_v26  ;;  %v5681_v3 = vpop.f32.mrf.mxu1  ;;  %v4376_v58 = vunpack.c.l.bf16 %v6345_v32  ;;  %v4377_v49 = vunpack.c.h.bf16 %v6345_v32 }
 0x363   : > { %v4341_v7 = vmax.f32 %v4277_v52, %v4309_v18  ;;  %v4280_v6 = vadd.f32 %v7720_v29, %v4241_v51  ;;  %v4142_v17 = vadd.f32 %v5677_v11, %v4141_v56  ;;  %v4147_v40 = vadd.f32 %v5938_v31, %v5680_v50 }
 0x364   : > { %v5942_v57 = vpop.f32.mrf.mxu0  ;;  %v4407_v0 = vadd.f32 %v4375_v5, %v4343_v8  ;;  %v5682_v38 = vpop.f32.mrf.mxu1 }
 0x365   : > { %v4405_v35 = vadd.f32 %v4373_v4, %v4341_v7  ;;  %v4312_v27 = vmul.f32 0.1, %v4280_v6  ;;  %v4242_v21 = vadd.f32 %v4142_v17, %v7656_v28  ;;  %v4243_v10 = vadd.f32 %v4147_v40, %v7648_v2 }
 0x366   : > { %v5259_v48 = vpack.c.bf16 %v4407_v0, %v4406_v44  ;;  %v4154_v30 = vpop.f32.mrf.mxu0  ;;  %v5683_v20 = vadd.f32 %v5682_v38, %v5681_v3  ;;  %v5684_v1 = vpop.f32.mrf.mxu1 }
 0x367   : > { %v5254_v39 = vpack.c.bf16 %v4405_v35, %v4404_v36  ;;  %v4281_v16 = vadd.f32 %v7720_v29, %v4242_v21  ;;  %v4344_v52 = vmax.f32 %v4280_v6, %v4312_v27  ;;  %v4282_v28 = vadd.f32 %v7720_v29, %v4243_v10  ;;  %v6346_v6 = vld [vmem:[%s6840_s9 + $0x28] sm:$0xff]  }
 0x368   : > { %5323 = vst [vmem:[%s6840_s9 + $0x18] sm:$0xff] %v5259_v48   ;;  %v4150_v31 = vadd.f32 %v5939_v22, %v5683_v20  ;;  %v5685_v11 = vpop.f32.mrf.mxu1  ;;  %v5943_v23 = vpop.f32.mrf.mxu0  ;;  %v4378_v17 = vunpack.c.l.bf16 %v6346_v6  ;;  %v4379_v50 = vunpack.c.h.bf16 %v6346_v6  ;;  %v6348_v6 = vld [vmem:[%s6840_s9 + $0x38] sm:$0xff]  }
 0x369   : > { %5322 = vst [vmem:[%s6840_s9 + $0x10] sm:$0xff] %v5254_v39   ;;  %v4313_v55 = vmul.f32 0.1, %v4281_v16  ;;  %v5686_v15 = vadd.f32 %v5685_v11, %v5684_v1  ;;  %v4314_v26 = vmul.f32 0.1, %v4282_v28  ;;  %v4408_v4 = vadd.f32 %v4376_v58, %v4344_v52 }
 0x36a   : > { %v4244_v2 = vadd.f32 %v4150_v31, %v7653_v33  ;;  %v5687_v19 = vpop.f32.mrf.mxu1  ;;  %v4157_v36 = vpop.f32.mrf.mxu0 }
 0x36b   : > { %v4345_v5 = vmax.f32 %v4281_v16, %v4313_v55  ;;  %v4155_v51 = vadd.f32 %v5686_v15, %v4154_v30  ;;  %v4346_v44 = vmax.f32 %v4282_v28, %v4314_v26  ;;  %v6347_v30 = vld [vmem:[%s6840_s9 + $0x30] sm:$0xff]  }
 0x36c   : > { %v4283_v56 = vadd.f32 %v7720_v29, %v4244_v2  ;;  %v5688_v8 = vpop.f32.mrf.mxu1  ;;  %v4380_v20 = vunpack.c.l.bf16 %v6347_v30  ;;  %v4381_v55 = vunpack.c.h.bf16 %v6347_v30 }
 0x36d   : > { %v4409_v18 = vadd.f32 %v4377_v49, %v4345_v5  ;;  %v4245_v7 = vadd.f32 %v4155_v51, %v7661_v13  ;;  %v5689_v22 = vadd.f32 %v5688_v8, %v5687_v19  ;;  %v5946_v13 = vpop.f32.mrf.mxu0  ;;  %v4410_v39 = vadd.f32 %v4378_v17, %v4346_v44 }
 0x36e   : > { %v4315_v0 = vmul.f32 0.1, %v4283_v56  ;;  %v5690_v33 = vpop.f32.mrf.mxu1  ;;  %v4382_v17 = vunpack.c.l.bf16 %v6348_v6  ;;  %v4383_v44 = vunpack.c.h.bf16 %v6348_v6 }
 0x36f   : > { %v5264_v41 = vpack.c.bf16 %v4409_v18, %v4408_v4  ;;  %v4284_v3 = vadd.f32 %v7720_v29, %v4245_v7  ;;  %v4158_v35 = vadd.f32 %v5689_v22, %v4157_v36 }
 0x370   : > { %v4347_v27 = vmax.f32 %v4283_v56, %v4315_v0  ;;  %v5691_v21 = vpop.f32.mrf.mxu1 }
 0x371   : > { %5324 = vst [vmem:[%s6840_s9 + $0x20] sm:$0xff] %v5264_v41   ;;  %v4316_v40 = vmul.f32 0.1, %v4284_v3  ;;  %v4246_v48 = vadd.f32 %v4158_v35, %v7666_v43  ;;  %v5692_v38 = vadd.f32 %v5691_v21, %v5690_v33  ;;  %v4170_v43 = vpop.f32.mrf.mxu0 }
 0x372   : > { %v4411_v16 = vadd.f32 %v4379_v50, %v4347_v27  ;;  %v5693_v10 = vpop.f32.mrf.mxu1 }
 0x373   : > { %v4285_v32 = vadd.f32 %v7720_v29, %v4246_v48  ;;  %v4163_v58 = vadd.f32 %v5942_v57, %v5692_v38  ;;  %v4348_v49 = vmax.f32 %v4284_v3, %v4316_v40  ;;  %v5947_v8 = vpop.f32.mrf.mxu0 }
 0x374   : > { %v5269_v1 = vpack.c.bf16 %v4411_v16, %v4410_v39  ;;  %v5694_v52 = vpop.f32.mrf.mxu1 }
 0x375   : > { %v4317_v28 = vmul.f32 0.1, %v4285_v32  ;;  %v4247_v31 = vadd.f32 %v4163_v58, %v7658_v54  ;;  %v5695_v11 = vadd.f32 %v5694_v52, %v5693_v10  ;;  %v4412_v19 = vadd.f32 %v4380_v20, %v4348_v49  ;;  %v4173_v3 = vpop.f32.mrf.mxu0 }
 0x376   : > { %5325 = vst [vmem:[%s6840_s9 + $0x28] sm:$0xff] %v5269_v1   ;;  %v5696_v5 = vpop.f32.mrf.mxu1  ;;  %v6349_v1 = vld [vmem:[%s6840_s9 + $0x40] sm:$0xff]  }
 0x377   : > { %v4349_v15 = vmax.f32 %v4285_v32, %v4317_v28  ;;  %v4286_v26 = vadd.f32 %v7720_v29, %v4247_v31  ;;  %v4166_v2 = vadd.f32 %v5943_v23, %v5695_v11  ;;  %v5950_v32 = vpop.f32.mrf.mxu0  ;;  %v4384_v49 = vunpack.c.l.bf16 %v6349_v1 }
 0x378   : > { %v5697_v57 = vpop.f32.mrf.mxu1  ;;  %v4385_v28 = vunpack.c.h.bf16 %v6349_v1 }
 0x379   : > { %v4413_v4 = vadd.f32 %v4381_v55, %v4349_v15  ;;  %v4318_v18 = vmul.f32 0.1, %v4286_v26  ;;  %v4248_v51 = vadd.f32 %v4166_v2, %v7663_v34  ;;  %v5698_v56 = vadd.f32 %v5697_v57, %v5696_v5  ;;  %v4186_v5 = vpop.f32.mrf.mxu0 }
 0x37a   : > { %v5699_v41 = vpop.f32.mrf.mxu1 }
 0x37b   : > { %v5274_v54 = vpack.c.bf16 %v4413_v4, %v4412_v19  ;;  %v4287_v7 = vadd.f32 %v7720_v29, %v4248_v51  ;;  %v4171_v22 = vadd.f32 %v5698_v56, %v4170_v43  ;;  %v4350_v50 = vmax.f32 %v4286_v26, %v4318_v18  ;;  %v5951_v56 = vpop.f32.mrf.mxu0 }
 0x37c   : > { %v5700_v36 = vpop.f32.mrf.mxu1 }
 0x37d   : > { %5326 = vst [vmem:[%s6840_s9 + $0x30] sm:$0xff] %v5274_v54   ;;  %v4319_v23 = vmul.f32 0.1, %v4287_v7  ;;  %v4249_v0 = vadd.f32 %v4171_v22, %v7671_v9  ;;  %v5701_v33 = vadd.f32 %v5700_v36, %v5699_v41  ;;  %v4414_v40 = vadd.f32 %v4382_v17, %v4350_v50  ;;  %v6350_v22 = vld [vmem:[%s6840_s9 + $0x48] sm:$0xff]  }
 0x37e   : > { %v5702_v34 = vpop.f32.mrf.mxu1  ;;  %v4386_v6 = vunpack.c.l.bf16 %v6350_v22  ;;  %v4387_v36 = vunpack.c.h.bf16 %v6350_v22 }
 0x37f   : > { %v4351_v35 = vmax.f32 %v4287_v7, %v4319_v23  ;;  %v4288_v27 = vadd.f32 %v7720_v29, %v4249_v0  ;;  %v4174_v21 = vadd.f32 %v5701_v33, %v4173_v3  ;;  %v4189_v0 = vpop.f32.mrf.mxu0 }
 0x380   : > { %v5703_v48 = vpop.f32.mrf.mxu1 }
 0x381   : > { %v4415_v38 = vadd.f32 %v4383_v44, %v4351_v35  ;;  %v4320_v39 = vmul.f32 0.1, %v4288_v27  ;;  %v4250_v16 = vadd.f32 %v4174_v21, %v7676_v62  ;;  %v5704_v10 = vadd.f32 %v5703_v48, %v5702_v34 }
 0x382   : > { %v5705_v58 = vpop.f32.mrf.mxu1 }
 0x383   : > { %v5279_v30 = vpack.c.bf16 %v4415_v38, %v4414_v40  ;;  %v4289_v9 = vadd.f32 %v7720_v29, %v4250_v16  ;;  %v4179_v20 = vadd.f32 %v5946_v13, %v5704_v10  ;;  %v4352_v52 = vmax.f32 %v4288_v27, %v4320_v39  ;;  %v5954_v39 = vpop.f32.mrf.mxu0 }
 0x384   : > { %v5706_v55 = vpop.f32.mrf.mxu1 }
 0x385   : > { %5327 = vst [vmem:[%s6840_s9 + $0x38] sm:$0xff] %v5279_v30   ;;  %v4321_v31 = vmul.f32 0.1, %v4289_v9  ;;  %v4251_v11 = vadd.f32 %v4179_v20, %v7669_v60  ;;  %v5707_v43 = vadd.f32 %v5706_v55, %v5705_v58  ;;  %v4416_v19 = vadd.f32 %v4384_v49, %v4352_v52  ;;  %v6351_v30 = vld [vmem:[%s6840_s9 + $0x50] sm:$0xff]  }
 0x386   : > { %v5708_v62 = vpop.f32.mrf.mxu1  ;;  %v4389_v49 = vunpack.c.h.bf16 %v6351_v30 }
 0x387   : > { %v4353_v15 = vmax.f32 %v4289_v9, %v4321_v31  ;;  %v4290_v26 = vadd.f32 %v7720_v29, %v4251_v11  ;;  %v4182_v2 = vadd.f32 %v5947_v8, %v5707_v43  ;;  %v4388_v9 = vunpack.c.l.bf16 %v6351_v30  ;;  %v4202_v31 = vpop.f32.mrf.mxu0 }
 0x388   : > { %v5709_v13 = vpop.f32.mrf.mxu1 }
 0x389   : > { %v4417_v57 = vadd.f32 %v4385_v28, %v4353_v15  ;;  %v4322_v4 = vmul.f32 0.1, %v4290_v26  ;;  %v4252_v18 = vadd.f32 %v4182_v2, %v7674_v42  ;;  %v5710_v51 = vadd.f32 %v5709_v13, %v5708_v62  ;;  %v5955_v13 = vpop.f32.mrf.mxu0 }
 0x38a   : > { %v5711_v41 = vpop.f32.mrf.mxu1 }
 0x38b   : > { %v5284_v54 = vpack.c.bf16 %v4417_v57, %v4416_v19  ;;  %v4291_v60 = vadd.f32 %v7720_v29, %v4252_v18  ;;  %v4187_v7 = vadd.f32 %v5710_v51, %v4186_v5  ;;  %v4354_v17 = vmax.f32 %v4290_v26, %v4322_v4  ;;  %v6352_v51 = vld [vmem:[%s6840_s9 + $0x58] sm:$0xff]  }
 0x38c   : > { %v5712_v50 = vpop.f32.mrf.mxu1 }
 0x38d   : > { %5328 = vst [vmem:[%s6840_s9 + $0x40] sm:$0xff] %v5284_v54   ;;  %v4323_v8 = vmul.f32 0.1, %v4291_v60  ;;  %v4253_v44 = vadd.f32 %v4187_v7, %v7679_v14  ;;  %v5713_v23 = vadd.f32 %v5712_v50, %v5711_v41  ;;  %v4418_v35 = vadd.f32 %v4386_v6, %v4354_v17  ;;  %v4205_v17 = vpop.f32.mrf.mxu0 }
 0x38e   : > { %v5714_v42 = vpop.f32.mrf.mxu1  ;;  %v4390_v41 = vunpack.c.l.bf16 %v6352_v51  ;;  %v4391_v7 = vunpack.c.h.bf16 %v6352_v51 }
 0x38f   : > { %v4355_v33 = vmax.f32 %v4291_v60, %v4323_v8  ;;  %v4292_v3 = vadd.f32 %v7720_v29, %v4253_v44  ;;  %v4190_v34 = vadd.f32 %v5713_v23, %v4189_v0  ;;  %v5958_v0 = vpop.f32.mrf.mxu0 }
 0x390   : > { %v5715_v27 = vpop.f32.mrf.mxu1 }
 0x391   : > { %v4419_v21 = vadd.f32 %v4387_v36, %v4355_v33  ;;  %v4324_v40 = vmul.f32 0.1, %v4292_v3  ;;  %v4254_v48 = vadd.f32 %v4190_v34, %v7682_v46  ;;  %v5716_v38 = vadd.f32 %v5715_v27, %v5714_v42 }
 0x392   : > { %v5717_v16 = vpop.f32.mrf.mxu1 }
 0x393   : > { %v5289_v10 = vpack.c.bf16 %v4419_v21, %v4418_v35  ;;  %v4293_v14 = vadd.f32 %v7720_v29, %v4254_v48  ;;  %v4195_v58 = vadd.f32 %v5950_v32, %v5716_v38  ;;  %v4356_v20 = vmax.f32 %v4292_v3, %v4324_v40  ;;  %v6353_v40 = vld [vmem:[%s6840_s9 + $0x60] sm:$0xff]  }
 0x394   : > { %v5718_v1 = vpop.f32.mrf.mxu1  ;;  %v4392_v48 = vunpack.c.l.bf16 %v6353_v40 }
 0x395   : > { %5329 = vst [vmem:[%s6840_s9 + $0x48] sm:$0xff] %v5289_v10   ;;  %v4325_v52 = vmul.f32 0.1, %v4293_v14  ;;  %v4255_v55 = vadd.f32 %v4195_v58, %v7685_v37  ;;  %v5719_v28 = vadd.f32 %v5718_v1, %v5717_v16  ;;  %v4420_v62 = vadd.f32 %v4388_v9, %v4356_v20  ;;  %v4218_v10 = vpop.f32.mrf.mxu0 }
 0x396   : > { %v5720_v46 = vpop.f32.mrf.mxu1 }
 0x397   : > { %v4357_v11 = vmax.f32 %v4293_v14, %v4325_v52  ;;  %v4294_v43 = vadd.f32 %v7720_v29, %v4255_v55  ;;  %v4198_v5 = vadd.f32 %v5951_v56, %v5719_v28  ;;  %v4393_v14 = vunpack.c.h.bf16 %v6353_v40 }
 0x398   : > { %v5721_v32 = vpop.f32.mrf.mxu1 }
 0x399   : > { %v4421_v15 = vadd.f32 %v4389_v49, %v4357_v11  ;;  %v4326_v26 = vmul.f32 0.1, %v4294_v43  ;;  %v4256_v2 = vadd.f32 %v4198_v5, %v7688_v61  ;;  %v5722_v19 = vadd.f32 %v5721_v32, %v5720_v46  ;;  %v6354_v32 = vld [vmem:[%s6840_s9 + $0x68] sm:$0xff]  }
 0x39a   : > { %v5723_v57 = vpop.f32.mrf.mxu1 }
 0x39b   : > { %v5294_v4 = vpack.c.bf16 %v4421_v15, %v4420_v62  ;;  %v4295_v37 = vadd.f32 %v7720_v29, %v4256_v2  ;;  %v4203_v18 = vadd.f32 %v5722_v19, %v4202_v31  ;;  %v4358_v54 = vmax.f32 %v4294_v43, %v4326_v26 }
 0x39c   : > { %v5724_v60 = vpop.f32.mrf.mxu1  ;;  %v4394_v15 = vunpack.c.l.bf16 %v6354_v32 }
 0x39d   : > { %5330 = vst [vmem:[%s6840_s9 + $0x50] sm:$0xff] %v5294_v4   ;;  %v4327_v56 = vmul.f32 0.1, %v4295_v37  ;;  %v4257_v22 = vadd.f32 %v4203_v18, %v7691_v53  ;;  %v5725_v6 = vadd.f32 %v5724_v60, %v5723_v57  ;;  %v4422_v44 = vadd.f32 %v4390_v41, %v4358_v54 }
 0x39e   : > { %v5726_v61 = vpop.f32.mrf.mxu1 }
 0x39f   : > { %v4359_v50 = vmax.f32 %v4295_v37, %v4327_v56  ;;  %v4296_v36 = vadd.f32 %v7720_v29, %v4257_v22  ;;  %v4206_v8 = vadd.f32 %v5725_v6, %v4205_v17 }
 0x3a0   : > { %v5727_v23 = vpop.f32.mrf.mxu1 }
 0x3a1   : > { %v4423_v42 = vadd.f32 %v4391_v7, %v4359_v50  ;;  %v4328_v33 = vmul.f32 0.1, %v4296_v36  ;;  %v4258_v3 = vadd.f32 %v4206_v8, %v7694_v25  ;;  %v5728_v34 = vadd.f32 %v5727_v23, %v5726_v61 }
 0x3a2   : > { %v5729_v35 = vpop.f32.mrf.mxu1 }
 0x3a3   : > { %v5299_v27 = vpack.c.bf16 %v4423_v42, %v4422_v44  ;;  %v4297_v53 = vadd.f32 %v7720_v29, %v4258_v3  ;;  %v4211_v21 = vadd.f32 %v5954_v39, %v5728_v34  ;;  %v4360_v38 = vmax.f32 %v4296_v36, %v4328_v33  ;;  %v5959_v39 = vpop.f32.mrf.mxu0  ;;  %v6355_v36 = vld [vmem:[%s6840_s9 + $0x70] sm:$0xff]  }
 0x3a4   : > { %v5730_v16 = vpop.f32.mrf.mxu1  ;;  %v4396_v8 = vunpack.c.l.bf16 %v6355_v36  ;;  %v4397_v44 = vunpack.c.h.bf16 %v6355_v36 }
 0x3a5   : > { %5331 = vst [vmem:[%s6840_s9 + $0x58] sm:$0xff] %v5299_v27   ;;  %v4329_v58 = vmul.f32 0.1, %v4297_v53  ;;  %v4259_v30 = vadd.f32 %v4211_v21, %v7697_v24  ;;  %v5731_v9 = vadd.f32 %v5730_v16, %v5729_v35  ;;  %v4424_v52 = vadd.f32 %v4392_v48, %v4360_v38  ;;  %v4221_v19 = vpop.f32.mrf.mxu0  ;;  %v6356_v16 = vld [vmem:[%s6840_s9 + $0x78] sm:$0xff]  }
 0x3a6   : > { %v5732_v20 = vpop.f32.mrf.mxu1 }
 0x3a7   : > { %v4361_v25 = vmax.f32 %v4297_v53, %v4329_v58  ;;  %v4298_v1 = vadd.f32 %v7720_v29, %v4259_v30  ;;  %v4214_v49 = vadd.f32 %v5955_v13, %v5731_v9  ;;  %v4395_v13 = vunpack.c.h.bf16 %v6354_v32 }
 0x3a8   : > { %v5733_v55 = vpop.f32.mrf.mxu1 }
 0x3a9   : > { %v4425_v28 = vadd.f32 %v4393_v14, %v4361_v25  ;;  %v4330_v31 = vmul.f32 0.1, %v4298_v1  ;;  %v4260_v46 = vadd.f32 %v4214_v49, %v7700_v59  ;;  %v5734_v11 = vadd.f32 %v5733_v55, %v5732_v20 }
 0x3aa   : > { %v5735_v43 = vpop.f32.mrf.mxu1 }
 0x3ab   : > { %v5304_v5 = vpack.c.bf16 %v4425_v28, %v4424_v52  ;;  %v4299_v24 = vadd.f32 %v7720_v29, %v4260_v46  ;;  %v4219_v62 = vadd.f32 %v5734_v11, %v4218_v10  ;;  %v4362_v26 = vmax.f32 %v4298_v1, %v4330_v31 }
 0x3ac   : > { %v5736_v2 = vpop.f32.mrf.mxu1  ;;  %v4398_v10 = vunpack.c.l.bf16 %v6356_v16 }
 0x3ad   : > { %5332 = vst [vmem:[%s6840_s9 + $0x60] sm:$0xff] %v5304_v5   ;;  %v4331_v57 = vmul.f32 0.1, %v4299_v24  ;;  %v4261_v4 = vadd.f32 %v4219_v62, %v7703_v63  ;;  %v5737_v37 = vadd.f32 %v5736_v2, %v5735_v43  ;;  %v4426_v54 = vadd.f32 %v4394_v15, %v4362_v26 }
 0x3ae   : > { %v5738_v18 = vpop.f32.mrf.mxu1 }
 0x3af   : > { %v4363_v59 = vmax.f32 %v4299_v24, %v4331_v57  ;;  %v4300_v51 = vadd.f32 %v7720_v29, %v4261_v4  ;;  %v4222_v41 = vadd.f32 %v5737_v37, %v4221_v19 }
 0x3b0   : > { %v5739_v60 = vpop.f32.mrf.mxu1 }
 0x3b1   : > { %v4427_v7 = vadd.f32 %v4395_v13, %v4363_v59  ;;  %v4332_v56 = vmul.f32 0.1, %v4300_v51  ;;  %v4262_v22 = vadd.f32 %v4222_v41, %v7706_v12  ;;  %v5740_v6 = vadd.f32 %v5739_v60, %v5738_v18 }
 0x3b2   : > { %v5741_v17 = vpop.f32.mrf.mxu1 }
 0x3b3   : > { %v5309_v61 = vpack.c.bf16 %v4427_v7, %v4426_v54  ;;  %v4301_v50 = vadd.f32 %v7720_v29, %v4262_v22  ;;  %v4227_v63 = vadd.f32 %v5958_v0, %v5740_v6  ;;  %v4364_v42 = vmax.f32 %v4300_v51, %v4332_v56 }
 0x3b4   : > { %v5742_v23 = vpop.f32.mrf.mxu1 }
 0x3b5   : > { %5333 = vst [vmem:[%s6840_s9 + $0x68] sm:$0xff] %v5309_v61   ;;  %v4333_v33 = vmul.f32 0.1, %v4301_v50  ;;  %v4263_v3 = vadd.f32 %v4227_v63, %v7709_v47  ;;  %v5743_v34 = vadd.f32 %v5742_v23, %v5741_v17  ;;  %v4428_v53 = vadd.f32 %v4396_v8, %v4364_v42 }
 0x3b6   : > { %v4399_v47 = vunpack.c.h.bf16 %v6356_v16 }
 0x3b7   : > { %v4365_v35 = vmax.f32 %v4301_v50, %v4333_v33  ;;  %v4302_v12 = vadd.f32 %v7720_v29, %v4263_v3  ;;  %v4230_v27 = vadd.f32 %v5959_v39, %v5743_v34 }
 0x3b9   : > { %v4429_v0 = vadd.f32 %v4397_v44, %v4365_v35  ;;  %v4334_v21 = vmul.f32 0.1, %v4302_v12  ;;  %v4264_v40 = vadd.f32 %v4230_v27, %v7712_v45 }
 0x3bb   : > { %v5314_v48 = vpack.c.bf16 %v4429_v0, %v4428_v53  ;;  %v4303_v38 = vadd.f32 %v7720_v29, %v4264_v40  ;;  %v4366_v14 = vmax.f32 %v4302_v12, %v4334_v21 }
 0x3bd   : > { %5334 = vst [vmem:[%s6840_s9 + $0x70] sm:$0xff] %v5314_v48   ;;  %v4335_v58 = vmul.f32 0.1, %v4303_v38  ;;  %v4430_v9 = vadd.f32 %v4398_v10, %v4366_v14 }
 0x3bf   : > { %v4367_v30 = vmax.f32 %v4303_v38, %v4335_v58 }
 0x3c1   : > { %v4431_v20 = vadd.f32 %v4399_v47, %v4367_v30 }
 0x3c3   : > { %v5319_v45 = vpack.c.bf16 %v4431_v20, %v4430_v9 }
 0x3c5   : > { %5335 = vst [vmem:[%s6840_s9 + $0x78] sm:$0xff] %v5319_v45  }
 0x3c6   : > { %6454 = shalt.err (!%p6451_p4)
}
 0x3c7   : > { %s6455_s17 = scalar_lea.hbm %s7821_s21, 2048  ;;  %s6459_s14 = scalar_lea.hbm %s7952_s6, 4096 }
 0x3c8   : > { %p6456_p12 = scmp.ne.s32.totalorder %s7821_s21, %s6455_s17  ;;  %p6460_p8 = scmp.lt.s32.totalorder %s7821_s21, %s7952_s6 }
 0x3c9   : > { %p6461_p9 = scmp.lt.s32.totalorder %s6459_s14, %s6455_s17 }
 0x3ca   : > { %p6457_p1 = pnand %p6456_p12, %p6756_p0 }
 0x3cb   : > { %p6462_p7 = por %p6461_p9, %p6460_p8 }
 0x3cc   : > { %p6458_p6 = pneg %p6457_p1 }
 0x3ce   : > { %p6463_p2 = pnand %p6462_p7, %p6458_p6 }
 0x3d0   : > { %6466 = shalt.err (!%p6463_p2)
}
 0x3d1   : > { %s6574_s24 = smov 64   ;;  %s6575_s16 = smov 4  }
 0x3d2   : > { %5969 = dma.vmem_to_hbm [thread:$0]  (%p6756_p0), %s7823_s18, 2048, %s7821_s21, %s4593_s25, %s6574_s24, %s6574_s24, %s6575_s16  }
 0x3d3 PF: > { %s7953_s30 = sld [smem:[#allocation14_spill]]  ;;  %p5986_p5 = scmp.ge.s32.totalorder %s6565_s28, 2 }
 0x3d4   : > { %p7954_p13 = scmp.ne.s32.totalorder %s7927_s11, 0 }
 0x3d6   : > { %p5982_p3 = pnand %p5986_p5, %p7954_p13 }
 0x3d8   : > { %p5983_p10 = pneg %p5982_p3 }
 0x3d9   : > { %s4621_s10 = sand.u32 1, %s7953_s30  }
 0x3da   : > { %s4622_s15 = scalar_lea.sflag [#allocation5], %s4621_s10 }
 0x3db   : > { %6520 = dma.done.wait (%p5983_p10), %s4622_s15, 2048  }
 0x3dc   : > { %6522 = vsyncadd (%p5983_p10), %s4622_s15, 4294965248  ;;  %s24_s28 = sadd.s32 1, %s6565_s28   ;;  %s7955_s2 = sld [smem:[#allocation13_spill]] }
 0x3dd   : > { %p21_p11 = scmp.ge.s32.totalorder %s24_s28, 6   ;;  %s7956_s20 = sld [smem:[#allocation19_spill]] }
 0x3de   : > { %s7957_s8 = sld [smem:[#allocation21_spill]]  ;;  %s7961_s18 = smov %s6529_s19 }
 0x3df   : > { %s7958_s25 = sld [smem:[#allocation17_spill]]  ;;  %s7963_s21 = smov %s6541_s22 }
 0x3e0   : > { %s7959_s1 = sld [smem:[#allocation18_spill]]  ;;  %s7964_s22 = smov %s6545_s23 }
 0x3e1   : > { %s7960_s27 = sld [smem:[#allocation20_spill]]  ;;  %s7966_s24 = smov %s6557_s26 }
 0x3e2   : > { %s7962_s19 = smov %s7955_s2  ;;  %23 = sbr.rel (!%p21_p11) target bundleno = 16 (0x10), region = 125 }
 0x3e4   : > { %s7965_s23 = smov %s7957_s8 }
 0x3e6   : > { %s7967_s26 = smov %s7959_s1 }
 0x3e7   :  { %4627 = vsyncpa [#allocation4], 1 }
 0x3e8   :  { %4629 = vsyncpa [#allocation4 + $0x1], 1 }
 0x3e9   :  { %4630 = vsyncpa [#allocation7], 1 }
 0x3ea   :  { %4632 = vsyncpa [#allocation7 + $0x1], 1 }
 0x3eb   :  { %4633 = vsyncpa [#allocation5], 1 }
 0x3ec   :  { %4635 = vsyncpa [#allocation5 + $0x1], 1 }

</bundles_post_ra>
